<compile_context>
chip_gen: v7x
topology: tpu7x:2x2x1
jax: 0.10.0
libtpu: 0.0.40
codegen_flags: <defaults>
</compile_context>

<pallas_src>
import functools
import math

import jax
import jax.numpy as jnp
from jax.experimental import pallas as pl
from jax.experimental.pallas import tpu as pltpu

# ------------------ scaled-down hyper-parameters ---------------------------
PATCH = 14                # dinov2_vitb14 patch size
FEATURE_DIM = 64          # dinov2_vitb14: 768
VIT_DEPTH = 2             # dinov2_vitb14: 12
VIT_HEADS = 4             # dinov2_vitb14: 12
MLP_RATIO = 4
CLS_ATTN_HEADS = 8        # nn.MultiheadAttention(embed_dim, num_heads=8)
NUM_CLASSES = 2
NUM_PATCHES = 2           # "num_patches" arg of the classifier
LN_EPS = 1e-6
BN_EPS = 1e-5
PATCH_K = 3 * PATCH * PATCH      # 588
PATCH_K_PAD = 640                # zero-padded contraction dim (multiple of 128)
HEAD_HIDDEN = 512
HEAD_OUT_PAD = 128               # fc2 logits padded to one full lane tile
NB_IMAGES = 2                    # images packed per grid step

_VMEM = pl.BlockSpec(memory_space=pltpu.MemorySpace.VMEM)


def _cparams(dims=None):
    return pltpu.CompilerParams(
        dimension_semantics=dims,
        vmem_limit_bytes=32 * 1024 * 1024,   # safe on v5e/v6e/v7x (64 MiB phys)
    )


# ====================== in-kernel helper math ==============================
def _ln(x, g, b, eps=LN_EPS):
    """Row-wise LayerNorm in f32."""
    mu = jnp.mean(x, axis=-1, keepdims=True)
    var = jnp.mean(jnp.square(x - mu), axis=-1, keepdims=True)
    return (x - mu) * jax.lax.rsqrt(var + eps) * g + b


def _softmax_rows(s):
    s = s - jnp.max(s, axis=-1, keepdims=True)
    p = jnp.exp(s)
    return p / jnp.sum(p, axis=-1, keepdims=True)


def _attn_heads(qkv_tok, num_heads, d):
    """Multi-head self-attention for one sequence.

    qkv_tok: (S, 3*d) bf16 with Q columns pre-scaled by 1/sqrt(dh) at init.
    Returns the lane-order concatenation of all head outputs, (S, d) f32; the
    output projection is applied by the caller as ONE fused matmul."""
    dh = d // num_heads
    outs = []
    # TODO(synk): head slices (dh=16/8 lanes) are not 128-aligned at this
    # scaled-down size; the masked lane ops are pure VPU/XLU filler.
    for h in range(num_heads):           # static unroll
        lo = h * dh
        qh = qkv_tok[:, lo:lo + dh]
        kh = qkv_tok[:, d + lo:d + lo + dh]
        vh = qkv_tok[:, 2 * d + lo:2 * d + lo + dh]
        # contract the last axes directly (no .T / XLU transpose)
        s = jax.lax.dot_general(qh, kh, (((1,), (1,)), ((), ())),
                                preferred_element_type=jnp.float32)
        p = _softmax_rows(s)
        outs.append(jnp.dot(p.astype(jnp.bfloat16), vh,
                            preferred_element_type=jnp.float32))
    return jnp.concatenate(outs, axis=-1)        # (S, d) f32


# =========================== Pallas kernels ================================
def _stem_kernel(p_ref, w_ref, add_ref, o_ref):
    """Patch embed (conv-as-matmul) + CLS slot + positional embedding for one
    chunk of nb images (nb*T rows packed into a single MXU matmul)."""
    tok = jnp.dot(p_ref[0], w_ref[...], preferred_element_type=jnp.float32)
    o_ref[0] = (tok + add_ref[...]).astype(o_ref.dtype)


def _blocks_kernel(tok_ref, ln1_g, ln1_b, qkv_w, qkv_b, proj_w, proj_b,
                   ln2_g, ln2_b, fc1_w, fc1_b, fc2_w, fc2_b,
                   cls_ref, tok_vmem, *, num_heads, nb, t):
    """One depth step of the fused ViT for one chunk of nb images.

    grid = (chunks, depth).  The f32 token stream lives in a VMEM scratch
    carried across the depth axis; block-l weights are streamed via the
    depth-indexed BlockSpecs (prefetched by the pipeline).  Only the CLS rows
    are written to HBM, on the last depth step."""
    l = pl.program_id(1)

    @pl.when(l == 0)
    def _():
        tok_vmem[...] = tok_ref[0].astype(jnp.float32)

    x = tok_vmem[...]                                         # (nb*t, D) f32
    d = x.shape[-1]

    # --- attention branch: x + proj(attn(ln1(x)))
    h = _ln(x, ln1_g[0], ln1_b[0])
    qkv = jnp.dot(h.astype(jnp.bfloat16), qkv_w[0],
                  preferred_element_type=jnp.float32) + qkv_b[0]     # (nb*t, 3D)
    qkv = qkv.astype(jnp.bfloat16)
    per_img = [_attn_heads(qkv[i * t:(i + 1) * t, :], num_heads, d)
               for i in range(nb)]
    o = jnp.concatenate(per_img, axis=0)                      # (nb*t, D) f32
    attn = jnp.dot(o.astype(jnp.bfloat16), proj_w[0],
                   preferred_element_type=jnp.float32) + proj_b[0]
    # TODO(synk): dinov2 blocks also apply LayerScale (ls1/ls2); omitted since
    # only random (non-checkpoint) weights are available here.
    x = x + attn

    # --- MLP branch: x + fc2(gelu(fc1(ln2(x))))
    h = _ln(x, ln2_g[0], ln2_b[0])
    h = jnp.dot(h.astype(jnp.bfloat16), fc1_w[0],
                preferred_element_type=jnp.float32) + fc1_b[0]
    # TODO(synk): PyTorch nn.GELU() default is the exact erf form; tanh approx here.
    h = jax.nn.gelu(h, approximate=True)
    h = jnp.dot(h.astype(jnp.bfloat16), fc2_w[0],
                preferred_element_type=jnp.float32) + fc2_b[0]
    x = x + h

    tok_vmem[...] = x

    @pl.when(l == pl.num_programs(1) - 1)
    def _():
        # CLS token = row 0 of each image's t-row group.
        cls_ref[0] = jnp.concatenate(
            [x[i * t:i * t + 1, :] for i in range(nb)], axis=0)


def _cls_head_kernel(x_ref, nrm_g, nrm_b, in_w, in_b, out_w, out_b,
                     w1, b1, bn_g, bn_b, bn_m, bn_v, w2, b2, o_ref,
                     *, batch, p_seq, num_heads):
    """Fused: double final LayerNorm + nn.MultiheadAttention over the P CLS
    tokens + classifier head (fc1 + BatchNorm(running stats) + ReLU + fc2),
    for the whole batch in a single launch."""
    d = x_ref.shape[-1]
    x = x_ref[...]                                            # (B*P, D) f32
    g, b = nrm_g[...], nrm_b[...]
    # transformer(x) already returns the normed CLS token and the module then
    # applies transformer.norm(x) again -> LayerNorm applied twice (as spec'd).
    x = _ln(_ln(x, g, b), g, b)
    qkv = (jnp.dot(x.astype(jnp.bfloat16), in_w[...],
                   preferred_element_type=jnp.float32) + in_b[...]
           ).astype(jnp.bfloat16)                             # (B*P, 3D)
    # attention over the P sequence positions, per batch element
    outs = [_attn_heads(qkv[bi * p_seq:(bi + 1) * p_seq, :], num_heads, d)
            for bi in range(batch)]
    # Stack p-major (row = p*batch + b) so the flattened fc1 below only needs
    # contiguous sublane slices instead of an in-kernel (B, P*D) reshape.
    o_pm = jnp.concatenate(
        [outs[bi][p:p + 1, :] for p in range(p_seq) for bi in range(batch)],
        axis=0)                                               # (P*B, D)
    attn = jnp.dot(o_pm.astype(jnp.bfloat16), out_w[...],
                   preferred_element_type=jnp.float32) + out_b[...]

    # classifier fc1 on the flattened (B, P*D) features:
    #   h[b] = sum_p attn[p*B + b, :] @ w1[p*D:(p+1)*D, :]
    h = jnp.zeros((batch, w1.shape[-1]), jnp.float32)
    for p in range(p_seq):
        xp = attn[p * batch:(p + 1) * batch, :].astype(jnp.bfloat16)
        h = h + jnp.dot(xp, w1[p * d:(p + 1) * d, :],
                        preferred_element_type=jnp.float32)
    h = h + b1[...]
    h = (h - bn_m[...]) * jax.lax.rsqrt(bn_v[...] + BN_EPS) * bn_g[...] + bn_b[...]
    h = jnp.maximum(h, 0.0)
    # Dropout(0.3): identity under inference (eval) semantics.
    o_ref[...] = (jnp.dot(h.astype(jnp.bfloat16), w2[...],
                          preferred_element_type=jnp.float32) + b2[...]
                  ).astype(o_ref.dtype)


# ============================ wrappers =====================================
def vit_stem(vit, imgs, nb):
    """imgs: (N, C, H, W) f32 -> packed tokens (N//nb, nb*T, D) bf16."""
    N, C, H, W = imgs.shape
    nH, nW = H // PATCH, W // PATCH
    T = 1 + nH * nW
    D = FEATURE_DIM
    chunks = N // nb
    patches = imgs.reshape(N, C, nH, PATCH, nW, PATCH)
    patches = patches.transpose(0, 2, 4, 1, 3, 5).reshape(N, nH * nW, PATCH_K)
    # zero row for the CLS slot + zero-pad K 588 -> 640 (lane-dense operand)
    patches = jnp.pad(patches, ((0, 0), (1, 0), (0, PATCH_K_PAD - PATCH_K)))
    patches = patches.reshape(chunks, nb * T, PATCH_K_PAD).astype(jnp.bfloat16)
    stem_add = jnp.concatenate(
        [vit["cls"] + vit["pos"][0:1], vit["patch_b"] + vit["pos"][1:]], axis=0)
    stem_add = jnp.tile(stem_add, (nb, 1))                    # (nb*T, D)

    return pl.pallas_call(
        _stem_kernel,
        out_shape=jax.ShapeDtypeStruct((chunks, nb * T, D), jnp.bfloat16),
        grid=(chunks,),
        in_specs=[pl.BlockSpec((1, nb * T, PATCH_K_PAD), lambda c: (c, 0, 0)),
                  pl.BlockSpec((PATCH_K_PAD, D), lambda c: (0, 0)),
                  pl.BlockSpec((nb * T, D), lambda c: (0, 0))],
        out_specs=pl.BlockSpec((1, nb * T, D), lambda c: (c, 0, 0)),
        compiler_params=_cparams(("parallel",)),
    )(patches, vit["patch_w"], stem_add)


def vit_blocks(blocks, tok, nb, t):
    """tok: (chunks, nb*T, D) bf16 -> CLS tokens (chunks, nb, D) f32.
    All VIT_DEPTH blocks run inside one pallas_call (depth = inner grid axis)."""
    chunks = tok.shape[0]
    D = FEATURE_DIM
    depth = blocks["qkv_w"].shape[0]
    names = ["ln1_g", "ln1_b", "qkv_w", "qkv_b", "proj_w", "proj_b",
             "ln2_g", "ln2_b", "fc1_w", "fc1_b", "fc2_w", "fc2_b"]
    weights = [blocks[n] for n in names]
    chunk_map = lambda c, l: (c, 0, 0)
    depth_map = lambda c, l: (l, 0, 0)
    w_specs = [pl.BlockSpec((1,) + a.shape[1:], depth_map) for a in weights]

    return pl.pallas_call(
        functools.partial(_blocks_kernel, num_heads=VIT_HEADS, nb=nb, t=t),
        out_shape=jax.ShapeDtypeStruct((chunks, nb, D), jnp.float32),
        grid=(chunks, depth),
        in_specs=[pl.BlockSpec((1, nb * t, D), chunk_map)] + w_specs,
        out_specs=pl.BlockSpec((1, nb, D), chunk_map),
        scratch_shapes=[pltpu.VMEM((nb * t, D), jnp.float32)],
        compiler_params=_cparams(("parallel", "arbitrary")),
    )(tok, *weights)


def cls_head(params, cls, batch, p_seq):
    """cls: (B*P, D) f32 -> padded logits (B, HEAD_OUT_PAD) f32."""
    vit, mha = params["vit"], params["mha"]
    args = [cls, vit["norm_g"], vit["norm_b"], mha["in_w"], mha["in_b"],
            mha["out_w"], mha["out_b"], params["fc1_w"], params["fc1_b"],
            params["bn_g"], params["bn_b"], params["bn_mean"], params["bn_var"],
            params["fc2_w"], params["fc2_b"]]
    return pl.pallas_call(
        functools.partial(_cls_head_kernel, batch=batch, p_seq=p_seq,
                          num_heads=CLS_ATTN_HEADS),
        out_shape=jax.ShapeDtypeStruct((batch, HEAD_OUT_PAD), jnp.float32),
        in_specs=[_VMEM] * len(args),
        out_specs=_VMEM,
        compiler_params=_cparams(),
    )(*args)


# ============================ parameters ===================================
def init_params(key, img_size=28):
    keys = iter(jax.random.split(key, 48))
    D = FEATURE_DIM
    T = 1 + (img_size // PATCH) ** 2

    def w(k, shape, dtype=jnp.float32):
        return (jax.random.normal(k, shape, jnp.float32) * 0.02).astype(dtype)

    vit = {}
    pw = w(next(keys), (PATCH_K, D))
    vit["patch_w"] = jnp.pad(pw, ((0, PATCH_K_PAD - PATCH_K), (0, 0))).astype(jnp.bfloat16)
    vit["patch_b"] = w(next(keys), (1, D))
    vit["cls"] = w(next(keys), (1, D))
    vit["pos"] = w(next(keys), (T, D))

    # 1/sqrt(dh) folded into the Q columns (and Q bias) of the qkv projection
    vit_scale = 1.0 / math.sqrt(D // VIT_HEADS)
    qs = jnp.concatenate([jnp.full((1, D), vit_scale, jnp.float32),
                          jnp.ones((1, 2 * D), jnp.float32)], axis=-1)
    vit["blocks"] = {
        "ln1_g": jnp.ones((VIT_DEPTH, 1, D), jnp.float32),
        "ln1_b": jnp.zeros((VIT_DEPTH, 1, D), jnp.float32),
        "ln2_g": jnp.ones((VIT_DEPTH, 1, D), jnp.float32),
        "ln2_b": jnp.zeros((VIT_DEPTH, 1, D), jnp.float32),
        "qkv_w": (w(next(keys), (VIT_DEPTH, D, 3 * D)) * qs).astype(jnp.bfloat16),
        "qkv_b": w(next(keys), (VIT_DEPTH, 1, 3 * D)) * qs,
        "proj_w": w(next(keys), (VIT_DEPTH, D, D), jnp.bfloat16),
        "proj_b": w(next(keys), (VIT_DEPTH, 1, D)),
        "fc1_w": w(next(keys), (VIT_DEPTH, D, MLP_RATIO * D), jnp.bfloat16),
        "fc1_b": w(next(keys), (VIT_DEPTH, 1, MLP_RATIO * D)),
        "fc2_w": w(next(keys), (VIT_DEPTH, MLP_RATIO * D, D), jnp.bfloat16),
        "fc2_b": w(next(keys), (VIT_DEPTH, 1, D)),
    }
    vit["norm_g"] = jnp.ones((1, D), jnp.float32)
    vit["norm_b"] = jnp.zeros((1, D), jnp.float32)

    mha_scale = 1.0 / math.sqrt(D // CLS_ATTN_HEADS)
    ms = jnp.concatenate([jnp.full((1, D), mha_scale, jnp.float32),
                          jnp.ones((1, 2 * D), jnp.float32)], axis=-1)
    mha = {
        "in_w": (w(next(keys), (D, 3 * D)) * ms).astype(jnp.bfloat16),
        "in_b": w(next(keys), (1, 3 * D)) * ms,
        "out_w": w(next(keys), (D, D), jnp.bfloat16),
        "out_b": w(next(keys), (1, D)),
    }

    fc2_w = w(next(keys), (HEAD_HIDDEN, NUM_CLASSES))
    fc2_b = w(next(keys), (1, NUM_CLASSES))
    return {
        "vit": vit, "mha": mha,
        "fc1_w": w(next(keys), (D * NUM_PATCHES, HEAD_HIDDEN), jnp.bfloat16),
        "fc1_b": w(next(keys), (1, HEAD_HIDDEN)),
        "bn_g": jnp.ones((1, HEAD_HIDDEN), jnp.float32),
        "bn_b": jnp.zeros((1, HEAD_HIDDEN), jnp.float32),
        "bn_mean": jnp.zeros((1, HEAD_HIDDEN), jnp.float32),
        "bn_var": jnp.ones((1, HEAD_HIDDEN), jnp.float32),
        # logits padded to a full 128-lane tile; real logits are cols [:NUM_CLASSES]
        "fc2_w": jnp.pad(fc2_w, ((0, 0), (0, HEAD_OUT_PAD - NUM_CLASSES))).astype(jnp.bfloat16),
        "fc2_b": jnp.pad(fc2_b, ((0, 0), (0, HEAD_OUT_PAD - NUM_CLASSES))),
    }


# ============================ model forward ================================
def dino_classifier_forward(params, x):
    """x: (B, P, C, H, W) float32 -> logits (B, NUM_CLASSES)."""
    B, P, C, H, W = x.shape
    N = B * P
    nb = NB_IMAGES
    assert N % nb == 0, (N, nb)
    t = 1 + (H // PATCH) * (W // PATCH)
    imgs = x.reshape(N, C, H, W)
    vit = params["vit"]

    tok = vit_stem(vit, imgs, nb)                   # (N//nb, nb*T, D) bf16
    cls = vit_blocks(vit["blocks"], tok, nb, t)     # (N//nb, nb, D)  f32, fused depth
    cls = cls.reshape(N, FEATURE_DIM)               # b-major rows (b*P + p)
    logits_pad = cls_head(params, cls, B, P)        # (B, HEAD_OUT_PAD)
    return logits_pad[:, :NUM_CLASSES]


# ================================ main =====================================
if __name__ == "__main__":
    key = jax.random.PRNGKey(0)
    pkey, xkey = jax.random.split(key)
    params = init_params(pkey, img_size=28)
    x = jax.random.normal(xkey, (2, NUM_PATCHES, 3, 28, 28), jnp.float32)
    out = jax.jit(dino_classifier_forward)(params, x)
    out = jax.block_until_ready(out)
    assert out.shape == (2, NUM_CLASSES), out.shape
    print("KERNEL_OK")
</pallas_src>

<mosaic_0001>
module attributes {stable_mosaic.version = 11 : i64} {
  func.func @_stem_kernel(%arg0: i32, %arg1: memref<1x10x640xbf16, #tpu.memory_space<vmem>>, %arg2: memref<640x64xbf16, #tpu.memory_space<vmem>>, %arg3: memref<10x64xf32, #tpu.memory_space<vmem>>, %arg4: memref<1x10x64xbf16, #tpu.memory_space<vmem>>) attributes {dimension_semantics = [#tpu.dimension_semantics<parallel>], iteration_bounds = array<i64: 2>, scalar_prefetch = 0 : i64, scratch_operands = 0 : i64, tpu.core_type = #tpu.core_type<tc>, window_params = [{transform_indices = @transform_0, window_bounds = array<i64: 1, 10, 640>}, {pipeline_mode = #tpu.pipeline_mode<synchronous>, transform_indices = @transform_1, window_bounds = array<i64: 640, 64>}, {pipeline_mode = #tpu.pipeline_mode<synchronous>, transform_indices = @transform_2, window_bounds = array<i64: 10, 64>}, {transform_indices = @transform_3, window_bounds = array<i64: 1, 10, 64>}]} {
    %c0 = arith.constant 0 : index
    %c0_0 = arith.constant 0 : index
    %c0_1 = arith.constant 0 : index
    %0 = vector.load %arg1[%c0, %c0_0, %c0_1] : memref<1x10x640xbf16, #tpu.memory_space<vmem>>, vector<1x10x640xbf16>
    %1 = vector.shape_cast %0 : vector<1x10x640xbf16> to vector<10x640xbf16>
    %c0_2 = arith.constant 0 : index
    %c0_3 = arith.constant 0 : index
    %2 = vector.load %arg2[%c0_2, %c0_3] : memref<640x64xbf16, #tpu.memory_space<vmem>>, vector<640x64xbf16>
    %cst = arith.constant dense<0.000000e+00> : vector<10x64xf32>
    %3 = tpu.matmul %1, %2, %cst {dimension_numbers = #tpu.dot_dimension_numbers<[1], [0], [0], [1], [0, 0, 1, 1], [], []>} : vector<10x640xbf16>, vector<640x64xbf16>, vector<10x64xf32> -> vector<10x64xf32>
    %c0_4 = arith.constant 0 : index
    %c0_5 = arith.constant 0 : index
    %4 = vector.load %arg3[%c0_4, %c0_5] : memref<10x64xf32, #tpu.memory_space<vmem>>, vector<10x64xf32>
    %5 = arith.addf %3, %4 : vector<10x64xf32>
    %6 = arith.truncf %5 : vector<10x64xf32> to vector<10x64xbf16>
    %c0_6 = arith.constant 0 : index
    %c0_7 = arith.constant 0 : index
    %c0_8 = arith.constant 0 : index
    %7 = vector.load %arg4[%c0_6, %c0_7, %c0_8] : memref<1x10x64xbf16, #tpu.memory_space<vmem>>, vector<1x10x64xbf16>
    %8 = vector.shape_cast %7 : vector<1x10x64xbf16> to vector<10x64xbf16>
    %9 = vector.shape_cast %6 : vector<10x64xbf16> to vector<1x10x64xbf16>
    tpu.vector_store %arg4[%c0_6, %c0_7, %c0_8], %9 {strides = array<i32>} : memref<1x10x64xbf16, #tpu.memory_space<vmem>>, vector<1x10x64xbf16>,
    return
  }
  func.func @transform_0(%arg0: i32) -> (i32, i32, i32) {
    %c0_i32 = arith.constant 0 : i32
    %c0_i32_0 = arith.constant 0 : i32
    %c0_i32_1 = arith.constant 0 : i32
    return %arg0, %c0_i32, %c0_i32_0 : i32, i32, i32
  }
  func.func @transform_1(%arg0: i32) -> (i32, i32) {
    %c0_i32 = arith.constant 0 : i32
    %c0_i32_0 = arith.constant 0 : i32
    %c0_i32_1 = arith.constant 0 : i32
    return %c0_i32, %c0_i32_0 : i32, i32
  }
  func.func @transform_2(%arg0: i32) -> (i32, i32) {
    %c0_i32 = arith.constant 0 : i32
    %c0_i32_0 = arith.constant 0 : i32
    %c0_i32_1 = arith.constant 0 : i32
    return %c0_i32, %c0_i32_0 : i32, i32
  }
  func.func @transform_3(%arg0: i32) -> (i32, i32, i32) {
    %c0_i32 = arith.constant 0 : i32
    %c0_i32_0 = arith.constant 0 : i32
    %c0_i32_1 = arith.constant 0 : i32
    return %arg0, %c0_i32, %c0_i32_0 : i32, i32, i32
  }
}

module attributes {stable_mosaic.version = 11 : i64} {
  func.func @_cls_head_kernel(%arg0: memref<4x64xf32, #tpu.memory_space<vmem>>, %arg1: memref<1x64xf32, #tpu.memory_space<vmem>>, %arg2: memref<1x64xf32, #tpu.memory_space<vmem>>, %arg3: memref<64x192xbf16, #tpu.memory_space<vmem>>, %arg4: memref<1x192xf32, #tpu.memory_space<vmem>>, %arg5: memref<64x64xbf16, #tpu.memory_space<vmem>>, %arg6: memref<1x64xf32, #tpu.memory_space<vmem>>, %arg7: memref<128x512xbf16, #tpu.memory_space<vmem>>, %arg8: memref<1x512xf32, #tpu.memory_space<vmem>>, %arg9: memref<1x512xf32, #tpu.memory_space<vmem>>, %arg10: memref<1x512xf32, #tpu.memory_space<vmem>>, %arg11: memref<1x512xf32, #tpu.memory_space<vmem>>, %arg12: memref<1x512xf32, #tpu.memory_space<vmem>>, %arg13: memref<512x128xbf16, #tpu.memory_space<vmem>>, %arg14: memref<1x128xf32, #tpu.memory_space<vmem>>, %arg15: memref<2x128xf32, #tpu.memory_space<vmem>>) attributes {dimension_semantics = [], scalar_prefetch = 0 : i64, scratch_operands = 0 : i64, tpu.core_type = #tpu.core_type<tc>} {
    %c0 = arith.constant 0 : index
    %c0_0 = arith.constant 0 : index
    %0 = vector.load %arg0[%c0, %c0_0] : memref<4x64xf32, #tpu.memory_space<vmem>>, vector<4x64xf32>
    %c0_1 = arith.constant 0 : index
    %c0_2 = arith.constant 0 : index
    %1 = vector.load %arg1[%c0_1, %c0_2] : memref<1x64xf32, #tpu.memory_space<vmem>>, vector<1x64xf32>
    %c0_3 = arith.constant 0 : index
    %c0_4 = arith.constant 0 : index
    %2 = vector.load %arg2[%c0_3, %c0_4] : memref<1x64xf32, #tpu.memory_space<vmem>>, vector<1x64xf32>
    %cst = arith.constant dense<0.000000e+00> : vector<4xf32>
    %3 = vector.multi_reduction <add>, %0, %cst [1] : vector<4x64xf32> to vector<4xf32>
    %4 = vector.shape_cast %3 : vector<4xf32> to vector<4x1xf32>
    %cst_5 = arith.constant 6.400000e+01 : f32
    %5 = vector.broadcast %cst_5 : f32 to vector<4x1xf32>
    %6 = arith.divf %4, %5 : vector<4x1xf32>
    %7 = vector.broadcast %6 : vector<4x1xf32> to vector<4x64xf32>
    %8 = arith.subf %0, %7 : vector<4x64xf32>
    %9 = arith.mulf %8, %8 : vector<4x64xf32>
    %cst_6 = arith.constant dense<0.000000e+00> : vector<4xf32>
    %10 = vector.multi_reduction <add>, %9, %cst_6 [1] : vector<4x64xf32> to vector<4xf32>
    %11 = vector.shape_cast %10 : vector<4xf32> to vector<4x1xf32>
    %cst_7 = arith.constant 6.400000e+01 : f32
    %12 = vector.broadcast %cst_7 : f32 to vector<4x1xf32>
    %13 = arith.divf %11, %12 : vector<4x1xf32>
    %14 = vector.broadcast %6 : vector<4x1xf32> to vector<4x64xf32>
    %15 = arith.subf %0, %14 : vector<4x64xf32>
    %cst_8 = arith.constant 9.99999997E-7 : f32
    %16 = vector.broadcast %cst_8 : f32 to vector<4x1xf32>
    %17 = arith.addf %13, %16 : vector<4x1xf32>
    %18 = math.rsqrt %17 : vector<4x1xf32>
    %19 = vector.broadcast %18 : vector<4x1xf32> to vector<4x64xf32>
    %20 = arith.mulf %15, %19 : vector<4x64xf32>
    %21 = vector.broadcast %1 : vector<1x64xf32> to vector<4x64xf32>
    %22 = arith.mulf %20, %21 : vector<4x64xf32>
    %23 = vector.broadcast %2 : vector<1x64xf32> to vector<4x64xf32>
    %24 = arith.addf %22, %23 : vector<4x64xf32>
    %cst_9 = arith.constant dense<0.000000e+00> : vector<4xf32>
    %25 = vector.multi_reduction <add>, %24, %cst_9 [1] : vector<4x64xf32> to vector<4xf32>
    %26 = vector.shape_cast %25 : vector<4xf32> to vector<4x1xf32>
    %cst_10 = arith.constant 6.400000e+01 : f32
    %27 = vector.broadcast %cst_10 : f32 to vector<4x1xf32>
    %28 = arith.divf %26, %27 : vector<4x1xf32>
    %29 = vector.broadcast %28 : vector<4x1xf32> to vector<4x64xf32>
    %30 = arith.subf %24, %29 : vector<4x64xf32>
    %31 = arith.mulf %30, %30 : vector<4x64xf32>
    %cst_11 = arith.constant dense<0.000000e+00> : vector<4xf32>
    %32 = vector.multi_reduction <add>, %31, %cst_11 [1] : vector<4x64xf32> to vector<4xf32>
    %33 = vector.shape_cast %32 : vector<4xf32> to vector<4x1xf32>
    %cst_12 = arith.constant 6.400000e+01 : f32
    %34 = vector.broadcast %cst_12 : f32 to vector<4x1xf32>
    %35 = arith.divf %33, %34 : vector<4x1xf32>
    %36 = vector.broadcast %28 : vector<4x1xf32> to vector<4x64xf32>
    %37 = arith.subf %24, %36 : vector<4x64xf32>
    %cst_13 = arith.constant 9.99999997E-7 : f32
    %38 = vector.broadcast %cst_13 : f32 to vector<4x1xf32>
    %39 = arith.addf %35, %38 : vector<4x1xf32>
    %40 = math.rsqrt %39 : vector<4x1xf32>
    %41 = vector.broadcast %40 : vector<4x1xf32> to vector<4x64xf32>
    %42 = arith.mulf %37, %41 : vector<4x64xf32>
    %43 = vector.broadcast %1 : vector<1x64xf32> to vector<4x64xf32>
    %44 = arith.mulf %42, %43 : vector<4x64xf32>
    %45 = vector.broadcast %2 : vector<1x64xf32> to vector<4x64xf32>
    %46 = arith.addf %44, %45 : vector<4x64xf32>
    %47 = arith.truncf %46 : vector<4x64xf32> to vector<4x64xbf16>
    %c0_14 = arith.constant 0 : index
    %c0_15 = arith.constant 0 : index
    %48 = vector.load %arg3[%c0_14, %c0_15] : memref<64x192xbf16, #tpu.memory_space<vmem>>, vector<64x192xbf16>
    %cst_16 = arith.constant dense<0.000000e+00> : vector<4x192xf32>
    %49 = tpu.matmul %47, %48, %cst_16 {dimension_numbers = #tpu.dot_dimension_numbers<[1], [0], [0], [1], [0, 0, 1, 1], [], []>} : vector<4x64xbf16>, vector<64x192xbf16>, vector<4x192xf32> -> vector<4x192xf32>
    %c0_17 = arith.constant 0 : index
    %c0_18 = arith.constant 0 : index
    %50 = vector.load %arg4[%c0_17, %c0_18] : memref<1x192xf32, #tpu.memory_space<vmem>>, vector<1x192xf32>
    %51 = vector.broadcast %50 : vector<1x192xf32> to vector<4x192xf32>
    %52 = arith.addf %49, %51 : vector<4x192xf32>
    %53 = arith.truncf %52 : vector<4x192xf32> to vector<4x192xbf16>
    %54 = vector.extract_strided_slice %53 {offsets = [0, 0], sizes = [2, 192], strides = [1, 1]} : vector<4x192xbf16> to vector<2x192xbf16>
    %55 = vector.extract_strided_slice %54 {offsets = [0, 0], sizes = [2, 8], strides = [1, 1]} : vector<2x192xbf16> to vector<2x8xbf16>
    %56 = vector.extract_strided_slice %54 {offsets = [0, 64], sizes = [2, 8], strides = [1, 1]} : vector<2x192xbf16> to vector<2x8xbf16>
    %57 = vector.extract_strided_slice %54 {offsets = [0, 128], sizes = [2, 8], strides = [1, 1]} : vector<2x192xbf16> to vector<2x8xbf16>
    %cst_19 = arith.constant dense<0.000000e+00> : vector<2x2xf32>
    %58 = tpu.matmul %55, %56, %cst_19 {dimension_numbers = #tpu.dot_dimension_numbers<[1], [1], [0], [0], [0, 0, 1, 0], [], []>} : vector<2x8xbf16>, vector<2x8xbf16>, vector<2x2xf32> -> vector<2x2xf32>
    %cst_20 = arith.constant dense<0xFF800000> : vector<2xf32>
    %59 = vector.multi_reduction <maximumf>, %58, %cst_20 [1] : vector<2x2xf32> to vector<2xf32>
    %60 = vector.shape_cast %59 : vector<2xf32> to vector<2x1xf32>
    %61 = vector.broadcast %60 : vector<2x1xf32> to vector<2x2xf32>
    %62 = arith.subf %58, %61 : vector<2x2xf32>
    %63 = math.exp %62 : vector<2x2xf32>
    %cst_21 = arith.constant dense<0.000000e+00> : vector<2xf32>
    %64 = vector.multi_reduction <add>, %63, %cst_21 [1] : vector<2x2xf32> to vector<2xf32>
    %65 = vector.shape_cast %64 : vector<2xf32> to vector<2x1xf32>
    %66 = vector.broadcast %65 : vector<2x1xf32> to vector<2x2xf32>
    %67 = arith.divf %63, %66 : vector<2x2xf32>
    %68 = arith.truncf %67 : vector<2x2xf32> to vector<2x2xbf16>
    %cst_22 = arith.constant dense<0.000000e+00> : vector<2x8xf32>
    %69 = tpu.matmul %68, %57, %cst_22 {dimension_numbers = #tpu.dot_dimension_numbers<[1], [0], [0], [1], [0, 0, 1, 1], [], []>} : vector<2x2xbf16>, vector<2x8xbf16>, vector<2x8xf32> -> vector<2x8xf32>
    %70 = vector.extract_strided_slice %54 {offsets = [0, 8], sizes = [2, 8], strides = [1, 1]} : vector<2x192xbf16> to vector<2x8xbf16>
    %71 = vector.extract_strided_slice %54 {offsets = [0, 72], sizes = [2, 8], strides = [1, 1]} : vector<2x192xbf16> to vector<2x8xbf16>
    %72 = vector.extract_strided_slice %54 {offsets = [0, 136], sizes = [2, 8], strides = [1, 1]} : vector<2x192xbf16> to vector<2x8xbf16>
    %cst_23 = arith.constant dense<0.000000e+00> : vector<2x2xf32>
    %73 = tpu.matmul %70, %71, %cst_23 {dimension_numbers = #tpu.dot_dimension_numbers<[1], [1], [0], [0], [0, 0, 1, 0], [], []>} : vector<2x8xbf16>, vector<2x8xbf16>, vector<2x2xf32> -> vector<2x2xf32>
    %cst_24 = arith.constant dense<0xFF800000> : vector<2xf32>
    %74 = vector.multi_reduction <maximumf>, %73, %cst_24 [1] : vector<2x2xf32> to vector<2xf32>
    %75 = vector.shape_cast %74 : vector<2xf32> to vector<2x1xf32>
    %76 = vector.broadcast %75 : vector<2x1xf32> to vector<2x2xf32>
    %77 = arith.subf %73, %76 : vector<2x2xf32>
    %78 = math.exp %77 : vector<2x2xf32>
    %cst_25 = arith.constant dense<0.000000e+00> : vector<2xf32>
    %79 = vector.multi_reduction <add>, %78, %cst_25 [1] : vector<2x2xf32> to vector<2xf32>
    %80 = vector.shape_cast %79 : vector<2xf32> to vector<2x1xf32>
    %81 = vector.broadcast %80 : vector<2x1xf32> to vector<2x2xf32>
    %82 = arith.divf %78, %81 : vector<2x2xf32>
    %83 = arith.truncf %82 : vector<2x2xf32> to vector<2x2xbf16>
    %cst_26 = arith.constant dense<0.000000e+00> : vector<2x8xf32>
    %84 = tpu.matmul %83, %72, %cst_26 {dimension_numbers = #tpu.dot_dimension_numbers<[1], [0], [0], [1], [0, 0, 1, 1], [], []>} : vector<2x2xbf16>, vector<2x8xbf16>, vector<2x8xf32> -> vector<2x8xf32>
    %85 = vector.extract_strided_slice %54 {offsets = [0, 16], sizes = [2, 8], strides = [1, 1]} : vector<2x192xbf16> to vector<2x8xbf16>
    %86 = vector.extract_strided_slice %54 {offsets = [0, 80], sizes = [2, 8], strides = [1, 1]} : vector<2x192xbf16> to vector<2x8xbf16>
    %87 = vector.extract_strided_slice %54 {offsets = [0, 144], sizes = [2, 8], strides = [1, 1]} : vector<2x192xbf16> to vector<2x8xbf16>
    %cst_27 = arith.constant dense<0.000000e+00> : vector<2x2xf32>
    %88 = tpu.matmul %85, %86, %cst_27 {dimension_numbers = #tpu.dot_dimension_numbers<[1], [1], [0], [0], [0, 0, 1, 0], [], []>} : vector<2x8xbf16>, vector<2x8xbf16>, vector<2x2xf32> -> vector<2x2xf32>
    %cst_28 = arith.constant dense<0xFF800000> : vector<2xf32>
    %89 = vector.multi_reduction <maximumf>, %88, %cst_28 [1] : vector<2x2xf32> to vector<2xf32>
    %90 = vector.shape_cast %89 : vector<2xf32> to vector<2x1xf32>
    %91 = vector.broadcast %90 : vector<2x1xf32> to vector<2x2xf32>
    %92 = arith.subf %88, %91 : vector<2x2xf32>
    %93 = math.exp %92 : vector<2x2xf32>
    %cst_29 = arith.constant dense<0.000000e+00> : vector<2xf32>
    %94 = vector.multi_reduction <add>, %93, %cst_29 [1] : vector<2x2xf32> to vector<2xf32>
    %95 = vector.shape_cast %94 : vector<2xf32> to vector<2x1xf32>
    %96 = vector.broadcast %95 : vector<2x1xf32> to vector<2x2xf32>
    %97 = arith.divf %93, %96 : vector<2x2xf32>
    %98 = arith.truncf %97 : vector<2x2xf32> to vector<2x2xbf16>
    %cst_30 = arith.constant dense<0.000000e+00> : vector<2x8xf32>
    %99 = tpu.matmul %98, %87, %cst_30 {dimension_numbers = #tpu.dot_dimension_numbers<[1], [0], [0], [1], [0, 0, 1, 1], [], []>} : vector<2x2xbf16>, vector<2x8xbf16>, vector<2x8xf32> -> vector<2x8xf32>
    %100 = vector.extract_strided_slice %54 {offsets = [0, 24], sizes = [2, 8], strides = [1, 1]} : vector<2x192xbf16> to vector<2x8xbf16>
    %101 = vector.extract_strided_slice %54 {offsets = [0, 88], sizes = [2, 8], strides = [1, 1]} : vector<2x192xbf16> to vector<2x8xbf16>
    %102 = vector.extract_strided_slice %54 {offsets = [0, 152], sizes = [2, 8], strides = [1, 1]} : vector<2x192xbf16> to vector<2x8xbf16>
    %cst_31 = arith.constant dense<0.000000e+00> : vector<2x2xf32>
    %103 = tpu.matmul %100, %101, %cst_31 {dimension_numbers = #tpu.dot_dimension_numbers<[1], [1], [0], [0], [0, 0, 1, 0], [], []>} : vector<2x8xbf16>, vector<2x8xbf16>, vector<2x2xf32> -> vector<2x2xf32>
    %cst_32 = arith.constant dense<0xFF800000> : vector<2xf32>
    %104 = vector.multi_reduction <maximumf>, %103, %cst_32 [1] : vector<2x2xf32> to vector<2xf32>
    %105 = vector.shape_cast %104 : vector<2xf32> to vector<2x1xf32>
    %106 = vector.broadcast %105 : vector<2x1xf32> to vector<2x2xf32>
    %107 = arith.subf %103, %106 : vector<2x2xf32>
    %108 = math.exp %107 : vector<2x2xf32>
    %cst_33 = arith.constant dense<0.000000e+00> : vector<2xf32>
    %109 = vector.multi_reduction <add>, %108, %cst_33 [1] : vector<2x2xf32> to vector<2xf32>
    %110 = vector.shape_cast %109 : vector<2xf32> to vector<2x1xf32>
    %111 = vector.broadcast %110 : vector<2x1xf32> to vector<2x2xf32>
    %112 = arith.divf %108, %111 : vector<2x2xf32>
    %113 = arith.truncf %112 : vector<2x2xf32> to vector<2x2xbf16>
    %cst_34 = arith.constant dense<0.000000e+00> : vector<2x8xf32>
    %114 = tpu.matmul %113, %102, %cst_34 {dimension_numbers = #tpu.dot_dimension_numbers<[1], [0], [0], [1], [0, 0, 1, 1], [], []>} : vector<2x2xbf16>, vector<2x8xbf16>, vector<2x8xf32> -> vector<2x8xf32>
    %115 = vector.extract_strided_slice %54 {offsets = [0, 32], sizes = [2, 8], strides = [1, 1]} : vector<2x192xbf16> to vector<2x8xbf16>
    %116 = vector.extract_strided_slice %54 {offsets = [0, 96], sizes = [2, 8], strides = [1, 1]} : vector<2x192xbf16> to vector<2x8xbf16>
    %117 = vector.extract_strided_slice %54 {offsets = [0, 160], sizes = [2, 8], strides = [1, 1]} : vector<2x192xbf16> to vector<2x8xbf16>
    %cst_35 = arith.constant dense<0.000000e+00> : vector<2x2xf32>
    %118 = tpu.matmul %115, %116, %cst_35 {dimension_numbers = #tpu.dot_dimension_numbers<[1], [1], [0], [0], [0, 0, 1, 0], [], []>} : vector<2x8xbf16>, vector<2x8xbf16>, vector<2x2xf32> -> vector<2x2xf32>
    %cst_36 = arith.constant dense<0xFF800000> : vector<2xf32>
    %119 = vector.multi_reduction <maximumf>, %118, %cst_36 [1] : vector<2x2xf32> to vector<2xf32>
    %120 = vector.shape_cast %119 : vector<2xf32> to vector<2x1xf32>
    %121 = vector.broadcast %120 : vector<2x1xf32> to vector<2x2xf32>
    %122 = arith.subf %118, %121 : vector<2x2xf32>
    %123 = math.exp %122 : vector<2x2xf32>
    %cst_37 = arith.constant dense<0.000000e+00> : vector<2xf32>
    %124 = vector.multi_reduction <add>, %123, %cst_37 [1] : vector<2x2xf32> to vector<2xf32>
    %125 = vector.shape_cast %124 : vector<2xf32> to vector<2x1xf32>
    %126 = vector.broadcast %125 : vector<2x1xf32> to vector<2x2xf32>
    %127 = arith.divf %123, %126 : vector<2x2xf32>
    %128 = arith.truncf %127 : vector<2x2xf32> to vector<2x2xbf16>
    %cst_38 = arith.constant dense<0.000000e+00> : vector<2x8xf32>
    %129 = tpu.matmul %128, %117, %cst_38 {dimension_numbers = #tpu.dot_dimension_numbers<[1], [0], [0], [1], [0, 0, 1, 1], [], []>} : vector<2x2xbf16>, vector<2x8xbf16>, vector<2x8xf32> -> vector<2x8xf32>
    %130 = vector.extract_strided_slice %54 {offsets = [0, 40], sizes = [2, 8], strides = [1, 1]} : vector<2x192xbf16> to vector<2x8xbf16>
    %131 = vector.extract_strided_slice %54 {offsets = [0, 104], sizes = [2, 8], strides = [1, 1]} : vector<2x192xbf16> to vector<2x8xbf16>
    %132 = vector.extract_strided_slice %54 {offsets = [0, 168], sizes = [2, 8], strides = [1, 1]} : vector<2x192xbf16> to vector<2x8xbf16>
    %cst_39 = arith.constant dense<0.000000e+00> : vector<2x2xf32>
    %133 = tpu.matmul %130, %131, %cst_39 {dimension_numbers = #tpu.dot_dimension_numbers<[1], [1], [0], [0], [0, 0, 1, 0], [], []>} : vector<2x8xbf16>, vector<2x8xbf16>, vector<2x2xf32> -> vector<2x2xf32>
    %cst_40 = arith.constant dense<0xFF800000> : vector<2xf32>
    %134 = vector.multi_reduction <maximumf>, %133, %cst_40 [1] : vector<2x2xf32> to vector<2xf32>
    %135 = vector.shape_cast %134 : vector<2xf32> to vector<2x1xf32>
    %136 = vector.broadcast %135 : vector<2x1xf32> to vector<2x2xf32>
    %137 = arith.subf %133, %136 : vector<2x2xf32>
    %138 = math.exp %137 : vector<2x2xf32>
    %cst_41 = arith.constant dense<0.000000e+00> : vector<2xf32>
    %139 = vector.multi_reduction <add>, %138, %cst_41 [1] : vector<2x2xf32> to vector<2xf32>
    %140 = vector.shape_cast %139 : vector<2xf32> to vector<2x1xf32>
    %141 = vector.broadcast %140 : vector<2x1xf32> to vector<2x2xf32>
    %142 = arith.divf %138, %141 : vector<2x2xf32>
    %143 = arith.truncf %142 : vector<2x2xf32> to vector<2x2xbf16>
    %cst_42 = arith.constant dense<0.000000e+00> : vector<2x8xf32>
    %144 = tpu.matmul %143, %132, %cst_42 {dimension_numbers = #tpu.dot_dimension_numbers<[1], [0], [0], [1], [0, 0, 1, 1], [], []>} : vector<2x2xbf16>, vector<2x8xbf16>, vector<2x8xf32> -> vector<2x8xf32>
    %145 = vector.extract_strided_slice %54 {offsets = [0, 48], sizes = [2, 8], strides = [1, 1]} : vector<2x192xbf16> to vector<2x8xbf16>
    %146 = vector.extract_strided_slice %54 {offsets = [0, 112], sizes = [2, 8], strides = [1, 1]} : vector<2x192xbf16> to vector<2x8xbf16>
    %147 = vector.extract_strided_slice %54 {offsets = [0, 176], sizes = [2, 8], strides = [1, 1]} : vector<2x192xbf16> to vector<2x8xbf16>
    %cst_43 = arith.constant dense<0.000000e+00> : vector<2x2xf32>
    %148 = tpu.matmul %145, %146, %cst_43 {dimension_numbers = #tpu.dot_dimension_numbers<[1], [1], [0], [0], [0, 0, 1, 0], [], []>} : vector<2x8xbf16>, vector<2x8xbf16>, vector<2x2xf32> -> vector<2x2xf32>
    %cst_44 = arith.constant dense<0xFF800000> : vector<2xf32>
    %149 = vector.multi_reduction <maximumf>, %148, %cst_44 [1] : vector<2x2xf32> to vector<2xf32>
    %150 = vector.shape_cast %149 : vector<2xf32> to vector<2x1xf32>
    %151 = vector.broadcast %150 : vector<2x1xf32> to vector<2x2xf32>
    %152 = arith.subf %148, %151 : vector<2x2xf32>
    %153 = math.exp %152 : vector<2x2xf32>
    %cst_45 = arith.constant dense<0.000000e+00> : vector<2xf32>
    %154 = vector.multi_reduction <add>, %153, %cst_45 [1] : vector<2x2xf32> to vector<2xf32>
    %155 = vector.shape_cast %154 : vector<2xf32> to vector<2x1xf32>
    %156 = vector.broadcast %155 : vector<2x1xf32> to vector<2x2xf32>
    %157 = arith.divf %153, %156 : vector<2x2xf32>
    %158 = arith.truncf %157 : vector<2x2xf32> to vector<2x2xbf16>
    %cst_46 = arith.constant dense<0.000000e+00> : vector<2x8xf32>
    %159 = tpu.matmul %158, %147, %cst_46 {dimension_numbers = #tpu.dot_dimension_numbers<[1], [0], [0], [1], [0, 0, 1, 1], [], []>} : vector<2x2xbf16>, vector<2x8xbf16>, vector<2x8xf32> -> vector<2x8xf32>
    %160 = vector.extract_strided_slice %54 {offsets = [0, 56], sizes = [2, 8], strides = [1, 1]} : vector<2x192xbf16> to vector<2x8xbf16>
    %161 = vector.extract_strided_slice %54 {offsets = [0, 120], sizes = [2, 8], strides = [1, 1]} : vector<2x192xbf16> to vector<2x8xbf16>
    %162 = vector.extract_strided_slice %54 {offsets = [0, 184], sizes = [2, 8], strides = [1, 1]} : vector<2x192xbf16> to vector<2x8xbf16>
    %cst_47 = arith.constant dense<0.000000e+00> : vector<2x2xf32>
    %163 = tpu.matmul %160, %161, %cst_47 {dimension_numbers = #tpu.dot_dimension_numbers<[1], [1], [0], [0], [0, 0, 1, 0], [], []>} : vector<2x8xbf16>, vector<2x8xbf16>, vector<2x2xf32> -> vector<2x2xf32>
    %cst_48 = arith.constant dense<0xFF800000> : vector<2xf32>
    %164 = vector.multi_reduction <maximumf>, %163, %cst_48 [1] : vector<2x2xf32> to vector<2xf32>
    %165 = vector.shape_cast %164 : vector<2xf32> to vector<2x1xf32>
    %166 = vector.broadcast %165 : vector<2x1xf32> to vector<2x2xf32>
    %167 = arith.subf %163, %166 : vector<2x2xf32>
    %168 = math.exp %167 : vector<2x2xf32>
    %cst_49 = arith.constant dense<0.000000e+00> : vector<2xf32>
    %169 = vector.multi_reduction <add>, %168, %cst_49 [1] : vector<2x2xf32> to vector<2xf32>
    %170 = vector.shape_cast %169 : vector<2xf32> to vector<2x1xf32>
    %171 = vector.broadcast %170 : vector<2x1xf32> to vector<2x2xf32>
    %172 = arith.divf %168, %171 : vector<2x2xf32>
    %173 = arith.truncf %172 : vector<2x2xf32> to vector<2x2xbf16>
    %cst_50 = arith.constant dense<0.000000e+00> : vector<2x8xf32>
    %174 = tpu.matmul %173, %162, %cst_50 {dimension_numbers = #tpu.dot_dimension_numbers<[1], [0], [0], [1], [0, 0, 1, 1], [], []>} : vector<2x2xbf16>, vector<2x8xbf16>, vector<2x8xf32> -> vector<2x8xf32>
    %175 = tpu.concatenate %69, %84, %99, %114, %129, %144, %159, %174 in 1 : vector<2x8xf32>, vector<2x8xf32>, vector<2x8xf32>, vector<2x8xf32>, vector<2x8xf32>, vector<2x8xf32>, vector<2x8xf32>, vector<2x8xf32> -> vector<2x64xf32>
    %176 = vector.extract_strided_slice %53 {offsets = [2, 0], sizes = [2, 192], strides = [1, 1]} : vector<4x192xbf16> to vector<2x192xbf16>
    %177 = vector.extract_strided_slice %176 {offsets = [0, 0], sizes = [2, 8], strides = [1, 1]} : vector<2x192xbf16> to vector<2x8xbf16>
    %178 = vector.extract_strided_slice %176 {offsets = [0, 64], sizes = [2, 8], strides = [1, 1]} : vector<2x192xbf16> to vector<2x8xbf16>
    %179 = vector.extract_strided_slice %176 {offsets = [0, 128], sizes = [2, 8], strides = [1, 1]} : vector<2x192xbf16> to vector<2x8xbf16>
    %cst_51 = arith.constant dense<0.000000e+00> : vector<2x2xf32>
    %180 = tpu.matmul %177, %178, %cst_51 {dimension_numbers = #tpu.dot_dimension_numbers<[1], [1], [0], [0], [0, 0, 1, 0], [], []>} : vector<2x8xbf16>, vector<2x8xbf16>, vector<2x2xf32> -> vector<2x2xf32>
    %cst_52 = arith.constant dense<0xFF800000> : vector<2xf32>
    %181 = vector.multi_reduction <maximumf>, %180, %cst_52 [1] : vector<2x2xf32> to vector<2xf32>
    %182 = vector.shape_cast %181 : vector<2xf32> to vector<2x1xf32>
    %183 = vector.broadcast %182 : vector<2x1xf32> to vector<2x2xf32>
    %184 = arith.subf %180, %183 : vector<2x2xf32>
    %185 = math.exp %184 : vector<2x2xf32>
    %cst_53 = arith.constant dense<0.000000e+00> : vector<2xf32>
    %186 = vector.multi_reduction <add>, %185, %cst_53 [1] : vector<2x2xf32> to vector<2xf32>
    %187 = vector.shape_cast %186 : vector<2xf32> to vector<2x1xf32>
    %188 = vector.broadcast %187 : vector<2x1xf32> to vector<2x2xf32>
    %189 = arith.divf %185, %188 : vector<2x2xf32>
    %190 = arith.truncf %189 : vector<2x2xf32> to vector<2x2xbf16>
    %cst_54 = arith.constant dense<0.000000e+00> : vector<2x8xf32>
    %191 = tpu.matmul %190, %179, %cst_54 {dimension_numbers = #tpu.dot_dimension_numbers<[1], [0], [0], [1], [0, 0, 1, 1], [], []>} : vector<2x2xbf16>, vector<2x8xbf16>, vector<2x8xf32> -> vector<2x8xf32>
    %192 = vector.extract_strided_slice %176 {offsets = [0, 8], sizes = [2, 8], strides = [1, 1]} : vector<2x192xbf16> to vector<2x8xbf16>
    %193 = vector.extract_strided_slice %176 {offsets = [0, 72], sizes = [2, 8], strides = [1, 1]} : vector<2x192xbf16> to vector<2x8xbf16>
    %194 = vector.extract_strided_slice %176 {offsets = [0, 136], sizes = [2, 8], strides = [1, 1]} : vector<2x192xbf16> to vector<2x8xbf16>
    %cst_55 = arith.constant dense<0.000000e+00> : vector<2x2xf32>
    %195 = tpu.matmul %192, %193, %cst_55 {dimension_numbers = #tpu.dot_dimension_numbers<[1], [1], [0], [0], [0, 0, 1, 0], [], []>} : vector<2x8xbf16>, vector<2x8xbf16>, vector<2x2xf32> -> vector<2x2xf32>
    %cst_56 = arith.constant dense<0xFF800000> : vector<2xf32>
    %196 = vector.multi_reduction <maximumf>, %195, %cst_56 [1] : vector<2x2xf32> to vector<2xf32>
    %197 = vector.shape_cast %196 : vector<2xf32> to vector<2x1xf32>
    %198 = vector.broadcast %197 : vector<2x1xf32> to vector<2x2xf32>
    %199 = arith.subf %195, %198 : vector<2x2xf32>
    %200 = math.exp %199 : vector<2x2xf32>
    %cst_57 = arith.constant dense<0.000000e+00> : vector<2xf32>
    %201 = vector.multi_reduction <add>, %200, %cst_57 [1] : vector<2x2xf32> to vector<2xf32>
    %202 = vector.shape_cast %201 : vector<2xf32> to vector<2x1xf32>
    %203 = vector.broadcast %202 : vector<2x1xf32> to vector<2x2xf32>
    %204 = arith.divf %200, %203 : vector<2x2xf32>
    %205 = arith.truncf %204 : vector<2x2xf32> to vector<2x2xbf16>
    %cst_58 = arith.constant dense<0.000000e+00> : vector<2x8xf32>
    %206 = tpu.matmul %205, %194, %cst_58 {dimension_numbers = #tpu.dot_dimension_numbers<[1], [0], [0], [1], [0, 0, 1, 1], [], []>} : vector<2x2xbf16>, vector<2x8xbf16>, vector<2x8xf32> -> vector<2x8xf32>
    %207 = vector.extract_strided_slice %176 {offsets = [0, 16], sizes = [2, 8], strides = [1, 1]} : vector<2x192xbf16> to vector<2x8xbf16>
    %208 = vector.extract_strided_slice %176 {offsets = [0, 80], sizes = [2, 8], strides = [1, 1]} : vector<2x192xbf16> to vector<2x8xbf16>
    %209 = vector.extract_strided_slice %176 {offsets = [0, 144], sizes = [2, 8], strides = [1, 1]} : vector<2x192xbf16> to vector<2x8xbf16>
    %cst_59 = arith.constant dense<0.000000e+00> : vector<2x2xf32>
    %210 = tpu.matmul %207, %208, %cst_59 {dimension_numbers = #tpu.dot_dimension_numbers<[1], [1], [0], [0], [0, 0, 1, 0], [], []>} : vector<2x8xbf16>, vector<2x8xbf16>, vector<2x2xf32> -> vector<2x2xf32>
    %cst_60 = arith.constant dense<0xFF800000> : vector<2xf32>
    %211 = vector.multi_reduction <maximumf>, %210, %cst_60 [1] : vector<2x2xf32> to vector<2xf32>
    %212 = vector.shape_cast %211 : vector<2xf32> to vector<2x1xf32>
    %213 = vector.broadcast %212 : vector<2x1xf32> to vector<2x2xf32>
    %214 = arith.subf %210, %213 : vector<2x2xf32>
    %215 = math.exp %214 : vector<2x2xf32>
    %cst_61 = arith.constant dense<0.000000e+00> : vector<2xf32>
    %216 = vector.multi_reduction <add>, %215, %cst_61 [1] : vector<2x2xf32> to vector<2xf32>
    %217 = vector.shape_cast %216 : vector<2xf32> to vector<2x1xf32>
    %218 = vector.broadcast %217 : vector<2x1xf32> to vector<2x2xf32>
    %219 = arith.divf %215, %218 : vector<2x2xf32>
    %220 = arith.truncf %219 : vector<2x2xf32> to vector<2x2xbf16>
    %cst_62 = arith.constant dense<0.000000e+00> : vector<2x8xf32>
    %221 = tpu.matmul %220, %209, %cst_62 {dimension_numbers = #tpu.dot_dimension_numbers<[1], [0], [0], [1], [0, 0, 1, 1], [], []>} : vector<2x2xbf16>, vector<2x8xbf16>, vector<2x8xf32> -> vector<2x8xf32>
    %222 = vector.extract_strided_slice %176 {offsets = [0, 24], sizes = [2, 8], strides = [1, 1]} : vector<2x192xbf16> to vector<2x8xbf16>
    %223 = vector.extract_strided_slice %176 {offsets = [0, 88], sizes = [2, 8], strides = [1, 1]} : vector<2x192xbf16> to vector<2x8xbf16>
    %224 = vector.extract_strided_slice %176 {offsets = [0, 152], sizes = [2, 8], strides = [1, 1]} : vector<2x192xbf16> to vector<2x8xbf16>
    %cst_63 = arith.constant dense<0.000000e+00> : vector<2x2xf32>
    %225 = tpu.matmul %222, %223, %cst_63 {dimension_numbers = #tpu.dot_dimension_numbers<[1], [1], [0], [0], [0, 0, 1, 0], [], []>} : vector<2x8xbf16>, vector<2x8xbf16>, vector<2x2xf32> -> vector<2x2xf32>
    %cst_64 = arith.constant dense<0xFF800000> : vector<2xf32>
    %226 = vector.multi_reduction <maximumf>, %225, %cst_64 [1] : vector<2x2xf32> to vector<2xf32>
    %227 = vector.shape_cast %226 : vector<2xf32> to vector<2x1xf32>
    %228 = vector.broadcast %227 : vector<2x1xf32> to vector<2x2xf32>
    %229 = arith.subf %225, %228 : vector<2x2xf32>
    %230 = math.exp %229 : vector<2x2xf32>
    %cst_65 = arith.constant dense<0.000000e+00> : vector<2xf32>
    %231 = vector.multi_reduction <add>, %230, %cst_65 [1] : vector<2x2xf32> to vector<2xf32>
    %232 = vector.shape_cast %231 : vector<2xf32> to vector<2x1xf32>
    %233 = vector.broadcast %232 : vector<2x1xf32> to vector<2x2xf32>
    %234 = arith.divf %230, %233 : vector<2x2xf32>
    %235 = arith.truncf %234 : vector<2x2xf32> to vector<2x2xbf16>
    %cst_66 = arith.constant dense<0.000000e+00> : vector<2x8xf32>
    %236 = tpu.matmul %235, %224, %cst_66 {dimension_numbers = #tpu.dot_dimension_numbers<[1], [0], [0], [1], [0, 0, 1, 1], [], []>} : vector<2x2xbf16>, vector<2x8xbf16>, vector<2x8xf32> -> vector<2x8xf32>
    %237 = vector.extract_strided_slice %176 {offsets = [0, 32], sizes = [2, 8], strides = [1, 1]} : vector<2x192xbf16> to vector<2x8xbf16>
    %238 = vector.extract_strided_slice %176 {offsets = [0, 96], sizes = [2, 8], strides = [1, 1]} : vector<2x192xbf16> to vector<2x8xbf16>
    %239 = vector.extract_strided_slice %176 {offsets = [0, 160], sizes = [2, 8], strides = [1, 1]} : vector<2x192xbf16> to vector<2x8xbf16>
    %cst_67 = arith.constant dense<0.000000e+00> : vector<2x2xf32>
    %240 = tpu.matmul %237, %238, %cst_67 {dimension_numbers = #tpu.dot_dimension_numbers<[1], [1], [0], [0], [0, 0, 1, 0], [], []>} : vector<2x8xbf16>, vector<2x8xbf16>, vector<2x2xf32> -> vector<2x2xf32>
    %cst_68 = arith.constant dense<0xFF800000> : vector<2xf32>
    %241 = vector.multi_reduction <maximumf>, %240, %cst_68 [1] : vector<2x2xf32> to vector<2xf32>
    %242 = vector.shape_cast %241 : vector<2xf32> to vector<2x1xf32>
    %243 = vector.broadcast %242 : vector<2x1xf32> to vector<2x2xf32>
    %244 = arith.subf %240, %243 : vector<2x2xf32>
    %245 = math.exp %244 : vector<2x2xf32>
    %cst_69 = arith.constant dense<0.000000e+00> : vector<2xf32>
    %246 = vector.multi_reduction <add>, %245, %cst_69 [1] : vector<2x2xf32> to vector<2xf32>
    %247 = vector.shape_cast %246 : vector<2xf32> to vector<2x1xf32>
    %248 = vector.broadcast %247 : vector<2x1xf32> to vector<2x2xf32>
    %249 = arith.divf %245, %248 : vector<2x2xf32>
    %250 = arith.truncf %249 : vector<2x2xf32> to vector<2x2xbf16>
    %cst_70 = arith.constant dense<0.000000e+00> : vector<2x8xf32>
    %251 = tpu.matmul %250, %239, %cst_70 {dimension_numbers = #tpu.dot_dimension_numbers<[1], [0], [0], [1], [0, 0, 1, 1], [], []>} : vector<2x2xbf16>, vector<2x8xbf16>, vector<2x8xf32> -> vector<2x8xf32>
    %252 = vector.extract_strided_slice %176 {offsets = [0, 40], sizes = [2, 8], strides = [1, 1]} : vector<2x192xbf16> to vector<2x8xbf16>
    %253 = vector.extract_strided_slice %176 {offsets = [0, 104], sizes = [2, 8], strides = [1, 1]} : vector<2x192xbf16> to vector<2x8xbf16>
    %254 = vector.extract_strided_slice %176 {offsets = [0, 168], sizes = [2, 8], strides = [1, 1]} : vector<2x192xbf16> to vector<2x8xbf16>
    %cst_71 = arith.constant dense<0.000000e+00> : vector<2x2xf32>
    %255 = tpu.matmul %252, %253, %cst_71 {dimension_numbers = #tpu.dot_dimension_numbers<[1], [1], [0], [0], [0, 0, 1, 0], [], []>} : vector<2x8xbf16>, vector<2x8xbf16>, vector<2x2xf32> -> vector<2x2xf32>
    %cst_72 = arith.constant dense<0xFF800000> : vector<2xf32>
    %256 = vector.multi_reduction <maximumf>, %255, %cst_72 [1] : vector<2x2xf32> to vector<2xf32>
    %257 = vector.shape_cast %256 : vector<2xf32> to vector<2x1xf32>
    %258 = vector.broadcast %257 : vector<2x1xf32> to vector<2x2xf32>
    %259 = arith.subf %255, %258 : vector<2x2xf32>
    %260 = math.exp %259 : vector<2x2xf32>
    %cst_73 = arith.constant dense<0.000000e+00> : vector<2xf32>
    %261 = vector.multi_reduction <add>, %260, %cst_73 [1] : vector<2x2xf32> to vector<2xf32>
    %262 = vector.shape_cast %261 : vector<2xf32> to vector<2x1xf32>
    %263 = vector.broadcast %262 : vector<2x1xf32> to vector<2x2xf32>
    %264 = arith.divf %260, %263 : vector<2x2xf32>
    %265 = arith.truncf %264 : vector<2x2xf32> to vector<2x2xbf16>
    %cst_74 = arith.constant dense<0.000000e+00> : vector<2x8xf32>
    %266 = tpu.matmul %265, %254, %cst_74 {dimension_numbers = #tpu.dot_dimension_numbers<[1], [0], [0], [1], [0, 0, 1, 1], [], []>} : vector<2x2xbf16>, vector<2x8xbf16>, vector<2x8xf32> -> vector<2x8xf32>
    %267 = vector.extract_strided_slice %176 {offsets = [0, 48], sizes = [2, 8], strides = [1, 1]} : vector<2x192xbf16> to vector<2x8xbf16>
    %268 = vector.extract_strided_slice %176 {offsets = [0, 112], sizes = [2, 8], strides = [1, 1]} : vector<2x192xbf16> to vector<2x8xbf16>
    %269 = vector.extract_strided_slice %176 {offsets = [0, 176], sizes = [2, 8], strides = [1, 1]} : vector<2x192xbf16> to vector<2x8xbf16>
    %cst_75 = arith.constant dense<0.000000e+00> : vector<2x2xf32>
    %270 = tpu.matmul %267, %268, %cst_75 {dimension_numbers = #tpu.dot_dimension_numbers<[1], [1], [0], [0], [0, 0, 1, 0], [], []>} : vector<2x8xbf16>, vector<2x8xbf16>, vector<2x2xf32> -> vector<2x2xf32>
    %cst_76 = arith.constant dense<0xFF800000> : vector<2xf32>
    %271 = vector.multi_reduction <maximumf>, %270, %cst_76 [1] : vector<2x2xf32> to vector<2xf32>
    %272 = vector.shape_cast %271 : vector<2xf32> to vector<2x1xf32>
    %273 = vector.broadcast %272 : vector<2x1xf32> to vector<2x2xf32>
    %274 = arith.subf %270, %273 : vector<2x2xf32>
    %275 = math.exp %274 : vector<2x2xf32>
    %cst_77 = arith.constant dense<0.000000e+00> : vector<2xf32>
    %276 = vector.multi_reduction <add>, %275, %cst_77 [1] : vector<2x2xf32> to vector<2xf32>
    %277 = vector.shape_cast %276 : vector<2xf32> to vector<2x1xf32>
    %278 = vector.broadcast %277 : vector<2x1xf32> to vector<2x2xf32>
    %279 = arith.divf %275, %278 : vector<2x2xf32>
    %280 = arith.truncf %279 : vector<2x2xf32> to vector<2x2xbf16>
    %cst_78 = arith.constant dense<0.000000e+00> : vector<2x8xf32>
    %281 = tpu.matmul %280, %269, %cst_78 {dimension_numbers = #tpu.dot_dimension_numbers<[1], [0], [0], [1], [0, 0, 1, 1], [], []>} : vector<2x2xbf16>, vector<2x8xbf16>, vector<2x8xf32> -> vector<2x8xf32>
    %282 = vector.extract_strided_slice %176 {offsets = [0, 56], sizes = [2, 8], strides = [1, 1]} : vector<2x192xbf16> to vector<2x8xbf16>
    %283 = vector.extract_strided_slice %176 {offsets = [0, 120], sizes = [2, 8], strides = [1, 1]} : vector<2x192xbf16> to vector<2x8xbf16>
    %284 = vector.extract_strided_slice %176 {offsets = [0, 184], sizes = [2, 8], strides = [1, 1]} : vector<2x192xbf16> to vector<2x8xbf16>
    %cst_79 = arith.constant dense<0.000000e+00> : vector<2x2xf32>
    %285 = tpu.matmul %282, %283, %cst_79 {dimension_numbers = #tpu.dot_dimension_numbers<[1], [1], [0], [0], [0, 0, 1, 0], [], []>} : vector<2x8xbf16>, vector<2x8xbf16>, vector<2x2xf32> -> vector<2x2xf32>
    %cst_80 = arith.constant dense<0xFF800000> : vector<2xf32>
    %286 = vector.multi_reduction <maximumf>, %285, %cst_80 [1] : vector<2x2xf32> to vector<2xf32>
    %287 = vector.shape_cast %286 : vector<2xf32> to vector<2x1xf32>
    %288 = vector.broadcast %287 : vector<2x1xf32> to vector<2x2xf32>
    %289 = arith.subf %285, %288 : vector<2x2xf32>
    %290 = math.exp %289 : vector<2x2xf32>
    %cst_81 = arith.constant dense<0.000000e+00> : vector<2xf32>
    %291 = vector.multi_reduction <add>, %290, %cst_81 [1] : vector<2x2xf32> to vector<2xf32>
    %292 = vector.shape_cast %291 : vector<2xf32> to vector<2x1xf32>
    %293 = vector.broadcast %292 : vector<2x1xf32> to vector<2x2xf32>
    %294 = arith.divf %290, %293 : vector<2x2xf32>
    %295 = arith.truncf %294 : vector<2x2xf32> to vector<2x2xbf16>
    %cst_82 = arith.constant dense<0.000000e+00> : vector<2x8xf32>
    %296 = tpu.matmul %295, %284, %cst_82 {dimension_numbers = #tpu.dot_dimension_numbers<[1], [0], [0], [1], [0, 0, 1, 1], [], []>} : vector<2x2xbf16>, vector<2x8xbf16>, vector<2x8xf32> -> vector<2x8xf32>
    %297 = tpu.concatenate %191, %206, %221, %236, %251, %266, %281, %296 in 1 : vector<2x8xf32>, vector<2x8xf32>, vector<2x8xf32>, vector<2x8xf32>, vector<2x8xf32>, vector<2x8xf32>, vector<2x8xf32>, vector<2x8xf32> -> vector<2x64xf32>
    %298 = vector.extract_strided_slice %175 {offsets = [0, 0], sizes = [1, 64], strides = [1, 1]} : vector<2x64xf32> to vector<1x64xf32>
    %299 = vector.extract_strided_slice %297 {offsets = [0, 0], sizes = [1, 64], strides = [1, 1]} : vector<2x64xf32> to vector<1x64xf32>
    %300 = vector.extract_strided_slice %175 {offsets = [1, 0], sizes = [1, 64], strides = [1, 1]} : vector<2x64xf32> to vector<1x64xf32>
    %301 = vector.extract_strided_slice %297 {offsets = [1, 0], sizes = [1, 64], strides = [1, 1]} : vector<2x64xf32> to vector<1x64xf32>
    %302 = tpu.concatenate %298, %299, %300, %301 in 0 : vector<1x64xf32>, vector<1x64xf32>, vector<1x64xf32>, vector<1x64xf32> -> vector<4x64xf32>
    %303 = arith.truncf %302 : vector<4x64xf32> to vector<4x64xbf16>
    %c0_83 = arith.constant 0 : index
    %c0_84 = arith.constant 0 : index
    %304 = vector.load %arg5[%c0_83, %c0_84] : memref<64x64xbf16, #tpu.memory_space<vmem>>, vector<64x64xbf16>
    %cst_85 = arith.constant dense<0.000000e+00> : vector<4x64xf32>
    %305 = tpu.matmul %303, %304, %cst_85 {dimension_numbers = #tpu.dot_dimension_numbers<[1], [0], [0], [1], [0, 0, 1, 1], [], []>} : vector<4x64xbf16>, vector<64x64xbf16>, vector<4x64xf32> -> vector<4x64xf32>
    %c0_86 = arith.constant 0 : index
    %c0_87 = arith.constant 0 : index
    %306 = vector.load %arg6[%c0_86, %c0_87] : memref<1x64xf32, #tpu.memory_space<vmem>>, vector<1x64xf32>
    %307 = vector.broadcast %306 : vector<1x64xf32> to vector<4x64xf32>
    %308 = arith.addf %305, %307 : vector<4x64xf32>
    %cst_88 = arith.constant 0.000000e+00 : f32
    %309 = vector.broadcast %cst_88 : f32 to vector<2x512xf32>
    %310 = vector.extract_strided_slice %308 {offsets = [0, 0], sizes = [2, 64], strides = [1, 1]} : vector<4x64xf32> to vector<2x64xf32>
    %311 = arith.truncf %310 : vector<2x64xf32> to vector<2x64xbf16>
    %c0_89 = arith.constant 0 : index
    %c0_90 = arith.constant 0 : index
    %312 = vector.load %arg7[%c0_89, %c0_90] : memref<128x512xbf16, #tpu.memory_space<vmem>>, vector<64x512xbf16>
    %cst_91 = arith.constant dense<0.000000e+00> : vector<2x512xf32>
    %313 = tpu.matmul %311, %312, %cst_91 {dimension_numbers = #tpu.dot_dimension_numbers<[1], [0], [0], [1], [0, 0, 1, 1], [], []>} : vector<2x64xbf16>, vector<64x512xbf16>, vector<2x512xf32> -> vector<2x512xf32>
    %314 = arith.addf %309, %313 : vector<2x512xf32>
    %315 = vector.extract_strided_slice %308 {offsets = [2, 0], sizes = [2, 64], strides = [1, 1]} : vector<4x64xf32> to vector<2x64xf32>
    %316 = arith.truncf %315 : vector<2x64xf32> to vector<2x64xbf16>
    %c64 = arith.constant 64 : index
    %c0_92 = arith.constant 0 : index
    %317 = vector.load %arg7[%c64, %c0_92] : memref<128x512xbf16, #tpu.memory_space<vmem>>, vector<64x512xbf16>
    %cst_93 = arith.constant dense<0.000000e+00> : vector<2x512xf32>
    %318 = tpu.matmul %316, %317, %cst_93 {dimension_numbers = #tpu.dot_dimension_numbers<[1], [0], [0], [1], [0, 0, 1, 1], [], []>} : vector<2x64xbf16>, vector<64x512xbf16>, vector<2x512xf32> -> vector<2x512xf32>
    %319 = arith.addf %314, %318 : vector<2x512xf32>
    %c0_94 = arith.constant 0 : index
    %c0_95 = arith.constant 0 : index
    %320 = vector.load %arg8[%c0_94, %c0_95] : memref<1x512xf32, #tpu.memory_space<vmem>>, vector<1x512xf32>
    %321 = vector.broadcast %320 : vector<1x512xf32> to vector<2x512xf32>
    %322 = arith.addf %319, %321 : vector<2x512xf32>
    %c0_96 = arith.constant 0 : index
    %c0_97 = arith.constant 0 : index
    %323 = vector.load %arg11[%c0_96, %c0_97] : memref<1x512xf32, #tpu.memory_space<vmem>>, vector<1x512xf32>
    %324 = vector.broadcast %323 : vector<1x512xf32> to vector<2x512xf32>
    %325 = arith.subf %322, %324 : vector<2x512xf32>
    %c0_98 = arith.constant 0 : index
    %c0_99 = arith.constant 0 : index
    %326 = vector.load %arg12[%c0_98, %c0_99] : memref<1x512xf32, #tpu.memory_space<vmem>>, vector<1x512xf32>
    %cst_100 = arith.constant 9.99999974E-6 : f32
    %327 = vector.broadcast %cst_100 : f32 to vector<1x512xf32>
    %328 = arith.addf %326, %327 : vector<1x512xf32>
    %329 = math.rsqrt %328 : vector<1x512xf32>
    %330 = vector.broadcast %329 : vector<1x512xf32> to vector<2x512xf32>
    %331 = arith.mulf %325, %330 : vector<2x512xf32>
    %c0_101 = arith.constant 0 : index
    %c0_102 = arith.constant 0 : index
    %332 = vector.load %arg9[%c0_101, %c0_102] : memref<1x512xf32, #tpu.memory_space<vmem>>, vector<1x512xf32>
    %333 = vector.broadcast %332 : vector<1x512xf32> to vector<2x512xf32>
    %334 = arith.mulf %331, %333 : vector<2x512xf32>
    %c0_103 = arith.constant 0 : index
    %c0_104 = arith.constant 0 : index
    %335 = vector.load %arg10[%c0_103, %c0_104] : memref<1x512xf32, #tpu.memory_space<vmem>>, vector<1x512xf32>
    %336 = vector.broadcast %335 : vector<1x512xf32> to vector<2x512xf32>
    %337 = arith.addf %334, %336 : vector<2x512xf32>
    %cst_105 = arith.constant 0.000000e+00 : f32
    %338 = vector.broadcast %cst_105 : f32 to vector<2x512xf32>
    %339 = arith.maximumf %337, %338 : vector<2x512xf32>
    %340 = arith.truncf %339 : vector<2x512xf32> to vector<2x512xbf16>
    %c0_106 = arith.constant 0 : index
    %c0_107 = arith.constant 0 : index
    %341 = vector.load %arg13[%c0_106, %c0_107] : memref<512x128xbf16, #tpu.memory_space<vmem>>, vector<512x128xbf16>
    %cst_108 = arith.constant dense<0.000000e+00> : vector<2x128xf32>
    %342 = tpu.matmul %340, %341, %cst_108 {dimension_numbers = #tpu.dot_dimension_numbers<[1], [0], [0], [1], [0, 0, 1, 1], [], []>} : vector<2x512xbf16>, vector<512x128xbf16>, vector<2x128xf32> -> vector<2x128xf32>
    %c0_109 = arith.constant 0 : index
    %c0_110 = arith.constant 0 : index
    %343 = vector.load %arg14[%c0_109, %c0_110] : memref<1x128xf32, #tpu.memory_space<vmem>>, vector<1x128xf32>
    %344 = vector.broadcast %343 : vector<1x128xf32> to vector<2x128xf32>
    %345 = arith.addf %342, %344 : vector<2x128xf32>
    %c0_111 = arith.constant 0 : index
    %c0_112 = arith.constant 0 : index
    %346 = vector.load %arg15[%c0_111, %c0_112] : memref<2x128xf32, #tpu.memory_space<vmem>>, vector<2x128xf32>
    tpu.vector_store %arg15[%c0_111, %c0_112], %345 {strides = array<i32>} : memref<2x128xf32, #tpu.memory_space<vmem>>, vector<2x128xf32>,
    return
  }
}

module attributes {stable_mosaic.version = 11 : i64} {
  func.func @_blocks_kernel(%arg0: i32, %arg1: i32, %arg2: memref<1x10x64xbf16, #tpu.memory_space<vmem>>, %arg3: memref<1x1x64xf32, #tpu.memory_space<vmem>>, %arg4: memref<1x1x64xf32, #tpu.memory_space<vmem>>, %arg5: memref<1x64x192xbf16, #tpu.memory_space<vmem>>, %arg6: memref<1x1x192xf32, #tpu.memory_space<vmem>>, %arg7: memref<1x64x64xbf16, #tpu.memory_space<vmem>>, %arg8: memref<1x1x64xf32, #tpu.memory_space<vmem>>, %arg9: memref<1x1x64xf32, #tpu.memory_space<vmem>>, %arg10: memref<1x1x64xf32, #tpu.memory_space<vmem>>, %arg11: memref<1x64x256xbf16, #tpu.memory_space<vmem>>, %arg12: memref<1x1x256xf32, #tpu.memory_space<vmem>>, %arg13: memref<1x256x64xbf16, #tpu.memory_space<vmem>>, %arg14: memref<1x1x64xf32, #tpu.memory_space<vmem>>, %arg15: memref<1x2x64xf32, #tpu.memory_space<vmem>>, %arg16: memref<10x64xf32, #tpu.memory_space<vmem>>) attributes {dimension_semantics = [#tpu.dimension_semantics<parallel>, #tpu.dimension_semantics<arbitrary>], iteration_bounds = array<i64: 2, 2>, scalar_prefetch = 0 : i64, scratch_operands = 1 : i64, tpu.core_type = #tpu.core_type<tc>, window_params = [{transform_indices = @transform_0, window_bounds = array<i64: 1, 10, 64>}, {transform_indices = @transform_1, window_bounds = array<i64: 1, 1, 64>}, {transform_indices = @transform_2, window_bounds = array<i64: 1, 1, 64>}, {transform_indices = @transform_3, window_bounds = array<i64: 1, 64, 192>}, {transform_indices = @transform_4, window_bounds = array<i64: 1, 1, 192>}, {transform_indices = @transform_5, window_bounds = array<i64: 1, 64, 64>}, {transform_indices = @transform_6, window_bounds = array<i64: 1, 1, 64>}, {transform_indices = @transform_7, window_bounds = array<i64: 1, 1, 64>}, {transform_indices = @transform_8, window_bounds = array<i64: 1, 1, 64>}, {transform_indices = @transform_9, window_bounds = array<i64: 1, 64, 256>}, {transform_indices = @transform_10, window_bounds = array<i64: 1, 1, 256>}, {transform_indices = @transform_11, window_bounds = array<i64: 1, 256, 64>}, {transform_indices = @transform_12, window_bounds = array<i64: 1, 1, 64>}, {transform_indices = @transform_13, window_bounds = array<i64: 1, 2, 64>}]} {
    %c0_i32 = arith.constant 0 : i32
    %0 = arith.cmpi eq, %arg1, %c0_i32 : i32
    %1 = arith.extui %0 : i1 to i32
    %c0_i32_0 = arith.constant 0 : i32
    %2 = arith.cmpi ne, %1, %c0_i32_0 : i32
    scf.if %2 {
      %c0_90 = arith.constant 0 : index
      %c0_91 = arith.constant 0 : index
      %c0_92 = arith.constant 0 : index
      %233 = vector.load %arg2[%c0_90, %c0_91, %c0_92] : memref<1x10x64xbf16, #tpu.memory_space<vmem>>, vector<1x10x64xbf16>
      %234 = vector.shape_cast %233 : vector<1x10x64xbf16> to vector<10x64xbf16>
      %235 = arith.extf %234 : vector<10x64xbf16> to vector<10x64xf32>
      %c0_93 = arith.constant 0 : index
      %c0_94 = arith.constant 0 : index
      %236 = vector.load %arg16[%c0_93, %c0_94] : memref<10x64xf32, #tpu.memory_space<vmem>>, vector<10x64xf32>
      tpu.vector_store %arg16[%c0_93, %c0_94], %235 {strides = array<i32>} : memref<10x64xf32, #tpu.memory_space<vmem>>, vector<10x64xf32>,
    } else {
    }
    %c0 = arith.constant 0 : index
    %c0_1 = arith.constant 0 : index
    %3 = vector.load %arg16[%c0, %c0_1] : memref<10x64xf32, #tpu.memory_space<vmem>>, vector<10x64xf32>
    %c0_2 = arith.constant 0 : index
    %c0_3 = arith.constant 0 : index
    %c0_4 = arith.constant 0 : index
    %4 = vector.load %arg3[%c0_2, %c0_3, %c0_4] : memref<1x1x64xf32, #tpu.memory_space<vmem>>, vector<1x1x64xf32>
    %5 = vector.shape_cast %4 : vector<1x1x64xf32> to vector<1x64xf32>
    %c0_5 = arith.constant 0 : index
    %c0_6 = arith.constant 0 : index
    %c0_7 = arith.constant 0 : index
    %6 = vector.load %arg4[%c0_5, %c0_6, %c0_7] : memref<1x1x64xf32, #tpu.memory_space<vmem>>, vector<1x1x64xf32>
    %7 = vector.shape_cast %6 : vector<1x1x64xf32> to vector<1x64xf32>
    %cst = arith.constant dense<0.000000e+00> : vector<10xf32>
    %8 = vector.multi_reduction <add>, %3, %cst [1] : vector<10x64xf32> to vector<10xf32>
    %9 = vector.shape_cast %8 : vector<10xf32> to vector<10x1xf32>
    %cst_8 = arith.constant 6.400000e+01 : f32
    %10 = vector.broadcast %cst_8 : f32 to vector<10x1xf32>
    %11 = arith.divf %9, %10 : vector<10x1xf32>
    %12 = vector.broadcast %11 : vector<10x1xf32> to vector<10x64xf32>
    %13 = arith.subf %3, %12 : vector<10x64xf32>
    %14 = arith.mulf %13, %13 : vector<10x64xf32>
    %cst_9 = arith.constant dense<0.000000e+00> : vector<10xf32>
    %15 = vector.multi_reduction <add>, %14, %cst_9 [1] : vector<10x64xf32> to vector<10xf32>
    %16 = vector.shape_cast %15 : vector<10xf32> to vector<10x1xf32>
    %cst_10 = arith.constant 6.400000e+01 : f32
    %17 = vector.broadcast %cst_10 : f32 to vector<10x1xf32>
    %18 = arith.divf %16, %17 : vector<10x1xf32>
    %19 = vector.broadcast %11 : vector<10x1xf32> to vector<10x64xf32>
    %20 = arith.subf %3, %19 : vector<10x64xf32>
    %cst_11 = arith.constant 9.99999997E-7 : f32
    %21 = vector.broadcast %cst_11 : f32 to vector<10x1xf32>
    %22 = arith.addf %18, %21 : vector<10x1xf32>
    %23 = math.rsqrt %22 : vector<10x1xf32>
    %24 = vector.broadcast %23 : vector<10x1xf32> to vector<10x64xf32>
    %25 = arith.mulf %20, %24 : vector<10x64xf32>
    %26 = vector.broadcast %5 : vector<1x64xf32> to vector<10x64xf32>
    %27 = arith.mulf %25, %26 : vector<10x64xf32>
    %28 = vector.broadcast %7 : vector<1x64xf32> to vector<10x64xf32>
    %29 = arith.addf %27, %28 : vector<10x64xf32>
    %30 = arith.truncf %29 : vector<10x64xf32> to vector<10x64xbf16>
    %c0_12 = arith.constant 0 : index
    %c0_13 = arith.constant 0 : index
    %c0_14 = arith.constant 0 : index
    %31 = vector.load %arg5[%c0_12, %c0_13, %c0_14] : memref<1x64x192xbf16, #tpu.memory_space<vmem>>, vector<1x64x192xbf16>
    %32 = vector.shape_cast %31 : vector<1x64x192xbf16> to vector<64x192xbf16>
    %cst_15 = arith.constant dense<0.000000e+00> : vector<10x192xf32>
    %33 = tpu.matmul %30, %32, %cst_15 {dimension_numbers = #tpu.dot_dimension_numbers<[1], [0], [0], [1], [0, 0, 1, 1], [], []>} : vector<10x64xbf16>, vector<64x192xbf16>, vector<10x192xf32> -> vector<10x192xf32>
    %c0_16 = arith.constant 0 : index
    %c0_17 = arith.constant 0 : index
    %c0_18 = arith.constant 0 : index
    %34 = vector.load %arg6[%c0_16, %c0_17, %c0_18] : memref<1x1x192xf32, #tpu.memory_space<vmem>>, vector<1x1x192xf32>
    %35 = vector.shape_cast %34 : vector<1x1x192xf32> to vector<1x192xf32>
    %36 = vector.broadcast %35 : vector<1x192xf32> to vector<10x192xf32>
    %37 = arith.addf %33, %36 : vector<10x192xf32>
    %38 = arith.truncf %37 : vector<10x192xf32> to vector<10x192xbf16>
    %39 = vector.extract_strided_slice %38 {offsets = [0, 0], sizes = [5, 192], strides = [1, 1]} : vector<10x192xbf16> to vector<5x192xbf16>
    %40 = vector.extract_strided_slice %39 {offsets = [0, 0], sizes = [5, 16], strides = [1, 1]} : vector<5x192xbf16> to vector<5x16xbf16>
    %41 = vector.extract_strided_slice %39 {offsets = [0, 64], sizes = [5, 16], strides = [1, 1]} : vector<5x192xbf16> to vector<5x16xbf16>
    %42 = vector.extract_strided_slice %39 {offsets = [0, 128], sizes = [5, 16], strides = [1, 1]} : vector<5x192xbf16> to vector<5x16xbf16>
    %cst_19 = arith.constant dense<0.000000e+00> : vector<5x5xf32>
    %43 = tpu.matmul %40, %41, %cst_19 {dimension_numbers = #tpu.dot_dimension_numbers<[1], [1], [0], [0], [0, 0, 1, 0], [], []>} : vector<5x16xbf16>, vector<5x16xbf16>, vector<5x5xf32> -> vector<5x5xf32>
    %cst_20 = arith.constant dense<0xFF800000> : vector<5xf32>
    %44 = vector.multi_reduction <maximumf>, %43, %cst_20 [1] : vector<5x5xf32> to vector<5xf32>
    %45 = vector.shape_cast %44 : vector<5xf32> to vector<5x1xf32>
    %46 = vector.broadcast %45 : vector<5x1xf32> to vector<5x5xf32>
    %47 = arith.subf %43, %46 : vector<5x5xf32>
    %48 = math.exp %47 : vector<5x5xf32>
    %cst_21 = arith.constant dense<0.000000e+00> : vector<5xf32>
    %49 = vector.multi_reduction <add>, %48, %cst_21 [1] : vector<5x5xf32> to vector<5xf32>
    %50 = vector.shape_cast %49 : vector<5xf32> to vector<5x1xf32>
    %51 = vector.broadcast %50 : vector<5x1xf32> to vector<5x5xf32>
    %52 = arith.divf %48, %51 : vector<5x5xf32>
    %53 = arith.truncf %52 : vector<5x5xf32> to vector<5x5xbf16>
    %cst_22 = arith.constant dense<0.000000e+00> : vector<5x16xf32>
    %54 = tpu.matmul %53, %42, %cst_22 {dimension_numbers = #tpu.dot_dimension_numbers<[1], [0], [0], [1], [0, 0, 1, 1], [], []>} : vector<5x5xbf16>, vector<5x16xbf16>, vector<5x16xf32> -> vector<5x16xf32>
    %55 = vector.extract_strided_slice %39 {offsets = [0, 16], sizes = [5, 16], strides = [1, 1]} : vector<5x192xbf16> to vector<5x16xbf16>
    %56 = vector.extract_strided_slice %39 {offsets = [0, 80], sizes = [5, 16], strides = [1, 1]} : vector<5x192xbf16> to vector<5x16xbf16>
    %57 = vector.extract_strided_slice %39 {offsets = [0, 144], sizes = [5, 16], strides = [1, 1]} : vector<5x192xbf16> to vector<5x16xbf16>
    %cst_23 = arith.constant dense<0.000000e+00> : vector<5x5xf32>
    %58 = tpu.matmul %55, %56, %cst_23 {dimension_numbers = #tpu.dot_dimension_numbers<[1], [1], [0], [0], [0, 0, 1, 0], [], []>} : vector<5x16xbf16>, vector<5x16xbf16>, vector<5x5xf32> -> vector<5x5xf32>
    %cst_24 = arith.constant dense<0xFF800000> : vector<5xf32>
    %59 = vector.multi_reduction <maximumf>, %58, %cst_24 [1] : vector<5x5xf32> to vector<5xf32>
    %60 = vector.shape_cast %59 : vector<5xf32> to vector<5x1xf32>
    %61 = vector.broadcast %60 : vector<5x1xf32> to vector<5x5xf32>
    %62 = arith.subf %58, %61 : vector<5x5xf32>
    %63 = math.exp %62 : vector<5x5xf32>
    %cst_25 = arith.constant dense<0.000000e+00> : vector<5xf32>
    %64 = vector.multi_reduction <add>, %63, %cst_25 [1] : vector<5x5xf32> to vector<5xf32>
    %65 = vector.shape_cast %64 : vector<5xf32> to vector<5x1xf32>
    %66 = vector.broadcast %65 : vector<5x1xf32> to vector<5x5xf32>
    %67 = arith.divf %63, %66 : vector<5x5xf32>
    %68 = arith.truncf %67 : vector<5x5xf32> to vector<5x5xbf16>
    %cst_26 = arith.constant dense<0.000000e+00> : vector<5x16xf32>
    %69 = tpu.matmul %68, %57, %cst_26 {dimension_numbers = #tpu.dot_dimension_numbers<[1], [0], [0], [1], [0, 0, 1, 1], [], []>} : vector<5x5xbf16>, vector<5x16xbf16>, vector<5x16xf32> -> vector<5x16xf32>
    %70 = vector.extract_strided_slice %39 {offsets = [0, 32], sizes = [5, 16], strides = [1, 1]} : vector<5x192xbf16> to vector<5x16xbf16>
    %71 = vector.extract_strided_slice %39 {offsets = [0, 96], sizes = [5, 16], strides = [1, 1]} : vector<5x192xbf16> to vector<5x16xbf16>
    %72 = vector.extract_strided_slice %39 {offsets = [0, 160], sizes = [5, 16], strides = [1, 1]} : vector<5x192xbf16> to vector<5x16xbf16>
    %cst_27 = arith.constant dense<0.000000e+00> : vector<5x5xf32>
    %73 = tpu.matmul %70, %71, %cst_27 {dimension_numbers = #tpu.dot_dimension_numbers<[1], [1], [0], [0], [0, 0, 1, 0], [], []>} : vector<5x16xbf16>, vector<5x16xbf16>, vector<5x5xf32> -> vector<5x5xf32>
    %cst_28 = arith.constant dense<0xFF800000> : vector<5xf32>
    %74 = vector.multi_reduction <maximumf>, %73, %cst_28 [1] : vector<5x5xf32> to vector<5xf32>
    %75 = vector.shape_cast %74 : vector<5xf32> to vector<5x1xf32>
    %76 = vector.broadcast %75 : vector<5x1xf32> to vector<5x5xf32>
    %77 = arith.subf %73, %76 : vector<5x5xf32>
    %78 = math.exp %77 : vector<5x5xf32>
    %cst_29 = arith.constant dense<0.000000e+00> : vector<5xf32>
    %79 = vector.multi_reduction <add>, %78, %cst_29 [1] : vector<5x5xf32> to vector<5xf32>
    %80 = vector.shape_cast %79 : vector<5xf32> to vector<5x1xf32>
    %81 = vector.broadcast %80 : vector<5x1xf32> to vector<5x5xf32>
    %82 = arith.divf %78, %81 : vector<5x5xf32>
    %83 = arith.truncf %82 : vector<5x5xf32> to vector<5x5xbf16>
    %cst_30 = arith.constant dense<0.000000e+00> : vector<5x16xf32>
    %84 = tpu.matmul %83, %72, %cst_30 {dimension_numbers = #tpu.dot_dimension_numbers<[1], [0], [0], [1], [0, 0, 1, 1], [], []>} : vector<5x5xbf16>, vector<5x16xbf16>, vector<5x16xf32> -> vector<5x16xf32>
    %85 = vector.extract_strided_slice %39 {offsets = [0, 48], sizes = [5, 16], strides = [1, 1]} : vector<5x192xbf16> to vector<5x16xbf16>
    %86 = vector.extract_strided_slice %39 {offsets = [0, 112], sizes = [5, 16], strides = [1, 1]} : vector<5x192xbf16> to vector<5x16xbf16>
    %87 = vector.extract_strided_slice %39 {offsets = [0, 176], sizes = [5, 16], strides = [1, 1]} : vector<5x192xbf16> to vector<5x16xbf16>
    %cst_31 = arith.constant dense<0.000000e+00> : vector<5x5xf32>
    %88 = tpu.matmul %85, %86, %cst_31 {dimension_numbers = #tpu.dot_dimension_numbers<[1], [1], [0], [0], [0, 0, 1, 0], [], []>} : vector<5x16xbf16>, vector<5x16xbf16>, vector<5x5xf32> -> vector<5x5xf32>
    %cst_32 = arith.constant dense<0xFF800000> : vector<5xf32>
    %89 = vector.multi_reduction <maximumf>, %88, %cst_32 [1] : vector<5x5xf32> to vector<5xf32>
    %90 = vector.shape_cast %89 : vector<5xf32> to vector<5x1xf32>
    %91 = vector.broadcast %90 : vector<5x1xf32> to vector<5x5xf32>
    %92 = arith.subf %88, %91 : vector<5x5xf32>
    %93 = math.exp %92 : vector<5x5xf32>
    %cst_33 = arith.constant dense<0.000000e+00> : vector<5xf32>
    %94 = vector.multi_reduction <add>, %93, %cst_33 [1] : vector<5x5xf32> to vector<5xf32>
    %95 = vector.shape_cast %94 : vector<5xf32> to vector<5x1xf32>
    %96 = vector.broadcast %95 : vector<5x1xf32> to vector<5x5xf32>
    %97 = arith.divf %93, %96 : vector<5x5xf32>
    %98 = arith.truncf %97 : vector<5x5xf32> to vector<5x5xbf16>
    %cst_34 = arith.constant dense<0.000000e+00> : vector<5x16xf32>
    %99 = tpu.matmul %98, %87, %cst_34 {dimension_numbers = #tpu.dot_dimension_numbers<[1], [0], [0], [1], [0, 0, 1, 1], [], []>} : vector<5x5xbf16>, vector<5x16xbf16>, vector<5x16xf32> -> vector<5x16xf32>
    %100 = tpu.concatenate %54, %69, %84, %99 in 1 : vector<5x16xf32>, vector<5x16xf32>, vector<5x16xf32>, vector<5x16xf32> -> vector<5x64xf32>
    %101 = vector.extract_strided_slice %38 {offsets = [5, 0], sizes = [5, 192], strides = [1, 1]} : vector<10x192xbf16> to vector<5x192xbf16>
    %102 = vector.extract_strided_slice %101 {offsets = [0, 0], sizes = [5, 16], strides = [1, 1]} : vector<5x192xbf16> to vector<5x16xbf16>
    %103 = vector.extract_strided_slice %101 {offsets = [0, 64], sizes = [5, 16], strides = [1, 1]} : vector<5x192xbf16> to vector<5x16xbf16>
    %104 = vector.extract_strided_slice %101 {offsets = [0, 128], sizes = [5, 16], strides = [1, 1]} : vector<5x192xbf16> to vector<5x16xbf16>
    %cst_35 = arith.constant dense<0.000000e+00> : vector<5x5xf32>
    %105 = tpu.matmul %102, %103, %cst_35 {dimension_numbers = #tpu.dot_dimension_numbers<[1], [1], [0], [0], [0, 0, 1, 0], [], []>} : vector<5x16xbf16>, vector<5x16xbf16>, vector<5x5xf32> -> vector<5x5xf32>
    %cst_36 = arith.constant dense<0xFF800000> : vector<5xf32>
    %106 = vector.multi_reduction <maximumf>, %105, %cst_36 [1] : vector<5x5xf32> to vector<5xf32>
    %107 = vector.shape_cast %106 : vector<5xf32> to vector<5x1xf32>
    %108 = vector.broadcast %107 : vector<5x1xf32> to vector<5x5xf32>
    %109 = arith.subf %105, %108 : vector<5x5xf32>
    %110 = math.exp %109 : vector<5x5xf32>
    %cst_37 = arith.constant dense<0.000000e+00> : vector<5xf32>
    %111 = vector.multi_reduction <add>, %110, %cst_37 [1] : vector<5x5xf32> to vector<5xf32>
    %112 = vector.shape_cast %111 : vector<5xf32> to vector<5x1xf32>
    %113 = vector.broadcast %112 : vector<5x1xf32> to vector<5x5xf32>
    %114 = arith.divf %110, %113 : vector<5x5xf32>
    %115 = arith.truncf %114 : vector<5x5xf32> to vector<5x5xbf16>
    %cst_38 = arith.constant dense<0.000000e+00> : vector<5x16xf32>
    %116 = tpu.matmul %115, %104, %cst_38 {dimension_numbers = #tpu.dot_dimension_numbers<[1], [0], [0], [1], [0, 0, 1, 1], [], []>} : vector<5x5xbf16>, vector<5x16xbf16>, vector<5x16xf32> -> vector<5x16xf32>
    %117 = vector.extract_strided_slice %101 {offsets = [0, 16], sizes = [5, 16], strides = [1, 1]} : vector<5x192xbf16> to vector<5x16xbf16>
    %118 = vector.extract_strided_slice %101 {offsets = [0, 80], sizes = [5, 16], strides = [1, 1]} : vector<5x192xbf16> to vector<5x16xbf16>
    %119 = vector.extract_strided_slice %101 {offsets = [0, 144], sizes = [5, 16], strides = [1, 1]} : vector<5x192xbf16> to vector<5x16xbf16>
    %cst_39 = arith.constant dense<0.000000e+00> : vector<5x5xf32>
    %120 = tpu.matmul %117, %118, %cst_39 {dimension_numbers = #tpu.dot_dimension_numbers<[1], [1], [0], [0], [0, 0, 1, 0], [], []>} : vector<5x16xbf16>, vector<5x16xbf16>, vector<5x5xf32> -> vector<5x5xf32>
    %cst_40 = arith.constant dense<0xFF800000> : vector<5xf32>
    %121 = vector.multi_reduction <maximumf>, %120, %cst_40 [1] : vector<5x5xf32> to vector<5xf32>
    %122 = vector.shape_cast %121 : vector<5xf32> to vector<5x1xf32>
    %123 = vector.broadcast %122 : vector<5x1xf32> to vector<5x5xf32>
    %124 = arith.subf %120, %123 : vector<5x5xf32>
    %125 = math.exp %124 : vector<5x5xf32>
    %cst_41 = arith.constant dense<0.000000e+00> : vector<5xf32>
    %126 = vector.multi_reduction <add>, %125, %cst_41 [1] : vector<5x5xf32> to vector<5xf32>
    %127 = vector.shape_cast %126 : vector<5xf32> to vector<5x1xf32>
    %128 = vector.broadcast %127 : vector<5x1xf32> to vector<5x5xf32>
    %129 = arith.divf %125, %128 : vector<5x5xf32>
    %130 = arith.truncf %129 : vector<5x5xf32> to vector<5x5xbf16>
    %cst_42 = arith.constant dense<0.000000e+00> : vector<5x16xf32>
    %131 = tpu.matmul %130, %119, %cst_42 {dimension_numbers = #tpu.dot_dimension_numbers<[1], [0], [0], [1], [0, 0, 1, 1], [], []>} : vector<5x5xbf16>, vector<5x16xbf16>, vector<5x16xf32> -> vector<5x16xf32>
    %132 = vector.extract_strided_slice %101 {offsets = [0, 32], sizes = [5, 16], strides = [1, 1]} : vector<5x192xbf16> to vector<5x16xbf16>
    %133 = vector.extract_strided_slice %101 {offsets = [0, 96], sizes = [5, 16], strides = [1, 1]} : vector<5x192xbf16> to vector<5x16xbf16>
    %134 = vector.extract_strided_slice %101 {offsets = [0, 160], sizes = [5, 16], strides = [1, 1]} : vector<5x192xbf16> to vector<5x16xbf16>
    %cst_43 = arith.constant dense<0.000000e+00> : vector<5x5xf32>
    %135 = tpu.matmul %132, %133, %cst_43 {dimension_numbers = #tpu.dot_dimension_numbers<[1], [1], [0], [0], [0, 0, 1, 0], [], []>} : vector<5x16xbf16>, vector<5x16xbf16>, vector<5x5xf32> -> vector<5x5xf32>
    %cst_44 = arith.constant dense<0xFF800000> : vector<5xf32>
    %136 = vector.multi_reduction <maximumf>, %135, %cst_44 [1] : vector<5x5xf32> to vector<5xf32>
    %137 = vector.shape_cast %136 : vector<5xf32> to vector<5x1xf32>
    %138 = vector.broadcast %137 : vector<5x1xf32> to vector<5x5xf32>
    %139 = arith.subf %135, %138 : vector<5x5xf32>
    %140 = math.exp %139 : vector<5x5xf32>
    %cst_45 = arith.constant dense<0.000000e+00> : vector<5xf32>
    %141 = vector.multi_reduction <add>, %140, %cst_45 [1] : vector<5x5xf32> to vector<5xf32>
    %142 = vector.shape_cast %141 : vector<5xf32> to vector<5x1xf32>
    %143 = vector.broadcast %142 : vector<5x1xf32> to vector<5x5xf32>
    %144 = arith.divf %140, %143 : vector<5x5xf32>
    %145 = arith.truncf %144 : vector<5x5xf32> to vector<5x5xbf16>
    %cst_46 = arith.constant dense<0.000000e+00> : vector<5x16xf32>
    %146 = tpu.matmul %145, %134, %cst_46 {dimension_numbers = #tpu.dot_dimension_numbers<[1], [0], [0], [1], [0, 0, 1, 1], [], []>} : vector<5x5xbf16>, vector<5x16xbf16>, vector<5x16xf32> -> vector<5x16xf32>
    %147 = vector.extract_strided_slice %101 {offsets = [0, 48], sizes = [5, 16], strides = [1, 1]} : vector<5x192xbf16> to vector<5x16xbf16>
    %148 = vector.extract_strided_slice %101 {offsets = [0, 112], sizes = [5, 16], strides = [1, 1]} : vector<5x192xbf16> to vector<5x16xbf16>
    %149 = vector.extract_strided_slice %101 {offsets = [0, 176], sizes = [5, 16], strides = [1, 1]} : vector<5x192xbf16> to vector<5x16xbf16>
    %cst_47 = arith.constant dense<0.000000e+00> : vector<5x5xf32>
    %150 = tpu.matmul %147, %148, %cst_47 {dimension_numbers = #tpu.dot_dimension_numbers<[1], [1], [0], [0], [0, 0, 1, 0], [], []>} : vector<5x16xbf16>, vector<5x16xbf16>, vector<5x5xf32> -> vector<5x5xf32>
    %cst_48 = arith.constant dense<0xFF800000> : vector<5xf32>
    %151 = vector.multi_reduction <maximumf>, %150, %cst_48 [1] : vector<5x5xf32> to vector<5xf32>
    %152 = vector.shape_cast %151 : vector<5xf32> to vector<5x1xf32>
    %153 = vector.broadcast %152 : vector<5x1xf32> to vector<5x5xf32>
    %154 = arith.subf %150, %153 : vector<5x5xf32>
    %155 = math.exp %154 : vector<5x5xf32>
    %cst_49 = arith.constant dense<0.000000e+00> : vector<5xf32>
    %156 = vector.multi_reduction <add>, %155, %cst_49 [1] : vector<5x5xf32> to vector<5xf32>
    %157 = vector.shape_cast %156 : vector<5xf32> to vector<5x1xf32>
    %158 = vector.broadcast %157 : vector<5x1xf32> to vector<5x5xf32>
    %159 = arith.divf %155, %158 : vector<5x5xf32>
    %160 = arith.truncf %159 : vector<5x5xf32> to vector<5x5xbf16>
    %cst_50 = arith.constant dense<0.000000e+00> : vector<5x16xf32>
    %161 = tpu.matmul %160, %149, %cst_50 {dimension_numbers = #tpu.dot_dimension_numbers<[1], [0], [0], [1], [0, 0, 1, 1], [], []>} : vector<5x5xbf16>, vector<5x16xbf16>, vector<5x16xf32> -> vector<5x16xf32>
    %162 = tpu.concatenate %116, %131, %146, %161 in 1 : vector<5x16xf32>, vector<5x16xf32>, vector<5x16xf32>, vector<5x16xf32> -> vector<5x64xf32>
    %163 = tpu.concatenate %100, %162 in 0 : vector<5x64xf32>, vector<5x64xf32> -> vector<10x64xf32>
    %164 = arith.truncf %163 : vector<10x64xf32> to vector<10x64xbf16>
    %c0_51 = arith.constant 0 : index
    %c0_52 = arith.constant 0 : index
    %c0_53 = arith.constant 0 : index
    %165 = vector.load %arg7[%c0_51, %c0_52, %c0_53] : memref<1x64x64xbf16, #tpu.memory_space<vmem>>, vector<1x64x64xbf16>
    %166 = vector.shape_cast %165 : vector<1x64x64xbf16> to vector<64x64xbf16>
    %cst_54 = arith.constant dense<0.000000e+00> : vector<10x64xf32>
    %167 = tpu.matmul %164, %166, %cst_54 {dimension_numbers = #tpu.dot_dimension_numbers<[1], [0], [0], [1], [0, 0, 1, 1], [], []>} : vector<10x64xbf16>, vector<64x64xbf16>, vector<10x64xf32> -> vector<10x64xf32>
    %c0_55 = arith.constant 0 : index
    %c0_56 = arith.constant 0 : index
    %c0_57 = arith.constant 0 : index
    %168 = vector.load %arg8[%c0_55, %c0_56, %c0_57] : memref<1x1x64xf32, #tpu.memory_space<vmem>>, vector<1x1x64xf32>
    %169 = vector.shape_cast %168 : vector<1x1x64xf32> to vector<1x64xf32>
    %170 = vector.broadcast %169 : vector<1x64xf32> to vector<10x64xf32>
    %171 = arith.addf %167, %170 : vector<10x64xf32>
    %172 = arith.addf %3, %171 : vector<10x64xf32>
    %c0_58 = arith.constant 0 : index
    %c0_59 = arith.constant 0 : index
    %c0_60 = arith.constant 0 : index
    %173 = vector.load %arg9[%c0_58, %c0_59, %c0_60] : memref<1x1x64xf32, #tpu.memory_space<vmem>>, vector<1x1x64xf32>
    %174 = vector.shape_cast %173 : vector<1x1x64xf32> to vector<1x64xf32>
    %c0_61 = arith.constant 0 : index
    %c0_62 = arith.constant 0 : index
    %c0_63 = arith.constant 0 : index
    %175 = vector.load %arg10[%c0_61, %c0_62, %c0_63] : memref<1x1x64xf32, #tpu.memory_space<vmem>>, vector<1x1x64xf32>
    %176 = vector.shape_cast %175 : vector<1x1x64xf32> to vector<1x64xf32>
    %cst_64 = arith.constant dense<0.000000e+00> : vector<10xf32>
    %177 = vector.multi_reduction <add>, %172, %cst_64 [1] : vector<10x64xf32> to vector<10xf32>
    %178 = vector.shape_cast %177 : vector<10xf32> to vector<10x1xf32>
    %cst_65 = arith.constant 6.400000e+01 : f32
    %179 = vector.broadcast %cst_65 : f32 to vector<10x1xf32>
    %180 = arith.divf %178, %179 : vector<10x1xf32>
    %181 = vector.broadcast %180 : vector<10x1xf32> to vector<10x64xf32>
    %182 = arith.subf %172, %181 : vector<10x64xf32>
    %183 = arith.mulf %182, %182 : vector<10x64xf32>
    %cst_66 = arith.constant dense<0.000000e+00> : vector<10xf32>
    %184 = vector.multi_reduction <add>, %183, %cst_66 [1] : vector<10x64xf32> to vector<10xf32>
    %185 = vector.shape_cast %184 : vector<10xf32> to vector<10x1xf32>
    %cst_67 = arith.constant 6.400000e+01 : f32
    %186 = vector.broadcast %cst_67 : f32 to vector<10x1xf32>
    %187 = arith.divf %185, %186 : vector<10x1xf32>
    %188 = vector.broadcast %180 : vector<10x1xf32> to vector<10x64xf32>
    %189 = arith.subf %172, %188 : vector<10x64xf32>
    %cst_68 = arith.constant 9.99999997E-7 : f32
    %190 = vector.broadcast %cst_68 : f32 to vector<10x1xf32>
    %191 = arith.addf %187, %190 : vector<10x1xf32>
    %192 = math.rsqrt %191 : vector<10x1xf32>
    %193 = vector.broadcast %192 : vector<10x1xf32> to vector<10x64xf32>
    %194 = arith.mulf %189, %193 : vector<10x64xf32>
    %195 = vector.broadcast %174 : vector<1x64xf32> to vector<10x64xf32>
    %196 = arith.mulf %194, %195 : vector<10x64xf32>
    %197 = vector.broadcast %176 : vector<1x64xf32> to vector<10x64xf32>
    %198 = arith.addf %196, %197 : vector<10x64xf32>
    %199 = arith.truncf %198 : vector<10x64xf32> to vector<10x64xbf16>
    %c0_69 = arith.constant 0 : index
    %c0_70 = arith.constant 0 : index
    %c0_71 = arith.constant 0 : index
    %200 = vector.load %arg11[%c0_69, %c0_70, %c0_71] : memref<1x64x256xbf16, #tpu.memory_space<vmem>>, vector<1x64x256xbf16>
    %201 = vector.shape_cast %200 : vector<1x64x256xbf16> to vector<64x256xbf16>
    %cst_72 = arith.constant dense<0.000000e+00> : vector<10x256xf32>
    %202 = tpu.matmul %199, %201, %cst_72 {dimension_numbers = #tpu.dot_dimension_numbers<[1], [0], [0], [1], [0, 0, 1, 1], [], []>} : vector<10x64xbf16>, vector<64x256xbf16>, vector<10x256xf32> -> vector<10x256xf32>
    %c0_73 = arith.constant 0 : index
    %c0_74 = arith.constant 0 : index
    %c0_75 = arith.constant 0 : index
    %203 = vector.load %arg12[%c0_73, %c0_74, %c0_75] : memref<1x1x256xf32, #tpu.memory_space<vmem>>, vector<1x1x256xf32>
    %204 = vector.shape_cast %203 : vector<1x1x256xf32> to vector<1x256xf32>
    %205 = vector.broadcast %204 : vector<1x256xf32> to vector<10x256xf32>
    %206 = arith.addf %202, %205 : vector<10x256xf32>
    %207 = arith.mulf %206, %206 : vector<10x256xf32>
    %208 = arith.mulf %206, %207 : vector<10x256xf32>
    %cst_76 = arith.constant 4.471500e-02 : f32
    %209 = vector.broadcast %cst_76 : f32 to vector<10x256xf32>
    %210 = arith.mulf %209, %208 : vector<10x256xf32>
    %211 = arith.addf %206, %210 : vector<10x256xf32>
    %cst_77 = arith.constant 0.797884583 : f32
    %212 = vector.broadcast %cst_77 : f32 to vector<10x256xf32>
    %213 = arith.mulf %212, %211 : vector<10x256xf32>
    %214 = math.tanh %213 : vector<10x256xf32>
    %cst_78 = arith.constant 1.000000e+00 : f32
    %215 = vector.broadcast %cst_78 : f32 to vector<10x256xf32>
    %216 = arith.addf %215, %214 : vector<10x256xf32>
    %cst_79 = arith.constant 5.000000e-01 : f32
    %217 = vector.broadcast %cst_79 : f32 to vector<10x256xf32>
    %218 = arith.mulf %217, %216 : vector<10x256xf32>
    %219 = arith.mulf %206, %218 : vector<10x256xf32>
    %220 = arith.truncf %219 : vector<10x256xf32> to vector<10x256xbf16>
    %c0_80 = arith.constant 0 : index
    %c0_81 = arith.constant 0 : index
    %c0_82 = arith.constant 0 : index
    %221 = vector.load %arg13[%c0_80, %c0_81, %c0_82] : memref<1x256x64xbf16, #tpu.memory_space<vmem>>, vector<1x256x64xbf16>
    %222 = vector.shape_cast %221 : vector<1x256x64xbf16> to vector<256x64xbf16>
    %cst_83 = arith.constant dense<0.000000e+00> : vector<10x64xf32>
    %223 = tpu.matmul %220, %222, %cst_83 {dimension_numbers = #tpu.dot_dimension_numbers<[1], [0], [0], [1], [0, 0, 1, 1], [], []>} : vector<10x256xbf16>, vector<256x64xbf16>, vector<10x64xf32> -> vector<10x64xf32>
    %c0_84 = arith.constant 0 : index
    %c0_85 = arith.constant 0 : index
    %c0_86 = arith.constant 0 : index
    %224 = vector.load %arg14[%c0_84, %c0_85, %c0_86] : memref<1x1x64xf32, #tpu.memory_space<vmem>>, vector<1x1x64xf32>
    %225 = vector.shape_cast %224 : vector<1x1x64xf32> to vector<1x64xf32>
    %226 = vector.broadcast %225 : vector<1x64xf32> to vector<10x64xf32>
    %227 = arith.addf %223, %226 : vector<10x64xf32>
    %228 = arith.addf %172, %227 : vector<10x64xf32>
    %c0_87 = arith.constant 0 : index
    %c0_88 = arith.constant 0 : index
    %229 = vector.load %arg16[%c0_87, %c0_88] : memref<10x64xf32, #tpu.memory_space<vmem>>, vector<10x64xf32>
    tpu.vector_store %arg16[%c0_87, %c0_88], %228 {strides = array<i32>} : memref<10x64xf32, #tpu.memory_space<vmem>>, vector<10x64xf32>,
    %c1_i32 = arith.constant 1 : i32
    %230 = arith.cmpi eq, %arg1, %c1_i32 : i32
    %231 = arith.extui %230 : i1 to i32
    %c0_i32_89 = arith.constant 0 : i32
    %232 = arith.cmpi ne, %231, %c0_i32_89 : i32
    scf.if %232 {
      %233 = vector.extract_strided_slice %228 {offsets = [0, 0], sizes = [1, 64], strides = [1, 1]} : vector<10x64xf32> to vector<1x64xf32>
      %234 = vector.extract_strided_slice %228 {offsets = [5, 0], sizes = [1, 64], strides = [1, 1]} : vector<10x64xf32> to vector<1x64xf32>
      %235 = tpu.concatenate %233, %234 in 0 : vector<1x64xf32>, vector<1x64xf32> -> vector<2x64xf32>
      %c0_90 = arith.constant 0 : index
      %c0_91 = arith.constant 0 : index
      %c0_92 = arith.constant 0 : index
      %236 = vector.load %arg15[%c0_90, %c0_91, %c0_92] : memref<1x2x64xf32, #tpu.memory_space<vmem>>, vector<1x2x64xf32>
      %237 = vector.shape_cast %236 : vector<1x2x64xf32> to vector<2x64xf32>
      %238 = vector.shape_cast %235 : vector<2x64xf32> to vector<1x2x64xf32>
      tpu.vector_store %arg15[%c0_90, %c0_91, %c0_92], %238 {strides = array<i32>} : memref<1x2x64xf32, #tpu.memory_space<vmem>>, vector<1x2x64xf32>,
    } else {
    }
    return
  }
  func.func @transform_0(%arg0: i32, %arg1: i32) -> (i32, i32, i32) {
    %c0_i32 = arith.constant 0 : i32
    %c0_i32_0 = arith.constant 0 : i32
    %c0_i32_1 = arith.constant 0 : i32
    return %arg0, %c0_i32, %c0_i32_0 : i32, i32, i32
  }
  func.func @transform_1(%arg0: i32, %arg1: i32) -> (i32, i32, i32) {
    %c0_i32 = arith.constant 0 : i32
    %c0_i32_0 = arith.constant 0 : i32
    %c0_i32_1 = arith.constant 0 : i32
    return %arg1, %c0_i32, %c0_i32_0 : i32, i32, i32
  }
  func.func @transform_2(%arg0: i32, %arg1: i32) -> (i32, i32, i32) {
    %c0_i32 = arith.constant 0 : i32
    %c0_i32_0 = arith.constant 0 : i32
    %c0_i32_1 = arith.constant 0 : i32
    return %arg1, %c0_i32, %c0_i32_0 : i32, i32, i32
  }
  func.func @transform_3(%arg0: i32, %arg1: i32) -> (i32, i32, i32) {
    %c0_i32 = arith.constant 0 : i32
    %c0_i32_0 = arith.constant 0 : i32
    %c0_i32_1 = arith.constant 0 : i32
    return %arg1, %c0_i32, %c0_i32_0 : i32, i32, i32
  }
  func.func @transform_4(%arg0: i32, %arg1: i32) -> (i32, i32, i32) {
    %c0_i32 = arith.constant 0 : i32
    %c0_i32_0 = arith.constant 0 : i32
    %c0_i32_1 = arith.constant 0 : i32
    return %arg1, %c0_i32, %c0_i32_0 : i32, i32, i32
  }
  func.func @transform_5(%arg0: i32, %arg1: i32) -> (i32, i32, i32) {
    %c0_i32 = arith.constant 0 : i32
    %c0_i32_0 = arith.constant 0 : i32
    %c0_i32_1 = arith.constant 0 : i32
    return %arg1, %c0_i32, %c0_i32_0 : i32, i32, i32
  }
  func.func @transform_6(%arg0: i32, %arg1: i32) -> (i32, i32, i32) {
    %c0_i32 = arith.constant 0 : i32
    %c0_i32_0 = arith.constant 0 : i32
    %c0_i32_1 = arith.constant 0 : i32
    return %arg1, %c0_i32, %c0_i32_0 : i32, i32, i32
  }
  func.func @transform_7(%arg0: i32, %arg1: i32) -> (i32, i32, i32) {
    %c0_i32 = arith.constant 0 : i32
    %c0_i32_0 = arith.constant 0 : i32
    %c0_i32_1 = arith.constant 0 : i32
    return %arg1, %c0_i32, %c0_i32_0 : i32, i32, i32
  }
  func.func @transform_8(%arg0: i32, %arg1: i32) -> (i32, i32, i32) {
    %c0_i32 = arith.constant 0 : i32
    %c0_i32_0 = arith.constant 0 : i32
    %c0_i32_1 = arith.constant 0 : i32
    return %arg1, %c0_i32, %c0_i32_0 : i32, i32, i32
  }
  func.func @transform_9(%arg0: i32, %arg1: i32) -> (i32, i32, i32) {
    %c0_i32 = arith.constant 0 : i32
    %c0_i32_0 = arith.constant 0 : i32
    %c0_i32_1 = arith.constant 0 : i32
    return %arg1, %c0_i32, %c0_i32_0 : i32, i32, i32
  }
  func.func @transform_10(%arg0: i32, %arg1: i32) -> (i32, i32, i32) {
    %c0_i32 = arith.constant 0 : i32
    %c0_i32_0 = arith.constant 0 : i32
    %c0_i32_1 = arith.constant 0 : i32
    return %arg1, %c0_i32, %c0_i32_0 : i32, i32, i32
  }
  func.func @transform_11(%arg0: i32, %arg1: i32) -> (i32, i32, i32) {
    %c0_i32 = arith.constant 0 : i32
    %c0_i32_0 = arith.constant 0 : i32
    %c0_i32_1 = arith.constant 0 : i32
    return %arg1, %c0_i32, %c0_i32_0 : i32, i32, i32
  }
  func.func @transform_12(%arg0: i32, %arg1: i32) -> (i32, i32, i32) {
    %c0_i32 = arith.constant 0 : i32
    %c0_i32_0 = arith.constant 0 : i32
    %c0_i32_1 = arith.constant 0 : i32
    return %arg1, %c0_i32, %c0_i32_0 : i32, i32, i32
  }
  func.func @transform_13(%arg0: i32, %arg1: i32) -> (i32, i32, i32) {
    %c0_i32 = arith.constant 0 : i32
    %c0_i32_0 = arith.constant 0 : i32
    %c0_i32_1 = arith.constant 0 : i32
    return %arg0, %c0_i32, %c0_i32_0 : i32, i32, i32
  }
}

</mosaic_0001>

<bundles_post_ra>
// kernel: tile.9
= control target key start
LH: loop header
LB: loop body
LE: loop exit
PB: predicated region body
PF: predicated region fallthrough
CT: control target
= control target key end

     0   :  { %vm3_vm0 = vcmask 523264   ;;  %s34_s0 = inlined_call_operand.vmem [shape: f32[2,5,64], index: 0, kind: input, shape index: {}]   ;;  %s35_s1 = inlined_call_operand.vmem [shape: f32[10,64], index: 1, kind: output, shape index: {}]  }
   0x1   :  { %v2_v0 = vld [vmem:[%s34_s0] sm:$0x1f]   ;;  %v10_v1 = vld [vmem:[%s34_s0 + $0x8] sm:$0x1f]  }
   0x2   :  { %4 = vst.msk [vmem:[%s35_s1] sm:$0x1f] %vm3_vm0, %v2_v0   ;;  %11 = vst.msk [vmem:[%s35_s1 + $0x5] sm:$0x1f] %vm3_vm0, %v10_v1  }

// kernel: dino_classifier_forward.3
= control target key start
LH: loop header
LB: loop body
LE: loop exit
PB: predicated region body
PF: predicated region fallthrough
CT: control target
= control target key end

     0   :  { %s937_s12 = smov 0   ;;  %s1095_s0 = inlined_call_operand.vmem [shape: bf16[2,10,640], index: 0, kind: input, shape index: {}]   ;;  %s1096_s1 = inlined_call_operand.vmem [shape: bf16[640,64], index: 1, kind: input, shape index: {}]   ;;  %s1097_s2 = inlined_call_operand.vmem [shape: f32[10,64], index: 2, kind: input, shape index: {}]   ;;  %s1098_s3 = inlined_call_operand.vmem [shape: bf16[2,10,64], index: 3, kind: output, shape index: {}]  }
   0x1 LB: > { %s716_s13 = sadd.s32 4294967295, %s913_s12   ;;  %p720_p0 = scmp.ge.s32.totalorder %s913_s12, 1  ;;  %s913_s12 = sphi %s937_s12, %s13_s12  }
   0x2   : > { %p137_p1 = scmp.lt.s32.totalorder %s913_s12, 3 }
   0x4   : > { %p138_p2 = pnand %p720_p0, %p137_p1 }
   0x5   : > { %v860_v0 = vld [vmem:[%s1096_s1 + $0x40] sm:$0xff] (!%p138_p2)   ;;  %v864_v4 = vld [vmem:[%s1096_s1 + $0x48] sm:$0xff] (!%p138_p2)   ;;  %v868_v8 = vld [vmem:[%s1096_s1 + $0x50] sm:$0xff] (!%p138_p2)   ;;  %p161_p3 = scmp.lt.s32.totalorder (!%p138_p2), %s716_s13, 1  ;;  %v915_v34 = vmov (!%p138_p2), 0.0   ;;  %vm916_vm0 = vmmov (!%p138_p2), 0  }
   0x6   : > { %141 = sbr.rel (%p138_p2) target bundleno = 289 (0x121), region = 32  ;;  %v861_v1 = vld [vmem:[%s1096_s1] sm:$0xff] (!%p138_p2)   ;;  %776 = vmatprep.subr.bf16.mxu0 (!%p138_p2), %v860_v0  ;;  %v865_v5 = vld [vmem:[%s1096_s1 + $0x8] sm:$0xff] (!%p138_p2)   ;;  %v869_v9 = vld [vmem:[%s1096_s1 + $0x10] sm:$0xff] (!%p138_p2)   ;;  %vm657_vm1 = vcmask (!%p138_p2), 519168   ;;  %vm659_vm2 = vcmask (!%p138_p2), 516096  }
   0x7   : > { %v862_v2 = vld [vmem:[%s1096_s1 + $0xc0] sm:$0xff] (!%p138_p2)   ;;  %777 = vmatpush3.bf16.msra.mxu0 (!%p138_p2), %v861_v1  ;;  %v866_v6 = vld [vmem:[%s1096_s1 + $0xc8] sm:$0xff] (!%p138_p2)   ;;  %v870_v10 = vld [vmem:[%s1096_s1 + $0xd0] sm:$0xff] (!%p138_p2)  }
   0x8   : > { %v863_v3 = vld [vmem:[%s1096_s1 + $0x80] sm:$0xff] (!%p138_p2)   ;;  %798 = vmatprep.subr.bf16.mxu1 (!%p138_p2), %v862_v2  ;;  %778 = vmatprep.subr.bf16.mxu0 (!%p138_p2), %v864_v4  ;;  %v867_v7 = vld [vmem:[%s1096_s1 + $0x88] sm:$0xff] (!%p138_p2)   ;;  %v871_v11 = vld [vmem:[%s1096_s1 + $0x90] sm:$0xff] (!%p138_p2)  }
   0x9   : > { %799 = vmatpush3.bf16.msra.mxu1 (!%p138_p2), %v863_v3  ;;  %v872_v12 = vld [vmem:[%s1096_s1 + $0x58] sm:$0xff] (!%p138_p2)   ;;  %v876_v16 = vld [vmem:[%s1096_s1 + $0x60] sm:$0xff] (!%p138_p2)   ;;  %v880_v20 = vld [vmem:[%s1096_s1 + $0x68] sm:$0xff] (!%p138_p2)  }
   0xa   : > { %800 = vmatprep.subr.bf16.mxu1 (!%p138_p2), %v866_v6  ;;  %v873_v13 = vld [vmem:[%s1096_s1 + $0x18] sm:$0xff] (!%p138_p2)   ;;  %v877_v17 = vld [vmem:[%s1096_s1 + $0x20] sm:$0xff] (!%p138_p2)   ;;  %v881_v21 = vld [vmem:[%s1096_s1 + $0x28] sm:$0xff] (!%p138_p2)  }
   0xb   : > { %779 = vmatpush3.bf16.msra.mxu0 (!%p138_p2), %v865_v5  ;;  %v874_v14 = vld [vmem:[%s1096_s1 + $0xd8] sm:$0xff] (!%p138_p2)   ;;  %v878_v18 = vld [vmem:[%s1096_s1 + $0xe0] sm:$0xff] (!%p138_p2)   ;;  %v882_v22 = vld [vmem:[%s1096_s1 + $0xe8] sm:$0xff] (!%p138_p2)  }
   0xc   : > { %780 = vmatprep.subr.bf16.mxu0 (!%p138_p2), %v868_v8  ;;  %v875_v15 = vld [vmem:[%s1096_s1 + $0x98] sm:$0xff] (!%p138_p2)   ;;  %v879_v19 = vld [vmem:[%s1096_s1 + $0xa0] sm:$0xff] (!%p138_p2)   ;;  %v883_v23 = vld [vmem:[%s1096_s1 + $0xa8] sm:$0xff] (!%p138_p2)  }
   0xd   : > { %801 = vmatpush3.bf16.msra.mxu1 %v867_v7  ;;  %s1100_s13 = smov (!%p161_p3, %s716_s13), 1  ;;  %v884_v24 = vld [vmem:[%s1096_s1 + $0x70] sm:$0xff]   ;;  %v888_v28 = vld [vmem:[%s1096_s1 + $0x78] sm:$0xff]   ;;  %v898_v37 = vld [vmem:[%s1096_s1 + $0x100] sm:$0xff]  }
   0xe   : > { %802 = vmatprep.subr.bf16.mxu1 %v870_v10  ;;  %s849_s14 = smul.u32 40, %s1100_s13  ;;  %v885_v25 = vld [vmem:[%s1096_s1 + $0x30] sm:$0xff]   ;;  %v889_v29 = vld [vmem:[%s1096_s1 + $0x38] sm:$0xff]   ;;  %v899_v38 = vld [vmem:[%s1096_s1 + $0x108] sm:$0xff]  }
   0xf   : > { %781 = vmatpush3.bf16.msra.mxu0 %v869_v9  ;;  %v886_v26 = vld [vmem:[%s1096_s1 + $0xf0] sm:$0xff]   ;;  %v890_v30 = vld [vmem:[%s1096_s1 + $0xf8] sm:$0xff]   ;;  %v902_v41 = vld [vmem:[%s1096_s1 + $0x120] sm:$0xff]  }
  0x10   : > { %782 = vmatprep.subr.bf16.mxu0 %v872_v12  ;;  %v887_v27 = vld [vmem:[%s1096_s1 + $0xb0] sm:$0xff]   ;;  %s1042_s25 = scalar_lea.vmem %s1095_s0, %s849_s14  ;;  %v894_v33 = vld [vmem:[%s1096_s1 + $0xb8] sm:$0xff]   ;;  %v903_v42 = vld [vmem:[%s1096_s1 + $0x128] sm:$0xff]  }
  0x11   : > { %803 = vmatpush3.bf16.msra.mxu1 %v871_v11  ;;  %v891_v31 = vld [vmem:[%s1042_s25] ss:$20 sps:$4 sm:$0x1f]   ;;  %v893_v32 = vld [vmem:[%s1042_s25 + $0x4] ss:$20 sps:$4 sm:$0x1f]  }
  0x12   : > { %804 = vmatprep.subr.bf16.mxu1 %v874_v14  ;;  %558 = vmatprep.mubr.bf16.mxu0 %v893_v32  ;;  %v895_v35 = vld [vmem:[%s1042_s25 + $0x8] ss:$20 sps:$4 sm:$0x1f]   ;;  %v897_v36 = vld [vmem:[%s1042_s25 + $0xc] ss:$20 sps:$4 sm:$0x1f]  }
  0x13   : > { %783 = vmatpush3.bf16.msra.mxu0 %v873_v13  ;;  %599 = vmatprep.mubr.bf16.mxu1 %v897_v36  ;;  %v900_v39 = vld [vmem:[%s1096_s1 + $0x110] sm:$0xff]   ;;  %v901_v40 = vld [vmem:[%s1096_s1 + $0x118] sm:$0xff]   ;;  %v258_v47 = vld [vmem:[%s1097_s2] sm:$0xff] }
  0x14   : > { %784 = vmatprep.subr.bf16.mxu0 %v876_v16  ;;  %v904_v43 = vld [vmem:[%s1096_s1 + $0x130] sm:$0xff]   ;;  %v905_v44 = vld [vmem:[%s1096_s1 + $0x138] sm:$0xff]   ;;  %v259_v52 = vld [vmem:[%s1097_s2 + $0x8] sm:$0x3] }
  0x15   : > { %805 = vmatpush3.bf16.msra.mxu1 %v875_v15  ;;  %v906_v45 = vld [vmem:[%s1042_s25 + $0x10] ss:$20 sps:$4 sm:$0x1f]   ;;  %s773_s25 = sshll.u32 %s1100_s13, 3 }
  0x16   : > { %806 = vmatprep.subr.bf16.mxu1 %v878_v18  ;;  %s170_s30 = scalar_lea.vmem %s1098_s3, %s773_s25 }
  0x17   : > { %785 = vmatpush3.bf16.msra.mxu0 %v877_v17 }
  0x18   : > { %786 = vmatprep.subr.bf16.mxu0 %v880_v20 }
  0x19   : > { %807 = vmatpush3.bf16.msra.mxu1 %v879_v19 }
  0x1a   : > { %808 = vmatprep.subr.bf16.mxu1 %v882_v22 }
  0x1b   : > { %787 = vmatpush3.bf16.msra.mxu0 %v881_v21 }
  0x1c   : > { %788 = vmatprep.subr.bf16.mxu0 %v884_v24 }
  0x1d   : > { %809 = vmatpush3.bf16.msra.mxu1 %v883_v23 }
  0x1e   : > { %810 = vmatprep.subr.bf16.mxu1 %v886_v26 }
  0x1f   : > { %789 = vmatpush3.bf16.msra.mxu0 %v885_v25 }
  0x20   : > { %790 = vmatprep.subr.bf16.mxu0 %v888_v28 }
  0x21   : > { %811 = vmatpush3.bf16.msra.mxu1 %v887_v27 }
  0x22   : > { %812 = vmatprep.subr.bf16.mxu1 %v890_v30 }
  0x23   : > { %791 = vmatpush3.bf16.msra.mxu0 %v889_v29 }
  0x24   : > { %829 = vmatprep.subr.bf16.mxu0 %v915_v34 }
  0x25   : > { %813 = vmatpush3.bf16.msra.mxu1 %v894_v33 }
  0x26   : > { %559 = vmatmul.mubr.bf16.vlgmr.msra.gmra.mrb[0].mxu0 %v891_v31 }
  0x27   : > { %845 = vmatprep.mubr.msk.bf16.mxu0 %vm916_vm0, %v915_v34  ;;  %830 = vmatpush3.bf16.msra.mxu0 %v898_v37 }
  0x28   : > { %600 = vmatmul.mubr.bf16.vlgmr.msra.gmra.mrb[0].mxu1 %v895_v35  ;;  %831 = vmatprep.subr.bf16.mxu0 %v915_v34 }
  0x2b   : > { %832 = vmatpush3.bf16.msra.mxu0 %v899_v38 }
  0x2c   : > { %833 = vmatprep.subr.bf16.mxu0 %v915_v34 }
  0x2f   : > { %834 = vmatpush3.bf16.msra.mxu0 %v900_v39 }
  0x30   : > { %835 = vmatprep.subr.bf16.mxu0 %v915_v34 }
  0x33   : > { %836 = vmatpush3.bf16.msra.mxu0 %v901_v40 }
  0x34   : > { %837 = vmatprep.subr.bf16.mxu0 %v915_v34 }
  0x37   : > { %838 = vmatpush3.bf16.msra.mxu0 %v902_v41 }
  0x38   : > { %839 = vmatprep.subr.bf16.mxu0 %v915_v34 }
  0x3b   : > { %840 = vmatpush3.bf16.msra.mxu0 %v903_v42 }
  0x3c   : > { %841 = vmatprep.subr.bf16.mxu0 %v915_v34 }
  0x3f   : > { %842 = vmatpush3.bf16.msra.mxu0 %v904_v43 }
  0x40   : > { %843 = vmatprep.subr.bf16.mxu0 %v915_v34 }
  0x43   : > { %844 = vmatpush3.bf16.msra.mxu0 %v905_v44 }
  0x46   : > { %846 = vmatmul.mubr.bf16.vlgmr.msra.gmra.mrb[4].mxu0 %v906_v45 }
  0xf9   : > { %v792_v46 = vpop.f32.mrb[0].mxu0 }
  0xfa   : > { %v793_v48 = vpop.f32.mrb[1].mxu0 }
  0xfb   : > { %v794_v49 = vadd.f32 %v793_v48, %v792_v46  ;;  %v795_v50 = vpop.f32.mrb[2].mxu0  ;;  %v814_v51 = vpop.f32.mrb[0].mxu1 }
  0xfc   : > { %v796_v53 = vpop.f32.mrb[3].mxu0  ;;  %v815_v54 = vpop.f32.mrb[1].mxu1 }
  0xfd   : > { %v561_v55 = vadd.f32 %v794_v49, %v258_v47  ;;  %v797_v56 = vadd.f32 %v796_v53, %v795_v50  ;;  %v816_v57 = vadd.f32 %v815_v54, %v814_v51  ;;  %v817_v58 = vpop.f32.mrb[2].mxu1 }
  0xfe   : > { %v818_v59 = vpop.f32.mrb[3].mxu1 }
  0xff   : > { %v564_v60 = vadd.f32 %v797_v56, %v259_v52  ;;  %v819_v61 = vadd.f32 %v818_v59, %v817_v58  ;;  %v602_v62 = vadd.f32 %v816_v57, %v561_v55 }
 0x101   : > { %v605_v63 = vadd.f32 %v819_v61, %v564_v60 }
 0x119   : > { %v642_v0 = vpop.f32.mrb[4].mxu0 }
 0x11a   : > { %v643_v1 = vadd.f32 %v642_v0, %v602_v62  ;;  %v847_v2 = vpop.f32.mrb[5].mxu0 }
 0x11b   : > { %v645_v3 = vpop.f32.mrb[6].mxu0 }
 0x11c   : > { %v774_v4 = vpack.c.bf16 %v643_v1, %v643_v1  ;;  %v646_v5 = vadd.f32 %v645_v3, %v605_v63  ;;  %v848_v6 = vpop.f32.mrb[7].mxu0 }
 0x11e   : > { %658 = vst.msk [vmem:[%s170_s30] sm:$0xf] %vm657_vm1, %v774_v4  ;;  %v775_v7 = vpack.c.bf16 %v646_v5, %v646_v5 }
 0x120   : > { %660 = vst.msk [vmem:[%s170_s30 + $0x4] sm:$0x1] %vm659_vm2, %v775_v7 }
 0x121 PF: > { %s13_s12 = sadd.s32 1, %s913_s12  }
 0x122   : > { %p10_p4 = scmp.ge.s32.totalorder %s13_s12, 4  }
 0x124   :  { %12 = sbr.rel (!%p10_p4) target bundleno = 1 (0x1), region = 62 }

// kernel: dino_classifier_forward.4
= control target key start
LH: loop header
LB: loop body
LE: loop exit
PB: predicated region body
PF: predicated region fallthrough
CT: control target
= control target key end

     0   :  { %s2936_s25 = smov 0   ;;  %s2938_s26 = smov 0   ;;  %s3336_s0 = inlined_call_operand.vmem [shape: bf16[2,10,64], index: 0, kind: input, shape index: {}]   ;;  %s3337_s1 = inlined_call_operand.vmem [shape: f32[2,1,64], index: 1, kind: input, shape index: {}]   ;;  %s3338_s2 = inlined_call_operand.vmem [shape: f32[2,1,64], index: 2, kind: input, shape index: {}]   ;;  %s3339_s3 = inlined_call_operand.vmem [shape: bf16[2,64,192], index: 3, kind: input, shape index: {}]   ;;  %s3340_s4 = inlined_call_operand.vmem [shape: f32[2,1,192], index: 4, kind: input, shape index: {}]   ;;  %s3341_s5 = inlined_call_operand.vmem [shape: bf16[2,64,64], index: 5, kind: input, shape index: {}]   ;;  %s3342_s6 = inlined_call_operand.vmem [shape: f32[2,1,64], index: 6, kind: input, shape index: {}]   ;;  %s3343_s7 = inlined_call_operand.vmem [shape: f32[2,1,64], index: 7, kind: input, shape index: {}]   ;;  %s3344_s8 = inlined_call_operand.vmem [shape: f32[2,1,64], index: 8, kind: input, shape index: {}]   ;;  %s3345_s9 = inlined_call_operand.vmem [shape: bf16[2,64,256], index: 9, kind: input, shape index: {}]   ;;  %s3346_s10 = inlined_call_operand.vmem [shape: f32[2,1,256], index: 10, kind: input, shape index: {}]   ;;  %s3347_s11 = inlined_call_operand.vmem [shape: bf16[2,256,64], index: 11, kind: input, shape index: {}]   ;;  %s3348_s12 = inlined_call_operand.vmem [shape: f32[2,1,64], index: 12, kind: input, shape index: {}]   ;;  %s3349_s13 = inlined_call_operand.vmem [shape: f32[2,2,64], index: 13, kind: output, shape index: {}]  }
   0x1   :  { %3354 = sst [smem:[#allocation9_spill]] %s3336_s0  ;;  %s2940_s27 = smov 0  }
   0x2   :  { %3355 = sst [smem:[#allocation10_spill]] %s3338_s2  ;;  %s2942_s28 = smov 0  }
   0x3   :  { %3356 = sst [smem:[#allocation11_spill]] %s3339_s3  ;;  %s2944_s29 = smov 0  }
   0x4   :  { %3357 = sst [smem:[#allocation12_spill]] %s3340_s4 }
   0x5   :  { %3358 = sst [smem:[#allocation13_spill]] %s3341_s5 }
   0x6   :  { %3359 = sst [smem:[#allocation14_spill]] %s3347_s11 }
   0x7   :  { %3360 = sst [smem:[#allocation15_spill]] %s3349_s13 }
   0x8 LB: > { %3361 = sst [smem:[#allocation3_spill]] %s2837_s25  ;;  %s32_s30 = sadd.s32 1, %s2845_s27  ;;  %s2853_s29 = sphi %s2944_s29, %s23_s29   ;;  %s2849_s28 = sphi %s2942_s28, %s3386_s28   ;;  %s2845_s27 = sphi %s2940_s27, %s3385_s27   ;;  %s2841_s26 = sphi %s2938_s26, %s3384_s26   ;;  %s2837_s25 = sphi %s2936_s25, %s3383_s25  }
   0x9   : > { %3362 = sst [smem:[#allocation4_spill]] %s2845_s27  ;;  %s35_s14 = sadd.s32 1, %s2849_s28 }
   0xa   : > { %3363 = sst [smem:[#allocation5_spill]] %s2849_s28  ;;  %p33_p0 = scmp.ge.s32.totalorder %s32_s30, 2 }
   0xb   : > { %3364 = sst [smem:[#allocation6_spill]] %s2853_s29  ;;  %p2411_p1 = scmp.ge.s32.totalorder %s2853_s29, 1 }
   0xc   : > { %p505_p2 = scmp.lt.s32.totalorder %s2853_s29, 5  ;;  %s3388_s30 = smov (%p33_p0, %s32_s30), 0 }
   0xd   : > { %3365 = sst [smem:[#allocation7_spill]] %s3388_s30  ;;  %s3390_s14 = smov (!%p33_p0, %s35_s14), %s2849_s28 }
   0xe   : > { %p506_p3 = pnand %p2411_p1, %p505_p2  ;;  %p37_p4 = scmp.ge.s32.totalorder %s3390_s14, 2 }
   0xf   : > { %p594_p5 = scmp.lt.s32.totalorder (!%p506_p3), %s2841_s26, 1  ;;  %p599_p6 = scmp.lt.s32.totalorder (!%p506_p3), %s2837_s25, 1 }
  0x10   : > { %s3392_s14 = smov (%p37_p4, %s3390_s14), 0  ;;  %509 = sbr.rel (%p506_p3) target bundleno = 2656 (0xa60), region = 72 }
  0x11   : > { %3366 = sst [smem:[#allocation8_spill]] %s3392_s14  ;;  %s3367_s0 = sld [smem:[#allocation9_spill]] (!%p506_p3) }
  0x12   : > { %s3369_s3 = sld [smem:[#allocation11_spill]] (!%p506_p3)  ;;  %s3370_s4 = sld [smem:[#allocation12_spill]] (!%p506_p3) }
  0x13   : > { %s3371_s5 = sld [smem:[#allocation13_spill]] (!%p506_p3)  ;;  %s3374_s13 = sld [smem:[#allocation3_spill]] (!%p506_p3) }
  0x17   : > { %s3394_s26 = smov (!%p594_p5, %s2841_s26), 1 }
  0x18   : > { %s2970_s15 = scalar_select %p599_p6, %s2837_s25, 1 }
  0x19   : > { %s2490_s16 = sshll.u32 %s3394_s26, 3  ;;  %s2424_s17 = sshll.u32 %s3394_s26, 1 }
  0x1a   : > { %s598_s20 = scalar_lea.vmem %s3367_s0, %s2490_s16  ;;  %s2491_s28 = sshll.u32 %s2970_s15, 6 }
  0x1b   : > { %s2987_s25 = scalar_lea.vmem %s3369_s3, %s2491_s28  ;;  %s2416_s26 = sshll.u32 %s2970_s15, 1 }
  0x1c   : > { %s2993_s18 = scalar_lea.vmem %s3370_s4, %s2416_s26  ;;  %s2492_s16 = sshll.u32 %s2970_s15, 5 }
  0x1d   : > { %s2999_s22 = scalar_lea.vmem %s3371_s5, %s2492_s16  ;;  %s3016_s2 = scalar_lea.vmem %s3345_s9, %s2491_s28 }
  0x1e   : > { %s3021_s21 = scalar_lea.vmem %s3346_s10, %s2416_s26  ;;  %s2494_s14 = sshll.u32 %s2970_s15, 7 }
  0x1f   : > { %s644_s23 = scalar_lea.vmem %s3348_s12, %s2970_s15  ;;  %s3372_s5 = sld [smem:[#allocation14_spill]] }
  0x20   : > { %s3373_s4 = sld [smem:[#allocation15_spill]]  ;;  %p2425_p7 = scmp.ne.s32.totalorder %s3374_s13, 0 }
  0x21   : > { %v654_v0 = vld [vmem:[%s598_s20] sm:$0xf] (!%p2425_p7)  ;;  %vm658_vm0 = vcmask (!%p2425_p7), 523264   ;;  %v655_v1 = vld [vmem:[%s598_s20 + $0x4] sm:$0x1] (!%p2425_p7)  ;;  %vm660_vm1 = vcmask (!%p2425_p7), 517120  }
  0x22   : > { %653 = sbr.rel (%p2425_p7) target bundleno = 41 (0x29), region = 76  ;;  %v656_v2 = vunpack.c.l.bf16 (!%p2425_p7), %v654_v0  ;;  %v657_v3 = vunpack.c.l.bf16 (!%p2425_p7), %v655_v1 }
  0x24   : > { %659 = vst.msk [vmem:[#allocation2] sm:$0xff] (!%p2425_p7), %vm658_vm0, %v656_v2 }
  0x25   : > { %s3031_s0 = scalar_lea.vmem %s3372_s5, %s2494_s14  ;;  %661 = vst.msk [vmem:[#allocation2 + $0x8] sm:$0x3] (!%p2425_p7), %vm660_vm1, %v657_v3 }
  0x26   : > { %s3036_s28 = scalar_lea.vmem %s3373_s4, %s2424_s17 }
  0x29 PF: > { %vm666_vm2 = vcmask 523264   ;;  %vm670_vm3 = vcmask 517120   ;;  %v2723_v18 = vld [vmem:[%s2987_s25 + $0x4] ss:$8 sps:$4 sm:$0xff]   ;;  %v2725_v19 = vld [vmem:[%s2987_s25] ss:$8 sps:$4 sm:$0xff]   ;;  %v722_v44 = vlaneseq  ;;  %s3378_s4 = scalar_lea.vmem %s3342_s6, %s2970_s15  ;;  %s3380_s17 = scalar_lea.vmem %s3344_s8, %s2970_s15 }
  0x2a   : > { %775 = vmatprep.subr.bf16.mxu1 %v2723_v18  ;;  %v2726_v20 = vld [vmem:[%s2987_s25 + $0x14] ss:$8 sps:$4 sm:$0xff]   ;;  %v2728_v21 = vld [vmem:[%s2987_s25 + $0x10] ss:$8 sps:$4 sm:$0xff]   ;;  %v2729_v22 = vld [vmem:[%s2987_s25 + $0x24] ss:$8 sps:$4 sm:$0xff]  }
  0x2b   : > { %v3039_v4 = vld [vmem:[#allocation2] sm:$0xff]  ;;  %776 = vmatpush1.bf16.msra.mxu1 %v2725_v19  ;;  %v2732_v24 = vld [vmem:[%s2987_s25 + $0x34] ss:$8 sps:$4 sm:$0xff]   ;;  %v2734_v25 = vld [vmem:[%s2987_s25 + $0x30] ss:$8 sps:$4 sm:$0xff]   ;;  %v2855_v26 = vmov 0  }
  0x2c   : > { %v3041_v5 = vld [vmem:[#allocation2 + $0x8] sm:$0x3]  ;;  %v667_v6 = vsel %vm666_vm2, %v3039_v4, 0.0  ;;  %777 = vmatprep.subr.bf16.mxu1 %v2726_v20  ;;  %807 = vmatprep.mubr.bf16.mxu1 %v2855_v26  ;;  %s3376_s26 = sld [smem:[#allocation10_spill]]  ;;  %v3071_v45 = vshrl.u32 %v722_v44, 7  ;;  %v2856_v46 = vmov 0.0  }
  0x2d   : > { %668 = vadd.xlane.f32.xlu0 %v667_v6  ;;  %v671_v7 = vsel %vm670_vm3, %v3041_v5, 0.0  ;;  %v2731_v23 = vld [vmem:[%s2987_s25 + $0x20] ss:$8 sps:$4 sm:$0xff]   ;;  %s3375_s25 = scalar_lea.vmem %s3337_s1, %s2970_s15  ;;  %2566 = vmatprep.subr.bf16.mxu0 %v2856_v46  ;;  %vm2857_vm4 = vmmov 0   ;;  %s2859_s11 = smov 64   ;;  %vm823_vm5 = vcmask 130048  }
  0x2e   : > { %v2426_v35 = vld [vmem:[%s3375_s25] ss:$0 sm:$0xff]  ;;  %v724_v47 = vsub.s32 0, %v3071_v45  ;;  %v728_v49 = vsub.s32 1, %v3071_v45  ;;  %2568 = vmatprep.mubr.msk.bf16.mxu0 %vm2857_vm4, %v2856_v46  ;;  %s2860_s19 = smov 112   ;;  %s2861_s16 = smov 96  }
  0x2f   : > { %778 = vmatpush1.bf16.msra.mxu1 %v2728_v21  ;;  %v720_v48 = vld [vmem:[%s2993_s18] sm:$0x3]  ;;  %s2858_s18 = smov 48   ;;  %s2862_s14 = smov 32   ;;  %vm887_vm6 = vcmask 1041408   ;;  %vm888_vm7 = vcmask 1042432  }
  0x30   : > { %779 = vmatprep.subr.bf16.mxu1 %v2729_v22  ;;  %v725_v50 = vrot.slane %v720_v48, %v724_v47  ;;  %v729_v52 = vrot.slane %v720_v48, %v728_v49  ;;  %s2863_s24 = smov 80   ;;  %s2864_s27 = smov 16   ;;  %vm870_vm8 = vcmask 36864   ;;  %vm883_vm9 = vcmask 39936  }
  0x31   : > { %672 = vadd.xlane.f32.xlu0 %v671_v7  ;;  %vm1278_vm10 = vcmask 261120   ;;  %vm1280_vm11 = vcmask 392192   ;;  %vm1750_vm12 = vcmask 1044480   ;;  %s3381_s20 = sld [smem:[#allocation3_spill]] }
  0x32   : > { %s3377_s29 = scalar_lea.vmem %s3376_s26, %s2970_s15 }
  0x33   : > { %780 = vmatpush1.bf16.msra.mxu1 %v2731_v23  ;;  %v2427_v39 = vld [vmem:[%s3377_s29] ss:$0 sm:$0xff] }
  0x34   : > { %781 = vmatprep.subr.bf16.mxu1 %v2732_v24 }
  0x37   : > { %782 = vmatpush1.bf16.msra.mxu1 %v2734_v25  ;;  %p2487_p8 = scmp.ne.s32.totalorder %s3381_s20, 1 }
  0x38   : > { %2554 = vmatprep.subr.bf16.mxu1 %v2856_v46  ;;  %vm2214_vm13 = vcmask (!%p2487_p8), 1040384  }
  0xba   : > { %v669_v8 = vpop.xlane.xlu0 %668 }
  0xbb   : > { %v675_v9 = vmul.f32 0.015625, %v669_v8 }
  0xbd   : > { %v677_v10 = vsub.f32 %v3039_v4, %v675_v9  ;;  %v2865_v9 = vmov 65535  }
  0xbe   : > { %v673_v11 = vpop.xlane.xlu0 %672 }
  0xbf   : > { %v676_v12 = vmul.f32 0.015625, %v673_v11  ;;  %v679_v13 = vmul.f32 %v677_v10, %v677_v10 }
  0xc1   : > { %v678_v14 = vsub.f32 %v3041_v5, %v676_v12  ;;  %v681_v15 = vsel %vm666_vm2, %v679_v13, 0.0 }
  0xc2   : > { %682 = vadd.xlane.f32.xlu1 %v681_v15 }
  0xc3   : > { %v680_v16 = vmul.f32 %v678_v14, %v678_v14 }
  0xc5   : > { %v684_v17 = vsel %vm670_vm3, %v680_v16, 0.0 }
  0xc6   : > { %685 = vadd.xlane.f32.xlu1 %v684_v17 }
 0x14f   : > { %v683_v27 = vpop.xlane.xlu1 %682 }
 0x150   : > { %v687_v28 = vmul.f32 0.015625, %v683_v27 }
 0x152   : > { %v689_v29 = vadd.f32 1e-06, %v687_v28 }
 0x153   : > { %v686_v30 = vpop.xlane.xlu1 %685 }
 0x154   : > { %2767 = vrsqrt.f32 %v689_v29  ;;  %v688_v31 = vmul.f32 0.015625, %v686_v30 }
 0x156   : > { %v690_v32 = vadd.f32 1e-06, %v688_v31 }
 0x158   : > { %2769 = vrsqrt.f32 %v690_v32 }
 0x15e   : > { %v2768_v33 = vpop.eup %2767 }
 0x15f   : > { %v693_v34 = vmul.f32 %v2768_v33, %v677_v10  ;;  %v889_v10 = vsel %vm887_vm6, 4294967295, %v2865_v9 }
 0x160   : > { %v3104_v12 = vsel %vm888_vm7, %v889_v10, 0 }
 0x161   : > { %v701_v38 = vmul.f32 %v2426_v35, %v693_v34 }
 0x162   : > { %v2770_v36 = vpop.eup %2769 }
 0x163   : > { %v694_v37 = vmul.f32 %v2770_v36, %v678_v14  ;;  %v709_v41 = vadd.f32 %v2427_v39, %v701_v38 }
 0x165   : > { %v702_v40 = vmul.f32 %v2426_v35, %v694_v37 }
 0x167   : > { %v710_v42 = vadd.f32 %v2427_v39, %v702_v40 }
 0x169   : > { %v711_v43 = vpack.c.bf16 %v710_v42, %v709_v41 }
 0x16b   : > { %2436 = vmatmul.mubr.msk.bf16.vlgmr.msra.gmra.mrb[0].mxu1 %vm666_vm2, %v711_v43 }
 0x16c   : > { %2556 = vmatprep.mubr.msk.bf16.mxu1 %vm2857_vm4, %v2856_v46 }
 0x23e   : > { %v809_v51 = vpop.f32.mrb[0].mxu1 }
 0x23f   : > { %v811_v53 = vpop.f32.mrb[1].mxu1  ;;  %v810_v55 = vadd.f32 %v809_v51, %v725_v50 }
 0x240   : > { %v813_v54 = vpop.f32.mrb[2].mxu1  ;;  %v812_v58 = vadd.f32 %v811_v53, %v729_v52 }
 0x241   : > { %v814_v56 = vadd.f32 %v813_v54, %v725_v50  ;;  %v815_v57 = vpop.f32.mrb[3].mxu1 }
 0x242   : > { %v816_v59 = vadd.f32 %v815_v57, %v729_v52 }
 0x243   : > { %v818_v60 = vpack.c.bf16 %v814_v56, %v810_v55 }
 0x244   : > { %v3086_v61 = vpack.c.bf16 %v816_v59, %v812_v58 }
 0x245   : > { %936 = vrot.lane.b32.xlu1 %v818_v60, %s2858_s18  ;;  %821 = vrot.lane.b32.xlu0 %v818_v60, %s2859_s11  ;;  %v1282_v62 = vshrl.u32 %v818_v60, 16  ;;  %v1285_v63 = vshll.u32 %v818_v60, 16 }
 0x246   : > { %v892_v14 = vand.u32 %v3104_v12, %v3086_v61 }
 0x247   : > { %v1284_v0 = vrot.slane %v1282_v62, 2  ;;  %v1287_v1 = vrot.slane %v1285_v63, 3 }
 0x249   : > { %934 = vrot.lane.b32.xlu1 %v818_v60, %s2860_s19  ;;  %1045 = vrot.lane.b32.xlu0 %v818_v60, %s2861_s16  ;;  %v1288_v2 = vor.u32 %v1287_v1, %v1284_v0 }
 0x24d   : > { %1047 = vrot.lane.b32.xlu1 %v818_v60, %s2862_s14  ;;  %1155 = vrot.lane.b32.xlu0 %v818_v60, %s2863_s24 }
 0x251   : > { %1157 = vrot.lane.b32.xlu1 %v818_v60, %s2864_s27  ;;  %1404 = vrot.lane.b32.xlu0 %v1288_v2, %s2858_s18 }
 0x255   : > { %1514 = vrot.lane.b32.xlu0 %v1288_v2, %s2862_s14  ;;  %1289 = vrot.lane.b32.xlu1 %v1288_v2, %s2859_s11 }
 0x259   : > { %1624 = vrot.lane.b32.xlu0 %v1288_v2, %s2864_s27  ;;  %1402 = vrot.lane.b32.xlu1 %v1288_v2, %s2860_s19 }
 0x25d   : > { %1512 = vrot.lane.b32.xlu1 %v1288_v2, %s2861_s16 }
 0x261   : > { %1622 = vrot.lane.b32.xlu1 %v1288_v2, %s2863_s24 }
 0x2b7   : > { %v937_v3 = vpop.permute.xlu1 %936  ;;  %v822_v6 = vpop.permute.xlu0 %821 }
 0x2b8   : > { %v828_v7 = vsel %vm823_vm5, %v822_v6, 0  ;;  %v942_v8 = vsel %vm823_vm5, %v937_v3, 0 }
 0x2b9   : > { %2555 = vmatpush3.bf16.xpose.msra.mxu1 %v828_v7  ;;  %2567 = vmatpush3.bf16.xpose.msra.mxu0 %v942_v8 }
 0x2ba   : > { %2560 = vmatprep.subr.bf16.mxu1 %v2856_v46  ;;  %2578 = vmatprep.subr.bf16.mxu0 %v2856_v46 }
 0x2bb   : > { %v935_v11 = vpop.permute.xlu1 %934  ;;  %v1046_v17 = vpop.permute.xlu0 %1045 }
 0x2bf   : > { %v1048_v13 = vpop.permute.xlu1 %1047  ;;  %v1156_v20 = vpop.permute.xlu0 %1155 }
 0x2c0   : > { %v1053_v15 = vsel %vm823_vm5, %v1048_v13, 0  ;;  %2557 = vmatmul.mubr.msk.bf16.vlgmr.msra.gmra.mrb[4].mxu1 %vm823_vm5, %v818_v60  ;;  %2569 = vmatmul.mubr.msk.bf16.vlgmr.msra.gmra.mrb[0].mxu0 %vm823_vm5, %v935_v11 }
 0x2c1   : > { %2561 = vmatpush3.bf16.msra.mxu1 %v892_v14  ;;  %2579 = vmatpush3.bf16.xpose.msra.mxu0 %v1053_v15 }
 0x2c2   : > { %2580 = vmatprep.mubr.msk.bf16.mxu0 %vm2857_vm4, %v2856_v46  ;;  %2590 = vmatprep.subr.bf16.mxu0 %v2856_v46 }
 0x2c3   : > { %2562 = vmatprep.mubr.msk.bf16.mxu1 %vm2857_vm4, %v2856_v46  ;;  %2572 = vmatprep.subr.bf16.mxu1 %v2856_v46  ;;  %v1158_v16 = vpop.permute.xlu1 %1157  ;;  %v1405_v22 = vpop.permute.xlu0 %1404 }
 0x2c4   : > { %v1163_v18 = vsel %vm823_vm5, %v1158_v16, 0  ;;  %v1410_v23 = vsel %vm823_vm5, %v1405_v22, 0 }
 0x2c7   : > { %v1290_v19 = vpop.permute.xlu1 %1289  ;;  %v1515_v24 = vpop.permute.xlu0 %1514 }
 0x2c8   : > { %2581 = vmatmul.mubr.msk.bf16.vlgmr.msra.gmra.mrb[4].mxu0 %vm823_vm5, %v1046_v17  ;;  %v1295_v21 = vsel %vm823_vm5, %v1290_v19, 0  ;;  %v1520_v27 = vsel %vm823_vm5, %v1515_v24, 0 }
 0x2c9   : > { %2591 = vmatpush3.bf16.xpose.msra.mxu0 %v1163_v18  ;;  %2592 = vmatprep.mubr.msk.bf16.mxu0 %vm2857_vm4, %v2856_v46 }
 0x2ca   : > { %2602 = vmatprep.subr.bf16.mxu0 %v2856_v46 }
 0x2cb   : > { %v1403_v25 = vpop.permute.xlu1 %1402  ;;  %v1625_v28 = vpop.permute.xlu0 %1624 }
 0x2cc   : > { %v1630_v30 = vsel %vm823_vm5, %v1625_v28, 0 }
 0x2cf   : > { %v1513_v29 = vpop.permute.xlu1 %1512 }
 0x2d0   : > { %2593 = vmatmul.mubr.msk.bf16.vlgmr.msra.gmra.mrb[8].mxu0 %vm823_vm5, %v1156_v20 }
 0x2d1   : > { %2603 = vmatpush3.bf16.xpose.msra.mxu0 %v1295_v21  ;;  %2604 = vmatprep.mubr.msk.bf16.mxu0 %vm2857_vm4, %v2856_v46 }
 0x2d2   : > { %2614 = vmatprep.subr.bf16.mxu0 %v2856_v46 }
 0x2d3   : > { %v1623_v31 = vpop.permute.xlu1 %1622 }
 0x2d8   : > { %2605 = vmatmul.mubr.msk.bf16.vlgmr.msra.gmra.mrb[12].mxu0 %vm823_vm5, %v1288_v2 }
 0x2d9   : > { %2615 = vmatpush3.bf16.xpose.msra.mxu0 %v1410_v23  ;;  %2616 = vmatprep.mubr.msk.bf16.mxu0 %vm2857_vm4, %v2856_v46 }
 0x2da   : > { %2626 = vmatprep.subr.bf16.mxu0 %v2856_v46 }
 0x2e0   : > { %2617 = vmatmul.mubr.msk.bf16.vlgmr.msra.gmra.mrb[16].mxu0 %vm823_vm5, %v1403_v25 }
 0x2e1   : > { %2627 = vmatpush3.bf16.xpose.msra.mxu0 %v1520_v27  ;;  %2628 = vmatprep.mubr.msk.bf16.mxu0 %vm2857_vm4, %v2856_v46 }
 0x2e2   : > { %2638 = vmatprep.subr.bf16.mxu0 %v2856_v46 }
 0x2e8   : > { %2629 = vmatmul.mubr.msk.bf16.vlgmr.msra.gmra.mrb[20].mxu0 %vm823_vm5, %v1513_v29 }
 0x2e9   : > { %2639 = vmatpush3.bf16.xpose.msra.mxu0 %v1630_v30  ;;  %2640 = vmatprep.mubr.msk.bf16.mxu0 %vm2857_vm4, %v2856_v46 }
 0x2ea   : > { %2650 = vmatprep.subr.bf16.mxu0 %v2856_v46 }
 0x2f0   : > { %2641 = vmatmul.mubr.msk.bf16.vlgmr.msra.gmra.mrb[24].mxu0 %vm823_vm5, %v1623_v31 }
 0x2f1   : > { %2658 = vmatprep.mubr.msk.bf16.mxu0 %vm2857_vm4, %v2856_v46 }
 0x393   : > { %v864_v32 = vpop.f32.mrb[4].mxu1  ;;  %v978_v33 = vpop.f32.mrb[0].mxu0 }
 0x394   : > { %v2558_v34 = vpop.f32.mrb[5].mxu1  ;;  %v2570_v35 = vpop.f32.mrb[1].mxu0  ;;  %v871_v36 = vsel %vm870_vm8, %v864_v32, -inf  ;;  %v984_v37 = vsel %vm870_vm8, %v978_v33, -inf }
 0x395   : > { %v867_v38 = vpop.f32.mrb[6].mxu1  ;;  %v981_v39 = vpop.f32.mrb[2].mxu0  ;;  %872 = vmax.xlane.f32.xlu0 %v871_v36  ;;  %985 = vmax.xlane.f32.xlu1 %v984_v37 }
 0x396   : > { %v2559_v40 = vpop.f32.mrb[7].mxu1  ;;  %v2571_v41 = vpop.f32.mrb[3].mxu0 }
 0x39b   : > { %v1089_v42 = vpop.f32.mrb[4].mxu0 }
 0x39c   : > { %v2582_v43 = vpop.f32.mrb[5].mxu0  ;;  %v1095_v44 = vsel %vm870_vm8, %v1089_v42, -inf }
 0x39d   : > { %v1092_v48 = vpop.f32.mrb[6].mxu0  ;;  %1096 = vmax.xlane.f32.xlu0 %v1095_v44 }
 0x39e   : > { %v2583_v50 = vpop.f32.mrb[7].mxu0 }
 0x3a3   : > { %v1199_v51 = vpop.f32.mrb[8].mxu0 }
 0x3a4   : > { %v2594_v52 = vpop.f32.mrb[9].mxu0  ;;  %v1205_v53 = vsel %vm870_vm8, %v1199_v51, -inf }
 0x3a5   : > { %v1202_v54 = vpop.f32.mrb[10].mxu0  ;;  %1206 = vmax.xlane.f32.xlu0 %v1205_v53 }
 0x3a6   : > { %v2595_v55 = vpop.f32.mrb[11].mxu0 }
 0x3ab   : > { %v1331_v56 = vpop.f32.mrb[12].mxu0 }
 0x3ac   : > { %v2606_v57 = vpop.f32.mrb[13].mxu0  ;;  %v1337_v58 = vsel %vm870_vm8, %v1331_v56, -inf }
 0x3ad   : > { %1338 = vmax.xlane.f32.xlu0 %v1337_v58  ;;  %v1334_v59 = vpop.f32.mrb[14].mxu0 }
 0x3ae   : > { %v2607_v60 = vpop.f32.mrb[15].mxu0 }
 0x3b3   : > { %v1446_v62 = vpop.f32.mrb[16].mxu0 }
 0x3b4   : > { %v2618_v63 = vpop.f32.mrb[17].mxu0  ;;  %v1452_v0 = vsel %vm870_vm8, %v1446_v62, -inf }
 0x3b5   : > { %1453 = vmax.xlane.f32.xlu1 %v1452_v0  ;;  %v1449_v1 = vpop.f32.mrb[18].mxu0  ;;  %v1352_v63 = vshll.u32 %v3086_v61, 16 }
 0x3b6   : > { %v2619_v2 = vpop.f32.mrb[19].mxu0 }
 0x3b7   : > { %v1354_v1 = vrot.slane %v1352_v63, 3 }
 0x3bb   : > { %v1556_v3 = vpop.f32.mrb[20].mxu0 }
 0x3bc   : > { %v2630_v6 = vpop.f32.mrb[21].mxu0  ;;  %v1562_v7 = vsel %vm870_vm8, %v1556_v3, -inf }
 0x3bd   : > { %1563 = vmax.xlane.f32.xlu0 %v1562_v7  ;;  %v1559_v8 = vpop.f32.mrb[22].mxu0 }
 0x3be   : > { %v2631_v9 = vpop.f32.mrb[23].mxu0 }
 0x3c3   : > { %v1666_v10 = vpop.f32.mrb[24].mxu0 }
 0x3c4   : > { %v2642_v11 = vpop.f32.mrb[25].mxu0  ;;  %v1672_v13 = vsel %vm870_vm8, %v1666_v10, -inf }
 0x3c5   : > { %1673 = vmax.xlane.f32.xlu1 %v1672_v13  ;;  %v1669_v14 = vpop.f32.mrb[26].mxu0 }
 0x3c6   : > { %v2643_v15 = vpop.f32.mrb[27].mxu0 }
 0x3d3   : > { %997 = vrot.lane.b32.xlu0 %v3086_v61, %s2860_s19 }
 0x422   : > { %v873_v16 = vpop.xlane.xlu0 %872  ;;  %v986_v17 = vpop.xlane.xlu1 %985 }
 0x423   : > { %v874_v18 = vsub.f32 %v864_v32, %v873_v16  ;;  %v987_v19 = vsub.f32 %v978_v33, %v986_v17 }
 0x425   : > { %v875_v20 = vmul.f32 1.442695, %v874_v18  ;;  %v988_v21 = vmul.f32 1.442695, %v987_v19 }
 0x427   : > { %2771 = vpow2.f32 %v875_v20 }
 0x428   : > { %2773 = vpow2.f32 %v988_v21 }
 0x42a   : > { %v1097_v22 = vpop.xlane.xlu0 %1096 }
 0x42b   : > { %v1098_v23 = vsub.f32 %v1089_v42, %v1097_v22 }
 0x42d   : > { %v1099_v24 = vmul.f32 1.442695, %v1098_v23 }
 0x42f   : > { %2775 = vpow2.f32 %v1099_v24 }
 0x431   : > { %v2772_v25 = vpop.eup %2771 }
 0x432   : > { %v3155_v27 = vpop.eup %2773  ;;  %v877_v28 = vsel %vm870_vm8, %v2772_v25, 0.0  ;;  %v1207_v32 = vpop.xlane.xlu0 %1206 }
 0x433   : > { %878 = vadd.xlane.f32.xlu0 %v877_v28  ;;  %v990_v29 = vsel %vm870_vm8, %v3155_v27, 0.0  ;;  %v1208_v33 = vsub.f32 %v1199_v51, %v1207_v32 }
 0x434   : > { %991 = vadd.xlane.f32.xlu1 %v990_v29 }
 0x435   : > { %v1209_v35 = vmul.f32 1.442695, %v1208_v33 }
 0x437   : > { %2777 = vpow2.f32 %v1209_v35 }
 0x439   : > { %v3160_v30 = vpop.eup %2775 }
 0x43a   : > { %v1101_v31 = vsel %vm870_vm8, %v3160_v30, 0.0  ;;  %v1339_v34 = vpop.xlane.xlu0 %1338 }
 0x43b   : > { %1102 = vadd.xlane.f32.xlu0 %v1101_v31  ;;  %v1340_v36 = vsub.f32 %v1331_v56, %v1339_v34 }
 0x43d   : > { %v1341_v40 = vmul.f32 1.442695, %v1340_v36 }
 0x43f   : > { %2779 = vpow2.f32 %v1341_v40 }
 0x441   : > { %v3168_v52 = vpop.eup %2777 }
 0x442   : > { %v1454_v37 = vpop.xlane.xlu1 %1453  ;;  %v1211_v51 = vsel %vm870_vm8, %v3168_v52, 0.0 }
 0x443   : > { %v1455_v41 = vsub.f32 %v1446_v62, %v1454_v37  ;;  %v1349_v62 = vshrl.u32 %v3086_v61, 16 }
 0x445   : > { %1107 = vrot.lane.b32.xlu1 %v3086_v61, %s2861_s16  ;;  %v1456_v48 = vmul.f32 1.442695, %v1455_v41  ;;  %v1351_v0 = vrot.slane %v1349_v62, 2 }
 0x447   : > { %v1355_v2 = vor.u32 %v1354_v1, %v1351_v0 }
 0x449   : > { %v3172_v53 = vpop.eup %2779  ;;  %v1360_v31 = vand.u32 %v1355_v2, %v3104_v12 }
 0x44a   : > { %v1564_v38 = vpop.xlane.xlu0 %1563  ;;  %v1343_v55 = vsel %vm870_vm8, %v3172_v53, 0.0 }
 0x44b   : > { %v1565_v39 = vsub.f32 %v1556_v3, %v1564_v38 }
 0x44d   : > { %v1566_v43 = vmul.f32 1.442695, %v1565_v39 }
 0x44e   : > { %v998_v3 = vpop.permute.xlu0 %997 }
 0x44f   : > { %2781 = vpow2.f32 %v1566_v43  ;;  %v1003_v13 = vand.u32 %v998_v3, %v3104_v12 }
 0x450   : > { %2783 = vpow2.f32 %v1456_v48 }
 0x451   : > { %1217 = vrot.lane.b32.xlu0 %v3086_v61, %s2863_s24 }
 0x452   : > { %v1674_v42 = vpop.xlane.xlu1 %1673 }
 0x453   : > { %v1675_v44 = vsub.f32 %v1666_v10, %v1674_v42 }
 0x455   : > { %v1676_v50 = vmul.f32 1.442695, %v1675_v44 }
 0x457   : > { %2785 = vpow2.f32 %v1676_v50 }
 0x459   : > { %v3174_v54 = vpop.eup %2781 }
 0x45a   : > { %v3178_v56 = vpop.eup %2783  ;;  %v1568_v57 = vsel %vm870_vm8, %v3174_v54, 0.0 }
 0x45b   : > { %v1458_v59 = vsel %vm870_vm8, %v3178_v56, 0.0 }
 0x461   : > { %v3182_v58 = vpop.eup %2785 }
 0x462   : > { %v1678_v60 = vsel %vm870_vm8, %v3182_v58, 0.0 }
 0x469   : > { %1212 = vadd.xlane.f32.xlu1 %v1211_v51 }
 0x46d   : > { %1344 = vadd.xlane.f32.xlu1 %v1343_v55 }
 0x470   : > { %1569 = vadd.xlane.f32.xlu0 %v1568_v57 }
 0x471   : > { %1459 = vadd.xlane.f32.xlu1 %v1458_v59 }
 0x474   : > { %1679 = vadd.xlane.f32.xlu0 %v1678_v60 }
 0x482   : > { %1464 = vrot.lane.b32.xlu1 %v1355_v2, %s2860_s19 }
 0x486   : > { %1684 = vrot.lane.b32.xlu1 %v1355_v2, %s2863_s24 }
 0x48a   : > { %1574 = vrot.lane.b32.xlu0 %v1355_v2, %s2861_s16 }
 0x4c0   : > { %v879_v6 = vpop.xlane.xlu0 %878 }
 0x4c1   : > { %2787 = vrcp.f32 %v879_v6  ;;  %v992_v7 = vpop.xlane.xlu1 %991 }
 0x4c2   : > { %2789 = vrcp.f32 %v992_v7 }
 0x4c5   : > { %v1108_v15 = vpop.permute.xlu1 %1107 }
 0x4c6   : > { %v1113_v18 = vand.u32 %v1108_v15, %v3104_v12 }
 0x4c8   : > { %v1103_v8 = vpop.xlane.xlu0 %1102 }
 0x4c9   : > { %2791 = vrcp.f32 %v1103_v8 }
 0x4cb   : > { %v2788_v9 = vpop.eup %2787 }
 0x4cc   : > { %v881_v10 = vmul.f32 %v2788_v9, %v2772_v25  ;;  %v2790_v11 = vpop.eup %2789  ;;  %v1218_v20 = vpop.permute.xlu0 %1217 }
 0x4cd   : > { %v994_v14 = vmul.f32 %v2790_v11, %v3155_v27  ;;  %v1223_v22 = vand.u32 %v1218_v20, %v3104_v12  ;;  %v2738_v20 = vld [vmem:[%s2999_s22 + $0x18] sm:$0xff]  }
 0x4ce   : > { %v882_v61 = vpack.c.bf16 %v881_v10, %v881_v10 }
 0x4cf   : > { %v995_v16 = vpack.c.bf16 %v994_v14, %v994_v14 }
 0x4d0   : > { %2563 = vmatmul.mubr.msk.bf16.vlgmr.msra.gmra.mrb[8].mxu1 %vm883_vm9, %v882_v61 }
 0x4d1   : > { %2573 = vmatpush3.bf16.msra.mxu1 %v1003_v13  ;;  %2574 = vmatprep.mubr.msk.bf16.mxu1 %vm2857_vm4, %v2856_v46  ;;  %v2736_v13 = vld [vmem:[%s2999_s22 + $0x8] sm:$0xff]  }
 0x4d2   : > { %2584 = vmatprep.subr.bf16.mxu1 %v2856_v46 }
 0x4d3   : > { %v2792_v17 = vpop.eup %2791 }
 0x4d4   : > { %v1105_v19 = vmul.f32 %v2792_v17, %v3160_v30 }
 0x4d6   : > { %v1106_v21 = vpack.c.bf16 %v1105_v19, %v1105_v19 }
 0x4d8   : > { %2575 = vmatmul.mubr.msk.bf16.vlgmr.msra.gmra.mrb[12].mxu1 %vm883_vm9, %v995_v16 }
 0x4d9   : > { %2585 = vmatpush3.bf16.msra.mxu1 %v1113_v18  ;;  %2586 = vmatprep.mubr.msk.bf16.mxu1 %vm2857_vm4, %v2856_v46  ;;  %v2737_v18 = vld [vmem:[%s2999_s22 + $0x10] sm:$0xff]  }
 0x4da   : > { %2596 = vmatprep.subr.bf16.mxu1 %v2856_v46 }
 0x4e0   : > { %2587 = vmatmul.mubr.msk.bf16.vlgmr.msra.gmra.mrb[16].mxu1 %vm883_vm9, %v1106_v21 }
 0x4e1   : > { %2597 = vmatpush3.bf16.msra.mxu1 %v1223_v22  ;;  %2598 = vmatprep.mubr.msk.bf16.mxu1 %vm2857_vm4, %v2856_v46 }
 0x4e2   : > { %2608 = vmatprep.subr.bf16.mxu1 %v2856_v46 }
 0x4f6   : > { %v1213_v23 = vpop.xlane.xlu1 %1212 }
 0x4f7   : > { %2793 = vrcp.f32 %v1213_v23 }
 0x4fa   : > { %v1345_v24 = vpop.xlane.xlu1 %1344 }
 0x4fb   : > { %2795 = vrcp.f32 %v1345_v24 }
 0x4fd   : > { %v1570_v32 = vpop.xlane.xlu0 %1569 }
 0x4fe   : > { %v1460_v25 = vpop.xlane.xlu1 %1459 }
 0x4ff   : > { %2797 = vrcp.f32 %v1460_v25 }
 0x500   : > { %2799 = vrcp.f32 %v1570_v32 }
 0x501   : > { %v2794_v27 = vpop.eup %2793  ;;  %v1680_v35 = vpop.xlane.xlu0 %1679 }
 0x502   : > { %v1215_v28 = vmul.f32 %v2794_v27, %v3168_v52  ;;  %v1465_v34 = vpop.permute.xlu1 %1464  ;;  %2801 = vrcp.f32 %v1680_v35 }
 0x503   : > { %v1470_v38 = vand.u32 %v1465_v34, %v3104_v12 }
 0x504   : > { %v1216_v29 = vpack.c.bf16 %v1215_v28, %v1215_v28 }
 0x505   : > { %v2796_v30 = vpop.eup %2795  ;;  %v1575_v40 = vpop.permute.xlu0 %1574 }
 0x506   : > { %2599 = vmatmul.mubr.msk.bf16.vlgmr.msra.gmra.mrb[20].mxu1 %vm883_vm9, %v1216_v29  ;;  %v1347_v33 = vmul.f32 %v2796_v30, %v3172_v53  ;;  %v1580_v43 = vand.u32 %v1575_v40, %v3104_v12  ;;  %v1685_v48 = vpop.permute.xlu1 %1684 }
 0x507   : > { %2609 = vmatpush3.bf16.msra.mxu1 %v1360_v31  ;;  %2610 = vmatprep.mubr.msk.bf16.mxu1 %vm2857_vm4, %v2856_v46  ;;  %v1690_v51 = vand.u32 %v1685_v48, %v3104_v12 }
 0x508   : > { %2620 = vmatprep.subr.bf16.mxu1 %v2856_v46  ;;  %v1348_v36 = vpack.c.bf16 %v1347_v33, %v1347_v33 }
 0x509   : > { %v2798_v37 = vpop.eup %2797 }
 0x50a   : > { %v1462_v39 = vmul.f32 %v2798_v37, %v3178_v56  ;;  %v2800_v42 = vpop.eup %2799 }
 0x50b   : > { %v1572_v44 = vmul.f32 %v2800_v42, %v3174_v54 }
 0x50c   : > { %v1463_v41 = vpack.c.bf16 %v1462_v39, %v1462_v39  ;;  %v2802_v52 = vpop.eup %2801 }
 0x50d   : > { %v1573_v50 = vpack.c.bf16 %v1572_v44, %v1572_v44  ;;  %v1682_v53 = vmul.f32 %v2802_v52, %v3182_v58  ;;  %v2453_v52 = vld [vmem:[%s3378_s4] ss:$0 sm:$0xff] }
 0x50e   : > { %2611 = vmatmul.mubr.msk.bf16.vlgmr.msra.gmra.mrb[24].mxu1 %vm883_vm9, %v1348_v36 }
 0x50f   : > { %2621 = vmatpush3.bf16.msra.mxu1 %v1470_v38  ;;  %2622 = vmatprep.mubr.msk.bf16.mxu1 %vm2857_vm4, %v2856_v46  ;;  %v1683_v55 = vpack.c.bf16 %v1682_v53, %v1682_v53 }
 0x510   : > { %2632 = vmatprep.subr.bf16.mxu1 %v2856_v46 }
 0x516   : > { %2623 = vmatmul.mubr.msk.bf16.vlgmr.msra.gmra.mrb[28].mxu1 %vm883_vm9, %v1463_v41 }
 0x517   : > { %2633 = vmatpush3.bf16.msra.mxu1 %v1580_v43  ;;  %2634 = vmatprep.mubr.msk.bf16.mxu1 %vm2857_vm4, %v2856_v46 }
 0x518   : > { %2644 = vmatprep.subr.bf16.mxu1 %v2856_v46 }
 0x51e   : > { %2635 = vmatmul.mubr.msk.bf16.vlgmr.msra.gmra.mrb[32].mxu1 %vm883_vm9, %v1573_v50 }
 0x51f   : > { %2645 = vmatpush3.bf16.msra.mxu1 %v1690_v51  ;;  %2646 = vmatprep.mubr.msk.bf16.mxu1 %vm2857_vm4, %v2856_v46 }
 0x526   : > { %2647 = vmatmul.mubr.msk.bf16.vlgmr.msra.gmra.mrb[36].mxu1 %vm883_vm9, %v1683_v55 }
 0x527   : > { %1978 = vmatprep.mubr.bf16.mxu1 %v2855_v26  ;;  %v2735_v26 = vld [vmem:[%s2999_s22] sm:$0xff]  }
 0x528   : > { %2651 = vmatpush3.bf16.msra.mxu0 %v2735_v26  ;;  %v2739_v26 = vld [vmem:[%s3016_s2] ss:$8 sps:$4 sm:$0xff]  }
 0x529   : > { %2652 = vmatprep.subr.bf16.mxu0 %v2856_v46 }
 0x52c   : > { %2653 = vmatpush3.bf16.msra.mxu0 %v2736_v13  ;;  %v2748_v13 = vld [vmem:[%s3016_s2 + $0x30] ss:$8 sps:$4 sm:$0xff]  }
 0x52d   : > { %2654 = vmatprep.subr.bf16.mxu0 %v2856_v46 }
 0x530   : > { %2655 = vmatpush3.bf16.msra.mxu0 %v2737_v18 }
 0x531   : > { %2656 = vmatprep.subr.bf16.mxu0 %v2856_v46 }
 0x534   : > { %2657 = vmatpush3.bf16.msra.mxu0 %v2738_v20 }
 0x5a3   : > { %v928_v54 = vpop.f32.mrb[8].mxu1 }
 0x5a4   : > { %v2564_v56 = vpop.f32.mrb[9].mxu1 }
 0x5a5   : > { %v931_v57 = vpop.f32.mrb[10].mxu1 }
 0x5a6   : > { %v2565_v59 = vpop.f32.mrb[11].mxu1 }
 0x5ab   : > { %v1039_v60 = vpop.f32.mrb[12].mxu1 }
 0x5ac   : > { %v2576_v12 = vpop.f32.mrb[13].mxu1 }
 0x5ad   : > { %v1042_v62 = vpop.f32.mrb[14].mxu1 }
 0x5ae   : > { %v2577_v63 = vpop.f32.mrb[15].mxu1 }
 0x5b3   : > { %v1149_v0 = vpop.f32.mrb[16].mxu1 }
 0x5b4   : > { %v2588_v1 = vpop.f32.mrb[17].mxu1 }
 0x5b5   : > { %v1152_v2 = vpop.f32.mrb[18].mxu1 }
 0x5b6   : > { %v2589_v3 = vpop.f32.mrb[19].mxu1 }
 0x5d9   : > { %v1259_v58 = vpop.f32.mrb[20].mxu1 }
 0x5da   : > { %v2600_v6 = vpop.f32.mrb[21].mxu1 }
 0x5db   : > { %v1262_v7 = vpop.f32.mrb[22].mxu1 }
 0x5dc   : > { %v2601_v8 = vpop.f32.mrb[23].mxu1 }
 0x5dd   : > { %v2741_v8 = vld [vmem:[%s3016_s2 + $0x4] ss:$8 sps:$4 sm:$0xff]  }
 0x5de   : > { %1946 = vmatprep.subr.bf16.mxu1 %v2741_v8 }
 0x5df   : > { %1947 = vmatpush1.bf16.msra.mxu1 %v2739_v26 }
 0x5e1   : > { %v1396_v9 = vpop.f32.mrb[24].mxu1 }
 0x5e2   : > { %v2612_v10 = vpop.f32.mrb[25].mxu1 }
 0x5e3   : > { %v1399_v61 = vpop.f32.mrb[26].mxu1  ;;  %v2742_v10 = vld [vmem:[%s3016_s2 + $0x10] ss:$8 sps:$4 sm:$0xff]  }
 0x5e4   : > { %v2613_v11 = vpop.f32.mrb[27].mxu1  ;;  %v2747_v61 = vld [vmem:[%s3016_s2 + $0x24] ss:$8 sps:$4 sm:$0xff]  }
 0x5e5   : > { %v2745_v11 = vld [vmem:[%s3016_s2 + $0x20] ss:$8 sps:$4 sm:$0xff]  }
 0x5e9   : > { %v1506_v14 = vpop.f32.mrb[28].mxu1 }
 0x5ea   : > { %v2713_v15 = vpack.i.bf16 %v1039_v60, %v1506_v14  ;;  %v2624_v16 = vpop.f32.mrb[29].mxu1  ;;  %v2750_v14 = vld [vmem:[%s3016_s2 + $0x34] ss:$8 sps:$4 sm:$0xff]  }
 0x5eb   : > { %v1509_v17 = vpop.f32.mrb[30].mxu1 }
 0x5ec   : > { %2714 = vrot.lane.b32.xlu1 %v2713_v15, %s2864_s27  ;;  %v2625_v19 = vpop.f32.mrb[31].mxu1 }
 0x5f1   : > { %v1616_v21 = vpop.f32.mrb[32].mxu1 }
 0x5f2   : > { %v2718_v22 = vpack.i.bf16 %v1149_v0, %v1616_v21  ;;  %v2636_v23 = vpop.f32.mrb[33].mxu1 }
 0x5f3   : > { %v1619_v24 = vpop.f32.mrb[34].mxu1 }
 0x5f4   : > { %2719 = vrot.lane.b32.xlu1 %v2718_v22, %s2862_s14  ;;  %v2637_v25 = vpop.f32.mrb[35].mxu1 }
 0x5f8   : > { %1274 = vrot.lane.b32.xlu1 %v1259_v58, %s2858_s18 }
 0x5f9   : > { %v1726_v27 = vpop.f32.mrb[36].mxu1 }
 0x5fa   : > { %1741 = vrot.lane.b32.xlu0 %v1726_v27, %s2858_s18  ;;  %v2648_v28 = vpop.f32.mrb[37].mxu1 }
 0x5fb   : > { %v1729_v29 = vpop.f32.mrb[38].mxu1  ;;  %v2460_v28 = vld [vmem:[%s3380_s17] ss:$0 sm:$0xff] }
 0x5fc   : > { %v2649_v30 = vpop.f32.mrb[39].mxu1 }
 0x65e   : > { %v2715_v31 = vpop.permute.xlu1 %2714 }
 0x65f   : > { %v2717_v46 = vunpack.i.h.bf16 %v2715_v31  ;;  %v2716_v33 = vunpack.i.l.bf16 %v2715_v31 }
 0x661   : > { %v1277_v36 = vsel %vm823_vm5, %v928_v54, %v2717_v46  ;;  %v1744_v37 = vsel %vm823_vm5, %v1396_v9, %v2716_v33  ;;  %v2744_v9 = vld [vmem:[%s3016_s2 + $0x14] ss:$8 sps:$4 sm:$0xff]   ;;  %s3379_s2 = scalar_lea.vmem %s3343_s7, %s2970_s15  ;;  %v2751_v46 = vld [vmem:[%s3031_s0 + $0x40] sm:$0xff]  }
 0x662   : > { %1948 = vmatprep.subr.bf16.mxu1 %v2744_v9  ;;  %v2459_v23 = vld [vmem:[%s3379_s2] ss:$0 sm:$0xff]  ;;  %2532 = vmatprep.subr.bf16.mxu0 %v2751_v46 }
 0x663   : > { %1949 = vmatpush1.bf16.msra.mxu1 %v2742_v10  ;;  %v2752_v33 = vld [vmem:[%s3031_s0] sm:$0xff]  }
 0x664   : > { %1950 = vmatprep.subr.bf16.mxu1 %v2747_v61 }
 0x666   : > { %v2720_v32 = vpop.permute.xlu1 %2719 }
 0x667   : > { %v2722_v34 = vunpack.i.h.bf16 %v2720_v32  ;;  %v2721_v35 = vunpack.i.l.bf16 %v2720_v32  ;;  %1951 = vmatpush1.bf16.msra.mxu1 %v2745_v11 }
 0x668   : > { %1952 = vmatprep.subr.bf16.mxu1 %v2750_v14 }
 0x669   : > { %v1279_v39 = vsel %vm1278_vm10, %v1277_v36, %v2722_v34  ;;  %v1745_v41 = vsel %vm1278_vm10, %v1744_v37, %v2721_v35  ;;  %v2753_v34 = vld [vmem:[%s3031_s0 + $0x48] sm:$0xff]   ;;  %v2755_v36 = vld [vmem:[%s3031_s0 + $0x50] sm:$0xff]  }
 0x66a   : > { %v1275_v38 = vpop.permute.xlu1 %1274  ;;  %v2754_v35 = vld [vmem:[%s3031_s0 + $0x8] sm:$0xff]   ;;  %v2756_v37 = vld [vmem:[%s3031_s0 + $0x10] sm:$0xff]  }
 0x66b   : > { %v1281_v44 = vsel %vm1280_vm11, %v1279_v39, %v1275_v38  ;;  %1953 = vmatpush1.bf16.msra.mxu1 %v2748_v13  ;;  %v2757_v38 = vld [vmem:[%s3031_s0 + $0x58] sm:$0xff]  }
 0x66c   : > { %v1742_v40 = vpop.permute.xlu0 %1741  ;;  %v2758_v39 = vld [vmem:[%s3031_s0 + $0x18] sm:$0xff]  }
 0x66d   : > { %v1746_v42 = vsel %vm1280_vm11, %v1745_v41, %v1742_v40  ;;  %v2759_v40 = vld [vmem:[%s3031_s0 + $0x60] sm:$0xff]  }
 0x66e   : > { %v1748_v43 = vrot.slane %v1746_v42, 3  ;;  %v2760_v41 = vld [vmem:[%s3031_s0 + $0x20] sm:$0xff]   ;;  %v2761_v42 = vld [vmem:[%s3031_s0 + $0x68] sm:$0xff]  }
 0x670   : > { %v1751_v48 = vsel %vm1750_vm12, %v1281_v44, %v1748_v43  ;;  %v2763_v44 = vld [vmem:[%s3031_s0 + $0x70] sm:$0xff]  }
 0x671   : > { %v1752_v50 = vpack.c.bf16 %v1748_v43, %v1751_v48  ;;  %v2762_v43 = vld [vmem:[%s3031_s0 + $0x28] sm:$0xff]   ;;  %v2764_v48 = vld [vmem:[%s3031_s0 + $0x30] sm:$0xff]  }
 0x673   : > { %2659 = vmatmul.mubr.msk.bf16.vlgmr.msra.gmra.mrb[28].mxu0 %vm666_vm2, %v1752_v50  ;;  %v2765_v50 = vld [vmem:[%s3031_s0 + $0x78] sm:$0xff]  }
 0x674   : > { %2533 = vmatpush3.bf16.msra.mxu0 %v2752_v33 }
 0x675   : > { %2534 = vmatprep.subr.bf16.mxu0 %v2753_v34 }
 0x678   : > { %2535 = vmatpush3.bf16.msra.mxu0 %v2754_v35 }
 0x679   : > { %2536 = vmatprep.subr.bf16.mxu0 %v2755_v36  ;;  %v2470_v36 = vld [vmem:[%s644_s23] ss:$0 sm:$0xff] }
 0x67c   : > { %2537 = vmatpush3.bf16.msra.mxu0 %v2756_v37 }
 0x67d   : > { %2538 = vmatprep.subr.bf16.mxu0 %v2757_v38 }
 0x680   : > { %2539 = vmatpush3.bf16.msra.mxu0 %v2758_v39 }
 0x681   : > { %2540 = vmatprep.subr.bf16.mxu0 %v2759_v40 }
 0x684   : > { %2541 = vmatpush3.bf16.msra.mxu0 %v2760_v41 }
 0x685   : > { %2542 = vmatprep.subr.bf16.mxu0 %v2761_v42 }
 0x688   : > { %2543 = vmatpush3.bf16.msra.mxu0 %v2762_v43 }
 0x689   : > { %2544 = vmatprep.subr.bf16.mxu0 %v2763_v44 }
 0x68c   : > { %2545 = vmatpush3.bf16.msra.mxu0 %v2764_v48 }
 0x68d   : > { %2546 = vmatprep.subr.bf16.mxu0 %v2765_v50 }
 0x746   : > { %v1829_v51 = vpop.f32.mrb[28].mxu0 }
 0x747   : > { %v1830_v53 = vadd.f32 %v2453_v52, %v1829_v51  ;;  %v2660_v55 = vpop.f32.mrb[29].mxu0  ;;  %v1891_v51 = vld [vmem:[%s3021_s21] sm:$0x3] }
 0x748   : > { %v1832_v54 = vpop.f32.mrb[30].mxu0  ;;  %v1900_v55 = vrot.slane %v1891_v51, %v728_v49 }
 0x749   : > { %v3256_v56 = vadd.f32 %v1830_v53, %v3039_v4  ;;  %v1833_v57 = vadd.f32 %v2453_v52, %v1832_v54  ;;  %v2661_v59 = vpop.f32.mrb[31].mxu0  ;;  %v2766_v52 = vld [vmem:[%s3031_s0 + $0x38] sm:$0xff]   ;;  %v1896_v53 = vrot.slane %v1891_v51, %v724_v47 }
 0x74a   : > { %2547 = vmatpush3.bf16.msra.mxu0 %v2766_v52 }
 0x74b   : > { %v3259_v60 = vadd.f32 %v1833_v57, %v3041_v5  ;;  %v1840_v12 = vsel %vm666_vm2, %v3256_v56, 0.0 }
 0x74c   : > { %1841 = vadd.xlane.f32.xlu0 %v1840_v12 }
 0x74d   : > { %v1843_v62 = vsel %vm670_vm3, %v3259_v60, 0.0 }
 0x74e   : > { %1844 = vadd.xlane.f32.xlu1 %v1843_v62 }
 0x7d9   : > { %v1842_v63 = vpop.xlane.xlu0 %1841 }
 0x7da   : > { %v1846_v0 = vmul.f32 0.015625, %v1842_v63 }
 0x7db   : > { %v1845_v4 = vpop.xlane.xlu1 %1844 }
 0x7dc   : > { %v1848_v1 = vsub.f32 %v3256_v56, %v1846_v0  ;;  %v1847_v2 = vmul.f32 0.015625, %v1845_v4 }
 0x7de   : > { %v1849_v5 = vsub.f32 %v3259_v60, %v1847_v2  ;;  %v1850_v3 = vmul.f32 %v1848_v1, %v1848_v1 }
 0x7e0   : > { %v1852_v58 = vsel %vm666_vm2, %v1850_v3, 0.0  ;;  %v1851_v6 = vmul.f32 %v1849_v5, %v1849_v5 }
 0x7e1   : > { %1853 = vadd.xlane.f32.xlu0 %v1852_v58 }
 0x7e2   : > { %v1855_v7 = vsel %vm670_vm3, %v1851_v6, 0.0 }
 0x7e5   : > { %1856 = vadd.xlane.f32.xlu0 %v1855_v7 }
 0x86e   : > { %v1854_v15 = vpop.xlane.xlu0 %1853 }
 0x86f   : > { %v1858_v16 = vmul.f32 0.015625, %v1854_v15 }
 0x871   : > { %v1860_v17 = vadd.f32 1e-06, %v1858_v16 }
 0x872   : > { %v1857_v18 = vpop.xlane.xlu0 %1856 }
 0x873   : > { %2803 = vrsqrt.f32 %v1860_v17  ;;  %v1859_v19 = vmul.f32 0.015625, %v1857_v18 }
 0x875   : > { %v1861_v20 = vadd.f32 1e-06, %v1859_v19 }
 0x877   : > { %2805 = vrsqrt.f32 %v1861_v20 }
 0x87d   : > { %v2804_v21 = vpop.eup %2803 }
 0x87e   : > { %v1864_v22 = vmul.f32 %v2804_v21, %v1848_v1 }
 0x880   : > { %v1872_v25 = vmul.f32 %v2459_v23, %v1864_v22 }
 0x881   : > { %v2806_v24 = vpop.eup %2805 }
 0x882   : > { %v1865_v27 = vmul.f32 %v2806_v24, %v1849_v5  ;;  %v1880_v30 = vadd.f32 %v2460_v28, %v1872_v25 }
 0x884   : > { %v1873_v29 = vmul.f32 %v2459_v23, %v1865_v27 }
 0x886   : > { %v1881_v31 = vadd.f32 %v2460_v28, %v1873_v29 }
 0x888   : > { %v1882_v32 = vpack.c.bf16 %v1881_v31, %v1880_v30 }
 0x88a   : > { %2469 = vmatmul.mubr.msk.bf16.vlgmr.msra.gmra.mrb[40].mxu1 %vm666_vm2, %v1882_v32 }
 0x95d   : > { %v1980_v54 = vpop.f32.mrb[40].mxu1 }
 0x95e   : > { %v1981_v57 = vadd.f32 %v1980_v54, %v1896_v53  ;;  %v1982_v59 = vpop.f32.mrb[41].mxu1 }
 0x95f   : > { %v1983_v12 = vadd.f32 %v1982_v59, %v1900_v55  ;;  %v1984_v62 = vpop.f32.mrb[42].mxu1 }
 0x960   : > { %v1989_v63 = vmul.f32 %v1981_v57, %v1981_v57  ;;  %v1985_v0 = vadd.f32 %v1984_v62, %v1896_v53  ;;  %v1986_v4 = vpop.f32.mrb[43].mxu1 }
 0x961   : > { %v1990_v1 = vmul.f32 %v1983_v12, %v1983_v12  ;;  %v1987_v2 = vadd.f32 %v1986_v4, %v1900_v55 }
 0x962   : > { %v1993_v5 = vmul.f32 %v1989_v63, %v1981_v57  ;;  %v1991_v3 = vmul.f32 %v1985_v0, %v1985_v0 }
 0x963   : > { %v1994_v58 = vmul.f32 %v1990_v1, %v1983_v12  ;;  %v1992_v6 = vmul.f32 %v1987_v2, %v1987_v2 }
 0x964   : > { %v1997_v7 = vmul.f32 0.044715, %v1993_v5  ;;  %v1995_v8 = vmul.f32 %v1991_v3, %v1985_v0 }
 0x965   : > { %v1998_v47 = vmul.f32 0.044715, %v1994_v58  ;;  %v1996_v26 = vmul.f32 %v1992_v6, %v1987_v2 }
 0x966   : > { %v2001_v45 = vadd.f32 %v1997_v7, %v1981_v57  ;;  %v1999_v49 = vmul.f32 0.044715, %v1995_v8 }
 0x967   : > { %v2002_v9 = vadd.f32 %v1998_v47, %v1983_v12  ;;  %v2000_v10 = vmul.f32 0.044715, %v1996_v26 }
 0x968   : > { %v2005_v61 = vmul.f32 0.7978846, %v2001_v45  ;;  %v2003_v11 = vadd.f32 %v1999_v49, %v1985_v0 }
 0x969   : > { %v2006_v13 = vmul.f32 0.7978846, %v2002_v9  ;;  %v2004_v14 = vadd.f32 %v2000_v10, %v1987_v2 }
 0x96a   : > { %2807 = vtanh.f32 %v2005_v61  ;;  %v2007_v15 = vmul.f32 0.7978846, %v2003_v11 }
 0x96b   : > { %2809 = vtanh.f32 %v2006_v13  ;;  %v2008_v16 = vmul.f32 0.7978846, %v2004_v14 }
 0x96c   : > { %2811 = vtanh.f32 %v2007_v15 }
 0x96d   : > { %2813 = vtanh.f32 %v2008_v16 }
 0x974   : > { %v2808_v17 = vpop.eup %2807 }
 0x975   : > { %v2810_v18 = vpop.eup %2809  ;;  %v2013_v19 = vadd.f32 1.0, %v2808_v17 }
 0x976   : > { %v2812_v20 = vpop.eup %2811  ;;  %v2014_v21 = vadd.f32 1.0, %v2810_v18 }
 0x977   : > { %v2814_v22 = vpop.eup %2813  ;;  %v2017_v23 = vmul.f32 0.5, %v2013_v19  ;;  %v2015_v24 = vadd.f32 1.0, %v2812_v20 }
 0x978   : > { %v2016_v25 = vadd.f32 1.0, %v2814_v22  ;;  %v2018_v27 = vmul.f32 0.5, %v2014_v21 }
 0x979   : > { %v2019_v28 = vmul.f32 0.5, %v2015_v24  ;;  %v2021_v30 = vmul.f32 %v2017_v23, %v1981_v57 }
 0x97a   : > { %v2020_v29 = vmul.f32 0.5, %v2016_v25  ;;  %v2022_v32 = vmul.f32 %v2018_v27, %v1983_v12 }
 0x97b   : > { %v2023_v31 = vmul.f32 %v2019_v28, %v1985_v0 }
 0x97c   : > { %v2024_v46 = vmul.f32 %v2020_v29, %v1987_v2 }
 0x97d   : > { %v2025_v33 = vpack.c.bf16 %v2023_v31, %v2021_v30 }
 0x97e   : > { %v2026_v34 = vpack.c.bf16 %v2024_v46, %v2022_v32 }
 0x980   : > { %2194 = vmatprep.mubr.bf16.mxu0 %v2026_v34 }
 0x981   : > { %2195 = vmatmul.mubr.bf16.vlgmr.msra.gmra.mrb[32].mxu0 %v2025_v33 }
 0xa54   : > { %v2548_v35 = vpop.f32.mrb[32].mxu0 }
 0xa55   : > { %v2549_v37 = vpop.f32.mrb[33].mxu0 }
 0xa56   : > { %v2550_v38 = vadd.f32 %v2549_v37, %v2548_v35  ;;  %v2551_v39 = vpop.f32.mrb[34].mxu0 }
 0xa57   : > { %v2552_v40 = vpop.f32.mrb[35].mxu0 }
 0xa58   : > { %v2197_v41 = vadd.f32 %v2550_v38, %v2470_v36  ;;  %v2553_v42 = vadd.f32 %v2552_v40, %v2551_v39  ;;  %2210 = sbr.rel (%p2487_p8) target bundleno = 2656 (0xa60), region = 80 }
 0xa5a   : > { %v2203_v43 = vadd.f32 %v2197_v41, %v3256_v56  ;;  %v2200_v44 = vadd.f32 %v2553_v42, %v2470_v36 }
 0xa5c   : > { %2205 = vst.msk [vmem:[#allocation2] sm:$0xff] %vm666_vm2, %v2203_v43  ;;  %v2204_v48 = vadd.f32 %v2200_v44, %v3259_v60  ;;  %v2212_v50 = vrot.slane (!%p2487_p8), %v2203_v43, 4 }
 0xa5e   : > { %2206 = vst.msk [vmem:[#allocation2 + $0x8] sm:$0x3] %vm670_vm3, %v2204_v48  ;;  %v2215_v52 = vsel (!%p2487_p8), %vm2214_vm13, %v2203_v43, %v2212_v50 }
 0xa5f   : > { %2216 = vst.msk [vmem:[%s3036_s28] sm:$0x3] %vm670_vm3, %v2215_v52 }
 0xa60 PF: > { %s3382_s15 = sld [smem:[#allocation6_spill]]  ;;  %s3383_s25 = sld [smem:[#allocation4_spill]] }
 0xa61   : > { %s3384_s26 = sld [smem:[#allocation5_spill]]  ;;  %s3385_s27 = sld [smem:[#allocation7_spill]] }
 0xa62   : > { %s3386_s28 = sld [smem:[#allocation8_spill]] }
 0xa66   : > { %s23_s29 = sadd.s32 1, %s3382_s15  }
 0xa67   : > { %p20_p9 = scmp.ge.s32.totalorder %s23_s29, 6  }
 0xa69   :  { %22 = sbr.rel (!%p20_p9) target bundleno = 8 (0x8), region = 146 }

// kernel: dino_classifier_forward.5
= control target key start
LH: loop header
LB: loop body
LE: loop exit
PB: predicated region body
PF: predicated region fallthrough
CT: control target
= control target key end

     0   :  { %vm55_vm0 = vcmask 519168   ;;  %s4537_s0 = inlined_call_operand.vmem [shape: f32[4,64], index: 0, kind: input, shape index: {}]   ;;  %s4538_s1 = inlined_call_operand.vmem [shape: f32[1,64], index: 1, kind: input, shape index: {}]   ;;  %s4539_s2 = inlined_call_operand.vmem [shape: f32[1,64], index: 2, kind: input, shape index: {}]   ;;  %s4540_s3 = inlined_call_operand.vmem [shape: bf16[64,192], index: 3, kind: input, shape index: {}]   ;;  %s4541_s4 = inlined_call_operand.vmem [shape: f32[1,192], index: 4, kind: input, shape index: {}]   ;;  %s4542_s5 = inlined_call_operand.vmem [shape: bf16[64,64], index: 5, kind: input, shape index: {}]   ;;  %s4543_s6 = inlined_call_operand.vmem [shape: f32[1,64], index: 6, kind: input, shape index: {}]   ;;  %s4544_s7 = inlined_call_operand.vmem [shape: bf16[128,512], index: 7, kind: input, shape index: {}]   ;;  %s4545_s8 = inlined_call_operand.vmem [shape: f32[1,512], index: 8, kind: input, shape index: {}]   ;;  %s4546_s9 = inlined_call_operand.vmem [shape: f32[1,512], index: 9, kind: input, shape index: {}]   ;;  %s4547_s10 = inlined_call_operand.vmem [shape: f32[1,512], index: 10, kind: input, shape index: {}]   ;;  %s4548_s11 = inlined_call_operand.vmem [shape: f32[1,512], index: 11, kind: input, shape index: {}]   ;;  %s4549_s12 = inlined_call_operand.vmem [shape: f32[1,512], index: 12, kind: input, shape index: {}]   ;;  %s4550_s13 = inlined_call_operand.vmem [shape: bf16[512,128], index: 13, kind: input, shape index: {}]   ;;  %s4551_s14 = inlined_call_operand.vmem [shape: f32[1,128], index: 14, kind: input, shape index: {}]   ;;  %s4552_s15 = inlined_call_operand.hbm [shape: f32[2,128], index: 15, kind: output, shape index: {}]  }
   0x1   :  { %v52_v0 = vld [vmem:[%s4537_s0] sm:$0xf] }
   0x2   :  { %v56_v1 = vsel %vm55_vm0, %v52_v0, 0.0 }
   0x3   :  { %57 = vadd.xlane.f32.xlu0 %v56_v1 }
   0x4   :  { %20 = vsyncpa [#allocation3], 0  ;;  %v3002_v11 = vld [vmem:[%s4538_s1] ss:$0 sm:$0xff]  ;;  %v3491_v22 = vld [vmem:[%s4540_s3 + $0x4] ss:$8 sps:$4 sm:$0xff]   ;;  %v110_v39 = vlaneseq }
   0x5   :  { %v3003_v13 = vld [vmem:[%s4539_s2] ss:$0 sm:$0xff]  ;;  %v3494_v24 = vld [vmem:[%s4540_s3 + $0x14] ss:$8 sps:$4 sm:$0xff]   ;;  %164 = vmatprep.subr.bf16.mxu0 %v3491_v22  ;;  %v3496_v25 = vld [vmem:[%s4540_s3 + $0x10] ss:$8 sps:$4 sm:$0xff]  }
   0x6   :  { %v3493_v23 = vld [vmem:[%s4540_s3] ss:$8 sps:$4 sm:$0xff]   ;;  %v3681_v26 = vmov 0   ;;  %v3497_v27 = vld [vmem:[%s4540_s3 + $0x24] ss:$8 sps:$4 sm:$0xff]   ;;  %vm160_vm1 = vcmask 523264  }
   0x7   :  { %165 = vmatpush1.bf16.msra.mxu0 %v3493_v23  ;;  %196 = vmatprep.mubr.bf16.mxu0 %v3681_v26  ;;  %v3499_v28 = vld [vmem:[%s4540_s3 + $0x20] ss:$8 sps:$4 sm:$0xff]   ;;  %v3500_v29 = vld [vmem:[%s4540_s3 + $0x34] ss:$8 sps:$4 sm:$0xff]   ;;  %v3502_v30 = vld [vmem:[%s4540_s3 + $0x30] ss:$8 sps:$4 sm:$0xff]  }
   0x8   :  { %166 = vmatprep.subr.bf16.mxu0 %v3494_v24  ;;  %v3819_v40 = vshrl.u32 %v110_v39, 7  ;;  %v3682_v41 = vmov 0.0   ;;  %v108_v43 = vld [vmem:[%s4541_s4] sm:$0x3]  ;;  %vm3683_vm2 = vmmov 0   ;;  %s3684_s22 = smov 64  }
   0x9   :  { %3233 = vmatprep.subr.bf16.mxu1 %v3682_v41  ;;  %3235 = vmatprep.mubr.msk.bf16.mxu1 %vm3683_vm2, %v3682_v41  ;;  %s3685_s4 = smov 120   ;;  %s3686_s23 = smov 112   ;;  %vm210_vm3 = vcmask 64512   ;;  %vm274_vm4 = vcmask 1040384   ;;  %vm257_vm5 = vcmask 9216   ;;  %vm270_vm6 = vcmask 15360  }
   0xa   :  { %v3824_v42 = vsub.s32 0, %v3819_v40  ;;  %s3687_s24 = smov 104   ;;  %s3688_s1 = smov 96   ;;  %v3870_v52 = vsub.s32 1, %v3819_v40  ;;  %vm1118_vm7 = vcmask 130048   ;;  %vm1120_vm8 = vcmask 195584  }
   0xb   :  { %167 = vmatpush1.bf16.msra.mxu0 %v3496_v25  ;;  %s3689_s25 = smov 88   ;;  %s3690_s2 = smov 80   ;;  %vm1122_vm9 = vcmask 261120   ;;  %vm1124_vm10 = vcmask 326656   ;;  %vm1126_vm11 = vcmask 392192   ;;  %vm1128_vm12 = vcmask 457728  }
   0xc   :  { %168 = vmatprep.subr.bf16.mxu0 %v3497_v27  ;;  %v113_v44 = vrot.slane %v108_v43, %v3824_v42  ;;  %s3691_s26 = smov 72   ;;  %s3692_s27 = smov 56   ;;  %v117_v53 = vrot.slane %v108_v43, %v3870_v52  ;;  %vm2052_vm13 = vcmask 1041408   ;;  %vm2054_vm14 = vcmask 1042432  }
   0xd   :  { %s3693_s28 = smov 48   ;;  %s3694_s29 = smov 40  }
   0xe   :  { %s3695_s30 = smov 32   ;;  %s3696_s16 = smov 24  }
   0xf   :  { %169 = vmatpush1.bf16.msra.mxu0 %v3499_v28  ;;  %s3697_s17 = smov 16   ;;  %s3698_s18 = smov 8  }
  0x10   :  { %170 = vmatprep.subr.bf16.mxu0 %v3500_v29 }
  0x13   :  { %171 = vmatpush1.bf16.msra.mxu0 %v3502_v30 }
  0x14   :  { %3257 = vmatprep.subr.bf16.mxu0 %v3682_v41 }
  0x90   :  { %v58_v2 = vpop.xlane.xlu0 %57 }
  0x91   :  { %v60_v3 = vmul.f32 0.015625, %v58_v2 }
  0x93   :  { %v61_v4 = vsub.f32 %v52_v0, %v60_v3 }
  0x95   :  { %v62_v5 = vmul.f32 %v61_v4, %v61_v4 }
  0x97   :  { %v63_v6 = vsel %vm55_vm0, %v62_v5, 0.0 }
  0x98   :  { %64 = vadd.xlane.f32.xlu0 %v63_v6 }
 0x125   :  { %v65_v7 = vpop.xlane.xlu0 %64 }
 0x126   :  { %v66_v8 = vmul.f32 0.015625, %v65_v7 }
 0x128   :  { %v67_v9 = vadd.f32 1e-06, %v66_v8 }
 0x12a   :  { %3587 = vrsqrt.f32 %v67_v9 }
 0x134   :  { %v3588_v10 = vpop.eup %3587 }
 0x135   :  { %v69_v12 = vmul.f32 %v3588_v10, %v61_v4 }
 0x137   :  { %v76_v14 = vmul.f32 %v3002_v11, %v69_v12 }
 0x139   :  { %v83_v15 = vadd.f32 %v3003_v13, %v76_v14 }
 0x13b   :  { %v84_v16 = vsel %vm55_vm0, %v83_v15, 0.0 }
 0x13c   :  { %85 = vadd.xlane.f32.xlu1 %v84_v16 }
 0x1c9   :  { %v86_v17 = vpop.xlane.xlu1 %85 }
 0x1ca   :  { %v87_v18 = vmul.f32 0.015625, %v86_v17 }
 0x1cc   :  { %v88_v19 = vsub.f32 %v83_v15, %v87_v18 }
 0x1ce   :  { %v89_v20 = vmul.f32 %v88_v19, %v88_v19 }
 0x1d0   :  { %v90_v21 = vsel %vm55_vm0, %v89_v20, 0.0 }
 0x1d1   :  { %91 = vadd.xlane.f32.xlu1 %v90_v21 }
 0x25e   :  { %v92_v31 = vpop.xlane.xlu1 %91 }
 0x25f   :  { %v93_v32 = vmul.f32 0.015625, %v92_v31 }
 0x261   :  { %v94_v33 = vadd.f32 1e-06, %v93_v32 }
 0x263   :  { %3589 = vrsqrt.f32 %v94_v33 }
 0x26d   :  { %v3590_v34 = vpop.eup %3589 }
 0x26e   :  { %v96_v35 = vmul.f32 %v3590_v34, %v88_v19 }
 0x270   :  { %v97_v36 = vmul.f32 %v3002_v11, %v96_v35 }
 0x272   :  { %v98_v37 = vadd.f32 %v3003_v13, %v97_v36 }
 0x274   :  { %v99_v38 = vpack.c.bf16 %v98_v37, %v98_v37 }
 0x276   :  { %3012 = vmatmul.mubr.msk.bf16.vlgmr.msra.gmra.mrb[0].mxu0 %vm160_vm1, %v99_v38 }
 0x277   :  { %3259 = vmatprep.mubr.msk.bf16.mxu0 %vm3683_vm2, %v3682_v41 }
 0x349   :  { %v198_v45 = vpop.f32.mrb[0].mxu0 }
 0x34a   :  { %v199_v46 = vadd.f32 %v198_v45, %v113_v44  ;;  %v200_v47 = vpop.f32.mrb[1].mxu0 }
 0x34b   :  { %v202_v48 = vpop.f32.mrb[2].mxu0  ;;  %v201_v55 = vadd.f32 %v200_v47, %v117_v53 }
 0x34c   :  { %v3834_v49 = vpack.c.bf16 %v199_v46, %v199_v46  ;;  %v203_v50 = vpop.f32.mrb[3].mxu0 }
 0x34d   :  { %v3875_v57 = vpack.c.bf16 %v201_v55, %v201_v55 }
 0x34e   :  { %208 = vrot.lane.b32.xlu0 %v3834_v49, %s3684_s22  ;;  %v3853_v51 = vrot.slane %v3834_v49, 1 }
 0x34f   :  { %v276_v58 = vsel %vm274_vm4, %v3875_v57, 0 }
 0x352   :  { %318 = vrot.lane.b32.xlu0 %v3834_v49, %s3685_s4 }
 0x356   :  { %429 = vrot.lane.b32.xlu0 %v3834_v49, %s3686_s23 }
 0x35a   :  { %539 = vrot.lane.b32.xlu0 %v3834_v49, %s3687_s24 }
 0x35e   :  { %649 = vrot.lane.b32.xlu0 %v3834_v49, %s3688_s1 }
 0x362   :  { %759 = vrot.lane.b32.xlu0 %v3834_v49, %s3689_s25 }
 0x366   :  { %869 = vrot.lane.b32.xlu0 %v3834_v49, %s3690_s2 }
 0x36a   :  { %979 = vrot.lane.b32.xlu0 %v3834_v49, %s3691_s26 }
 0x36e   :  { %1240 = vrot.lane.b32.xlu0 %v3853_v51, %s3692_s27 }
 0x372   :  { %1350 = vrot.lane.b32.xlu0 %v3853_v51, %s3693_s28 }
 0x376   :  { %1460 = vrot.lane.b32.xlu0 %v3853_v51, %s3694_s29 }
 0x37a   :  { %1570 = vrot.lane.b32.xlu0 %v3853_v51, %s3695_s30 }
 0x37e   :  { %1680 = vrot.lane.b32.xlu0 %v3853_v51, %s3696_s16 }
 0x382   :  { %1790 = vrot.lane.b32.xlu0 %v3853_v51, %s3697_s17 }
 0x386   :  { %1900 = vrot.lane.b32.xlu0 %v3853_v51, %s3698_s18 }
 0x3c0   :  { %v209_v54 = vpop.permute.xlu0 %208 }
 0x3c1   :  { %v215_v56 = vsel %vm210_vm3, %v209_v54, 0 }
 0x3c2   :  { %3234 = vmatpush3.bf16.xpose.msra.mxu1 %v215_v56 }
 0x3c3   :  { %3239 = vmatprep.subr.bf16.mxu1 %v3682_v41 }
 0x3c4   :  { %v319_v9 = vpop.permute.xlu0 %318 }
 0x3c8   :  { %v430_v14 = vpop.permute.xlu0 %429 }
 0x3c9   :  { %3236 = vmatmul.mubr.msk.bf16.vlgmr.msra.gmra.mrb[0].mxu1 %vm210_vm3, %v3834_v49 }
 0x3ca   :  { %3240 = vmatpush3.bf16.msra.mxu1 %v276_v58  ;;  %3241 = vmatprep.mubr.msk.bf16.mxu1 %vm3683_vm2, %v3682_v41 }
 0x3cb   :  { %3245 = vmatprep.subr.bf16.mxu1 %v3682_v41 }
 0x3cc   :  { %v540_v18 = vpop.permute.xlu0 %539 }
 0x3d0   :  { %v650_v21 = vpop.permute.xlu0 %649 }
 0x3d4   :  { %v760_v24 = vpop.permute.xlu0 %759 }
 0x3d8   :  { %v870_v28 = vpop.permute.xlu0 %869 }
 0x3dc   :  { %v980_v31 = vpop.permute.xlu0 %979 }
 0x3e0   :  { %v1241_v33 = vpop.permute.xlu0 %1240 }
 0x3e1   :  { %v1246_v34 = vsel %vm210_vm3, %v1241_v33, 0 }
 0x3e4   :  { %v1351_v35 = vpop.permute.xlu0 %1350 }
 0x3e5   :  { %v1356_v37 = vsel %vm210_vm3, %v1351_v35, 0 }
 0x3e8   :  { %v1461_v38 = vpop.permute.xlu0 %1460 }
 0x3e9   :  { %v1466_v43 = vsel %vm210_vm3, %v1461_v38, 0 }
 0x3ec   :  { %v1571_v44 = vpop.permute.xlu0 %1570 }
 0x3ed   :  { %v1576_v46 = vsel %vm210_vm3, %v1571_v44, 0 }
 0x3f0   :  { %v1681_v47 = vpop.permute.xlu0 %1680 }
 0x3f4   :  { %v1791_v50 = vpop.permute.xlu0 %1790 }
 0x3f5   :  { %v1796_v53 = vsel %vm210_vm3, %v1791_v50, 0 }
 0x3f8   :  { %v1901_v54 = vpop.permute.xlu0 %1900 }
 0x3f9   :  { %v1906_v56 = vsel %vm210_vm3, %v1901_v54, 0 }
 0x49c   :  { %v251_v59 = vpop.f32.mrb[0].mxu1 }
 0x49d   :  { %v3237_v60 = vpop.f32.mrb[1].mxu1  ;;  %v258_v61 = vsel %vm257_vm5, %v251_v59, -inf }
 0x49e   :  { %259 = vmax.xlane.f32.xlu1 %v258_v61  ;;  %v254_v62 = vpop.f32.mrb[2].mxu1 }
 0x49f   :  { %v3238_v63 = vpop.f32.mrb[3].mxu1 }
 0x52b   :  { %v260_v0 = vpop.xlane.xlu1 %259 }
 0x52c   :  { %v261_v1 = vsub.f32 %v251_v59, %v260_v0 }
 0x52e   :  { %v262_v2 = vmul.f32 1.442695, %v261_v1 }
 0x530   :  { %3591 = vpow2.f32 %v262_v2 }
 0x53a   :  { %v3592_v3 = vpop.eup %3591 }
 0x53b   :  { %v264_v4 = vsel %vm257_vm5, %v3592_v3, 0.0 }
 0x53c   :  { %265 = vadd.xlane.f32.xlu1 %v264_v4 }
 0x54d   :  { %320 = vrot.lane.b32.xlu1 %v3834_v49, %s3692_s27 }
 0x551   :  { %431 = vrot.lane.b32.xlu1 %v3834_v49, %s3693_s28 }
 0x555   :  { %541 = vrot.lane.b32.xlu1 %v3834_v49, %s3694_s29 }
 0x559   :  { %651 = vrot.lane.b32.xlu1 %v3834_v49, %s3695_s30 }
 0x55d   :  { %761 = vrot.lane.b32.xlu1 %v3834_v49, %s3696_s16 }
 0x561   :  { %871 = vrot.lane.b32.xlu1 %v3834_v49, %s3697_s17 }
 0x565   :  { %981 = vrot.lane.b32.xlu1 %v3834_v49, %s3698_s18  ;;  %v1686_v49 = vsel %vm210_vm3, %v1681_v47, 0 }
 0x569   :  { %1131 = vrot.lane.b32.xlu1 %v3853_v51, %s3684_s22 }
 0x56d   :  { %1238 = vrot.lane.b32.xlu1 %v3853_v51, %s3685_s4 }
 0x571   :  { %1348 = vrot.lane.b32.xlu1 %v3853_v51, %s3686_s23 }
 0x575   :  { %1458 = vrot.lane.b32.xlu1 %v3853_v51, %s3687_s24 }
 0x579   :  { %1568 = vrot.lane.b32.xlu1 %v3853_v51, %s3688_s1 }
 0x57d   :  { %1678 = vrot.lane.b32.xlu1 %v3853_v51, %s3689_s25 }
 0x581   :  { %1788 = vrot.lane.b32.xlu1 %v3853_v51, %s3690_s2 }
 0x585   :  { %1898 = vrot.lane.b32.xlu1 %v3853_v51, %s3691_s26 }
 0x5c9   :  { %v266_v5 = vpop.xlane.xlu1 %265 }
 0x5ca   :  { %3593 = vrcp.f32 %v266_v5 }
 0x5cd   :  { %v321_v6 = vpop.permute.xlu1 %320 }
 0x5ce   :  { %v326_v15 = vsel %vm210_vm3, %v321_v6, 0 }
 0x5d1   :  { %v432_v7 = vpop.permute.xlu1 %431 }
 0x5d2   :  { %v437_v8 = vsel %vm210_vm3, %v432_v7, 0 }
 0x5d3   :  { %3258 = vmatpush3.bf16.xpose.msra.mxu0 %v437_v8 }
 0x5d4   :  { %v3594_v10 = vpop.eup %3593  ;;  %3269 = vmatprep.subr.bf16.mxu0 %v3682_v41 }
 0x5d5   :  { %v268_v11 = vmul.f32 %v3594_v10, %v3592_v3  ;;  %v542_v12 = vpop.permute.xlu1 %541 }
 0x5d6   :  { %v547_v16 = vsel %vm210_vm3, %v542_v12, 0 }
 0x5d7   :  { %v269_v13 = vpack.c.bf16 %v268_v11, %v268_v11 }
 0x5d9   :  { %3242 = vmatmul.mubr.msk.bf16.vlgmr.msra.gmra.mrb[4].mxu1 %vm270_vm6, %v269_v13  ;;  %v652_v17 = vpop.permute.xlu1 %651 }
 0x5da   :  { %3246 = vmatpush3.bf16.xpose.msra.mxu1 %v326_v15  ;;  %3260 = vmatmul.mubr.msk.bf16.vlgmr.msra.gmra.mrb[4].mxu0 %vm210_vm3, %v430_v14  ;;  %v657_v19 = vsel %vm210_vm3, %v652_v17, 0 }
 0x5db   :  { %3270 = vmatpush3.bf16.xpose.msra.mxu0 %v547_v16  ;;  %3247 = vmatprep.mubr.msk.bf16.mxu1 %vm3683_vm2, %v3682_v41 }
 0x5dc   :  { %3271 = vmatprep.mubr.msk.bf16.mxu0 %vm3683_vm2, %v3682_v41  ;;  %3281 = vmatprep.subr.bf16.mxu0 %v3682_v41 }
 0x5dd   :  { %3251 = vmatprep.subr.bf16.mxu1 %v3682_v41  ;;  %v762_v20 = vpop.permute.xlu1 %761 }
 0x5de   :  { %v767_v22 = vsel %vm210_vm3, %v762_v20, 0 }
 0x5e1   :  { %3248 = vmatmul.mubr.msk.bf16.vlgmr.msra.gmra.mrb[8].mxu1 %vm210_vm3, %v319_v9  ;;  %v872_v23 = vpop.permute.xlu1 %871 }
 0x5e2   :  { %3272 = vmatmul.mubr.msk.bf16.vlgmr.msra.gmra.mrb[8].mxu0 %vm210_vm3, %v540_v18  ;;  %3253 = vmatprep.mubr.msk.bf16.mxu1 %vm3683_vm2, %v3682_v41  ;;  %v877_v25 = vsel %vm210_vm3, %v872_v23, 0 }
 0x5e3   :  { %3282 = vmatpush3.bf16.xpose.msra.mxu0 %v657_v19  ;;  %3283 = vmatprep.mubr.msk.bf16.mxu0 %vm3683_vm2, %v3682_v41 }
 0x5e4   :  { %3293 = vmatprep.subr.bf16.mxu0 %v3682_v41 }
 0x5e5   :  { %v982_v27 = vpop.permute.xlu1 %981 }
 0x5e6   :  { %v987_v29 = vsel %vm210_vm3, %v982_v27, 0 }
 0x5e9   :  { %v1132_v30 = vpop.permute.xlu1 %1131 }
 0x5ea   :  { %3284 = vmatmul.mubr.msk.bf16.vlgmr.msra.gmra.mrb[12].mxu0 %vm210_vm3, %v650_v21  ;;  %v1137_v32 = vsel %vm210_vm3, %v1132_v30, 0 }
 0x5eb   :  { %3294 = vmatpush3.bf16.xpose.msra.mxu0 %v767_v22  ;;  %3295 = vmatprep.mubr.msk.bf16.mxu0 %vm3683_vm2, %v3682_v41 }
 0x5ec   :  { %3305 = vmatprep.subr.bf16.mxu0 %v3682_v41 }
 0x5ed   :  { %v1239_v36 = vpop.permute.xlu1 %1238 }
 0x5f1   :  { %v1349_v39 = vpop.permute.xlu1 %1348 }
 0x5f2   :  { %3296 = vmatmul.mubr.msk.bf16.vlgmr.msra.gmra.mrb[16].mxu0 %vm210_vm3, %v760_v24 }
 0x5f3   :  { %3306 = vmatpush3.bf16.xpose.msra.mxu0 %v877_v25  ;;  %3307 = vmatprep.mubr.msk.bf16.mxu0 %vm3683_vm2, %v3682_v41 }
 0x5f4   :  { %3317 = vmatprep.subr.bf16.mxu0 %v3682_v41 }
 0x5f5   :  { %v1459_v45 = vpop.permute.xlu1 %1458 }
 0x5f9   :  { %v1569_v48 = vpop.permute.xlu1 %1568 }
 0x5fa   :  { %3308 = vmatmul.mubr.msk.bf16.vlgmr.msra.gmra.mrb[20].mxu0 %vm210_vm3, %v870_v28 }
 0x5fb   :  { %3318 = vmatpush3.bf16.xpose.msra.mxu0 %v987_v29  ;;  %3319 = vmatprep.mubr.msk.bf16.mxu0 %vm3683_vm2, %v3682_v41 }
 0x5fc   :  { %3329 = vmatprep.subr.bf16.mxu0 %v3682_v41 }
 0x602   :  { %3320 = vmatmul.mubr.msk.bf16.vlgmr.msra.gmra.mrb[24].mxu0 %vm210_vm3, %v980_v31 }
 0x603   :  { %3330 = vmatpush3.bf16.xpose.msra.mxu0 %v1137_v32  ;;  %3331 = vmatprep.mubr.msk.bf16.mxu0 %vm3683_vm2, %v3682_v41 }
 0x604   :  { %3341 = vmatprep.subr.bf16.mxu0 %v3682_v41 }
 0x60a   :  { %3332 = vmatmul.mubr.msk.bf16.vlgmr.msra.gmra.mrb[28].mxu0 %vm210_vm3, %v3853_v51  ;;  %v1679_v51 = vpop.permute.xlu1 %1678 }
 0x60b   :  { %3342 = vmatpush3.bf16.xpose.msra.mxu0 %v1246_v34  ;;  %3343 = vmatprep.mubr.msk.bf16.mxu0 %vm3683_vm2, %v3682_v41 }
 0x60c   :  { %3353 = vmatprep.subr.bf16.mxu0 %v3682_v41 }
 0x60e   :  { %v1789_v55 = vpop.permute.xlu1 %1788 }
 0x612   :  { %3344 = vmatmul.mubr.msk.bf16.vlgmr.msra.gmra.mrb[32].mxu0 %vm210_vm3, %v1239_v36  ;;  %v1899_v58 = vpop.permute.xlu1 %1898 }
 0x613   :  { %3354 = vmatpush3.bf16.xpose.msra.mxu0 %v1356_v37  ;;  %3355 = vmatprep.mubr.msk.bf16.mxu0 %vm3683_vm2, %v3682_v41 }
 0x614   :  { %3365 = vmatprep.subr.bf16.mxu0 %v3682_v41 }
 0x61a   :  { %3356 = vmatmul.mubr.msk.bf16.vlgmr.msra.gmra.mrb[36].mxu0 %vm210_vm3, %v1349_v39 }
 0x61b   :  { %3366 = vmatpush3.bf16.xpose.msra.mxu0 %v1466_v43  ;;  %3367 = vmatprep.mubr.msk.bf16.mxu0 %vm3683_vm2, %v3682_v41 }
 0x61c   :  { %3377 = vmatprep.subr.bf16.mxu0 %v3682_v41 }
 0x622   :  { %3368 = vmatmul.mubr.msk.bf16.vlgmr.msra.gmra.mrb[40].mxu0 %vm210_vm3, %v1459_v45 }
 0x623   :  { %3378 = vmatpush3.bf16.xpose.msra.mxu0 %v1576_v46  ;;  %3379 = vmatprep.mubr.msk.bf16.mxu0 %vm3683_vm2, %v3682_v41 }
 0x624   :  { %3389 = vmatprep.subr.bf16.mxu0 %v3682_v41 }
 0x62a   :  { %3380 = vmatmul.mubr.msk.bf16.vlgmr.msra.gmra.mrb[44].mxu0 %vm210_vm3, %v1569_v48 }
 0x62b   :  { %3390 = vmatpush3.bf16.xpose.msra.mxu0 %v1686_v49  ;;  %3391 = vmatprep.mubr.msk.bf16.mxu0 %vm3683_vm2, %v3682_v41 }
 0x62c   :  { %3401 = vmatprep.subr.bf16.mxu0 %v3682_v41 }
 0x632   :  { %3392 = vmatmul.mubr.msk.bf16.vlgmr.msra.gmra.mrb[48].mxu0 %vm210_vm3, %v1679_v51 }
 0x633   :  { %3402 = vmatpush3.bf16.xpose.msra.mxu0 %v1796_v53  ;;  %3403 = vmatprep.mubr.msk.bf16.mxu0 %vm3683_vm2, %v3682_v41 }
 0x634   :  { %3413 = vmatprep.subr.bf16.mxu0 %v3682_v41 }
 0x63a   :  { %3404 = vmatmul.mubr.msk.bf16.vlgmr.msra.gmra.mrb[52].mxu0 %vm210_vm3, %v1789_v55 }
 0x63b   :  { %3414 = vmatpush3.bf16.xpose.msra.mxu0 %v1906_v56  ;;  %3415 = vmatprep.mubr.msk.bf16.mxu0 %vm3683_vm2, %v3682_v41 }
 0x63c   :  { %3425 = vmatprep.subr.bf16.mxu0 %v3682_v41 }
 0x642   :  { %3416 = vmatmul.mubr.msk.bf16.vlgmr.msra.gmra.mrb[56].mxu0 %vm210_vm3, %v1899_v58 }
 0x643   :  { %3433 = vmatprep.mubr.msk.bf16.mxu0 %vm3683_vm2, %v3682_v41 }
 0x6ac   :  { %v3995_v59 = vpop.f32.mrb[4].mxu1 }
 0x6ad   :  { %v3243_v60 = vpop.f32.mrb[5].mxu1  ;;  %v3997_v61 = vpop.f32.mrb[4].mxu0 }
 0x6ae   :  { %v315_v62 = vpop.f32.mrb[6].mxu1  ;;  %v3261_v63 = vpop.f32.mrb[5].mxu0  ;;  %v479_v0 = vsel %vm257_vm5, %v3997_v61, -inf }
 0x6af   :  { %v3244_v1 = vpop.f32.mrb[7].mxu1  ;;  %v476_v2 = vpop.f32.mrb[6].mxu0  ;;  %480 = vmax.xlane.f32.xlu1 %v479_v0 }
 0x6b0   :  { %v3262_v3 = vpop.f32.mrb[7].mxu0 }
 0x6b4   :  { %v4001_v4 = vpop.f32.mrb[8].mxu1 }
 0x6b5   :  { %v3249_v5 = vpop.f32.mrb[9].mxu1  ;;  %v4003_v6 = vpop.f32.mrb[8].mxu0 }
 0x6b6   :  { %v365_v7 = vpop.f32.mrb[10].mxu1  ;;  %v3273_v8 = vpop.f32.mrb[9].mxu0  ;;  %v589_v9 = vsel %vm257_vm5, %v4003_v6, -inf }
 0x6b7   :  { %v3250_v10 = vpop.f32.mrb[11].mxu1  ;;  %v586_v11 = vpop.f32.mrb[10].mxu0  ;;  %590 = vmax.xlane.f32.xlu0 %v589_v9 }
 0x6b8   :  { %v3274_v12 = vpop.f32.mrb[11].mxu0 }
 0x6bd   :  { %v4007_v13 = vpop.f32.mrb[12].mxu0 }
 0x6be   :  { %v3285_v14 = vpop.f32.mrb[13].mxu0  ;;  %v699_v15 = vsel %vm257_vm5, %v4007_v13, -inf }
 0x6bf   :  { %v696_v16 = vpop.f32.mrb[14].mxu0  ;;  %700 = vmax.xlane.f32.xlu0 %v699_v15 }
 0x6c0   :  { %v3286_v17 = vpop.f32.mrb[15].mxu0 }
 0x6c5   :  { %v4011_v18 = vpop.f32.mrb[16].mxu0 }
 0x6c6   :  { %v3297_v19 = vpop.f32.mrb[17].mxu0  ;;  %v809_v20 = vsel %vm257_vm5, %v4011_v18, -inf }
 0x6c7   :  { %v806_v21 = vpop.f32.mrb[18].mxu0  ;;  %810 = vmax.xlane.f32.xlu0 %v809_v20 }
 0x6c8   :  { %v3298_v22 = vpop.f32.mrb[19].mxu0 }
 0x6cd   :  { %v4015_v23 = vpop.f32.mrb[20].mxu0 }
 0x6ce   :  { %v3309_v24 = vpop.f32.mrb[21].mxu0  ;;  %v919_v25 = vsel %vm257_vm5, %v4015_v23, -inf }
 0x6cf   :  { %v916_v27 = vpop.f32.mrb[22].mxu0  ;;  %920 = vmax.xlane.f32.xlu1 %v919_v25 }
 0x6d0   :  { %v3310_v28 = vpop.f32.mrb[23].mxu0 }
 0x6d5   :  { %v4019_v29 = vpop.f32.mrb[24].mxu0 }
 0x6d6   :  { %v3321_v30 = vpop.f32.mrb[25].mxu0  ;;  %v1029_v31 = vsel %vm257_vm5, %v4019_v29, -inf }
 0x6d7   :  { %v1026_v32 = vpop.f32.mrb[26].mxu0  ;;  %1030 = vmax.xlane.f32.xlu0 %v1029_v31 }
 0x6d8   :  { %v3322_v33 = vpop.f32.mrb[27].mxu0 }
 0x6dd   :  { %v4023_v34 = vpop.f32.mrb[28].mxu0 }
 0x6de   :  { %v3333_v35 = vpop.f32.mrb[29].mxu0  ;;  %v1179_v36 = vsel %vm257_vm5, %v4023_v34, -inf }
 0x6df   :  { %1180 = vmax.xlane.f32.xlu1 %v1179_v36  ;;  %v1176_v37 = vpop.f32.mrb[30].mxu0 }
 0x6e0   :  { %v3334_v38 = vpop.f32.mrb[31].mxu0 }
 0x6e5   :  { %v4027_v39 = vpop.f32.mrb[32].mxu0 }
 0x6e6   :  { %v3345_v43 = vpop.f32.mrb[33].mxu0  ;;  %v1288_v44 = vsel %vm257_vm5, %v4027_v39, -inf }
 0x6e7   :  { %1289 = vmax.xlane.f32.xlu0 %v1288_v44  ;;  %v1285_v45 = vpop.f32.mrb[34].mxu0 }
 0x6e8   :  { %v3346_v46 = vpop.f32.mrb[35].mxu0 }
 0x6ed   :  { %v4031_v47 = vpop.f32.mrb[36].mxu0 }
 0x6ee   :  { %v3357_v48 = vpop.f32.mrb[37].mxu0  ;;  %v1398_v49 = vsel %vm257_vm5, %v4031_v47, -inf }
 0x6ef   :  { %1399 = vmax.xlane.f32.xlu1 %v1398_v49  ;;  %v1395_v50 = vpop.f32.mrb[38].mxu0 }
 0x6f0   :  { %v3358_v51 = vpop.f32.mrb[39].mxu0 }
 0x6f5   :  { %v4035_v53 = vpop.f32.mrb[40].mxu0 }
 0x6f6   :  { %v3369_v54 = vpop.f32.mrb[41].mxu0  ;;  %v1508_v55 = vsel %vm257_vm5, %v4035_v53, -inf }
 0x6f7   :  { %1509 = vmax.xlane.f32.xlu0 %v1508_v55  ;;  %v1505_v56 = vpop.f32.mrb[42].mxu0 }
 0x6f8   :  { %v3370_v58 = vpop.f32.mrb[43].mxu0 }
 0x6fd   :  { %v4039_v60 = vpop.f32.mrb[44].mxu0 }
 0x6fe   :  { %v3381_v62 = vpop.f32.mrb[45].mxu0  ;;  %v1618_v63 = vsel %vm257_vm5, %v4039_v60, -inf }
 0x6ff   :  { %1619 = vmax.xlane.f32.xlu0 %v1618_v63  ;;  %v1615_v0 = vpop.f32.mrb[46].mxu0 }
 0x700   :  { %381 = vrot.lane.b32.xlu1 %v3875_v57, %s3685_s4  ;;  %v3382_v1 = vpop.f32.mrb[47].mxu0 }
 0x705   :  { %v4045_v2 = vpop.f32.mrb[48].mxu0 }
 0x706   :  { %v3393_v3 = vpop.f32.mrb[49].mxu0  ;;  %v1728_v5 = vsel %vm257_vm5, %v4045_v2, -inf }
 0x707   :  { %1729 = vmax.xlane.f32.xlu0 %v1728_v5  ;;  %v1725_v7 = vpop.f32.mrb[50].mxu0 }
 0x708   :  { %v3394_v8 = vpop.f32.mrb[51].mxu0 }
 0x70d   :  { %v4049_v9 = vpop.f32.mrb[52].mxu0 }
 0x70e   :  { %v3405_v10 = vpop.f32.mrb[53].mxu0  ;;  %v1838_v11 = vsel %vm257_vm5, %v4049_v9, -inf }
 0x70f   :  { %1839 = vmax.xlane.f32.xlu0 %v1838_v11  ;;  %v1835_v12 = vpop.f32.mrb[54].mxu0 }
 0x710   :  { %v3406_v14 = vpop.f32.mrb[55].mxu0 }
 0x715   :  { %v4053_v15 = vpop.f32.mrb[56].mxu0 }
 0x716   :  { %v3417_v16 = vpop.f32.mrb[57].mxu0  ;;  %v1948_v17 = vsel %vm257_vm5, %v4053_v15, -inf }
 0x717   :  { %1949 = vmax.xlane.f32.xlu0 %v1948_v17  ;;  %v1945_v19 = vpop.f32.mrb[58].mxu0 }
 0x718   :  { %v3418_v20 = vpop.f32.mrb[59].mxu0 }
 0x72d   :  { %491 = vrot.lane.b32.xlu0 %v3875_v57, %s3686_s23 }
 0x73c   :  { %v481_v21 = vpop.xlane.xlu1 %480 }
 0x73d   :  { %v482_v22 = vsub.f32 %v3997_v61, %v481_v21 }
 0x73f   :  { %v483_v24 = vmul.f32 1.442695, %v482_v22 }
 0x741   :  { %3595 = vpow2.f32 %v483_v24 }
 0x744   :  { %v591_v25 = vpop.xlane.xlu0 %590 }
 0x745   :  { %v592_v27 = vsub.f32 %v4003_v6, %v591_v25 }
 0x747   :  { %v593_v28 = vmul.f32 1.442695, %v592_v27 }
 0x749   :  { %3597 = vpow2.f32 %v593_v28 }
 0x74b   :  { %v4061_v30 = vpop.eup %3595 }
 0x74c   :  { %v701_v31 = vpop.xlane.xlu0 %700  ;;  %v485_v32 = vsel %vm257_vm5, %v4061_v30, 0.0 }
 0x74d   :  { %v702_v33 = vsub.f32 %v4007_v13, %v701_v31  ;;  %486 = vadd.xlane.f32.xlu1 %v485_v32 }
 0x74f   :  { %v703_v35 = vmul.f32 1.442695, %v702_v33 }
 0x751   :  { %3599 = vpow2.f32 %v703_v35 }
 0x753   :  { %v4066_v36 = vpop.eup %3597 }
 0x754   :  { %v811_v61 = vpop.xlane.xlu0 %810  ;;  %v595_v37 = vsel %vm257_vm5, %v4066_v36, 0.0 }
 0x755   :  { %v812_v6 = vsub.f32 %v4011_v18, %v811_v61  ;;  %596 = vadd.xlane.f32.xlu1 %v595_v37  ;;  %v368_v18 = vsel %vm257_vm5, %v4001_v4, -inf }
 0x757   :  { %v813_v38 = vmul.f32 1.442695, %v812_v6 }
 0x759   :  { %3601 = vpow2.f32 %v813_v38 }
 0x75b   :  { %v4071_v43 = vpop.eup %3599 }
 0x75c   :  { %v921_v44 = vpop.xlane.xlu1 %920  ;;  %v705_v13 = vsel %vm257_vm5, %v4071_v43, 0.0 }
 0x75d   :  { %v922_v45 = vsub.f32 %v4015_v23, %v921_v44  ;;  %706 = vadd.xlane.f32.xlu1 %v705_v13 }
 0x75f   :  { %v923_v46 = vmul.f32 1.442695, %v922_v45 }
 0x761   :  { %3603 = vpow2.f32 %v923_v46 }
 0x763   :  { %v4076_v48 = vpop.eup %3601 }
 0x764   :  { %v815_v49 = vsel %vm257_vm5, %v4076_v48, 0.0  ;;  %v1031_v54 = vpop.xlane.xlu0 %1030 }
 0x765   :  { %816 = vadd.xlane.f32.xlu0 %v815_v49  ;;  %v1032_v3 = vsub.f32 %v4019_v29, %v1031_v54 }
 0x767   :  { %v1033_v5 = vmul.f32 1.442695, %v1032_v3 }
 0x769   :  { %369 = vmax.xlane.f32.xlu0 %v368_v18  ;;  %3605 = vpow2.f32 %v1033_v5 }
 0x76b   :  { %v4082_v50 = vpop.eup %3603 }
 0x76c   :  { %v925_v51 = vsel %vm257_vm5, %v4082_v50, 0.0  ;;  %v1181_v23 = vpop.xlane.xlu1 %1180 }
 0x76d   :  { %926 = vadd.xlane.f32.xlu1 %v925_v51 }
 0x773   :  { %v4097_v14 = vpop.eup %3605 }
 0x774   :  { %v1290_v58 = vpop.xlane.xlu0 %1289  ;;  %v1035_v29 = vsel %vm257_vm5, %v4097_v14, 0.0 }
 0x775   :  { %v1291_v7 = vsub.f32 %v4027_v39, %v1290_v58 }
 0x777   :  { %v1292_v10 = vmul.f32 1.442695, %v1291_v7 }
 0x77c   :  { %v1400_v55 = vpop.xlane.xlu1 %1399 }
 0x77d   :  { %v1401_v56 = vsub.f32 %v4031_v47, %v1400_v55  ;;  %v1182_v47 = vsub.f32 %v4023_v34, %v1181_v23 }
 0x77e   :  { %711 = vrot.lane.b32.xlu1 %v3875_v57, %s3688_s1 }
 0x77f   :  { %601 = vrot.lane.b32.xlu0 %v3875_v57, %s3687_s24  ;;  %v1183_v8 = vmul.f32 1.442695, %v1182_v47 }
 0x780   :  { %v382_v62 = vpop.permute.xlu1 %381 }
 0x781   :  { %v387_v63 = vsel %vm274_vm4, %v382_v62, 0  ;;  %3607 = vpow2.f32 %v1183_v8 }
 0x782   :  { %3252 = vmatpush3.bf16.msra.mxu1 %v387_v63  ;;  %3609 = vpow2.f32 %v1292_v10 }
 0x783   :  { %3263 = vmatprep.subr.bf16.mxu1 %v3682_v41 }
 0x784   :  { %v1510_v0 = vpop.xlane.xlu0 %1509 }
 0x785   :  { %v1511_v1 = vsub.f32 %v4035_v53, %v1510_v0 }
 0x78b   :  { %v4099_v17 = vpop.eup %3607 }
 0x78c   :  { %v1620_v11 = vpop.xlane.xlu0 %1619  ;;  %v4104_v34 = vpop.eup %3609  ;;  %v1185_v19 = vsel %vm257_vm5, %v4099_v17, 0.0 }
 0x78d   :  { %v1294_v39 = vsel %vm257_vm5, %v4104_v34, 0.0  ;;  %v1621_v22 = vsub.f32 %v4039_v60, %v1620_v11  ;;  %v4127_v60 = vrot.slane %v3875_v57, 1 }
 0x78f   :  { %v1622_v24 = vmul.f32 1.442695, %v1621_v22 }
 0x794   :  { %v1730_v12 = vpop.xlane.xlu0 %1729 }
 0x795   :  { %v1731_v37 = vsub.f32 %v4045_v2, %v1730_v12 }
 0x797   :  { %v1732_v6 = vmul.f32 1.442695, %v1731_v37 }
 0x79c   :  { %v1840_v16 = vpop.xlane.xlu0 %1839 }
 0x79d   :  { %v1841_v53 = vsub.f32 %v4049_v9, %v1840_v16  ;;  %v1402_v9 = vmul.f32 1.442695, %v1401_v56 }
 0x79e   :  { %1036 = vadd.xlane.f32.xlu0 %v1035_v29 }
 0x79f   :  { %3611 = vpow2.f32 %v1402_v9 }
 0x7a0   :  { %3613 = vpow2.f32 %v1622_v24 }
 0x7a2   :  { %1295 = vadd.xlane.f32.xlu1 %v1294_v39  ;;  %1186 = vadd.xlane.f32.xlu0 %v1185_v19 }
 0x7a4   :  { %v1950_v20 = vpop.xlane.xlu0 %1949 }
 0x7a5   :  { %v1951_v21 = vsub.f32 %v4053_v15, %v1950_v20 }
 0x7a7   :  { %v1952_v2 = vmul.f32 1.442695, %v1951_v21 }
 0x7a8   :  { %v492_v31 = vpop.permute.xlu0 %491 }
 0x7a9   :  { %v4116_v25 = vpop.eup %3611  ;;  %v497_v8 = vsel %vm274_vm4, %v492_v31, 0 }
 0x7aa   :  { %v1404_v27 = vsel %vm257_vm5, %v4116_v25, 0.0  ;;  %v4120_v28 = vpop.eup %3613 }
 0x7ab   :  { %v1624_v15 = vsel %vm257_vm5, %v4120_v28, 0.0 }
 0x7b8   :  { %821 = vrot.lane.b32.xlu0 %v3875_v57, %s3689_s25 }
 0x7bc   :  { %931 = vrot.lane.b32.xlu0 %v3875_v57, %s3690_s2 }
 0x7da   :  { %v487_v55 = vpop.xlane.xlu1 %486 }
 0x7db   :  { %1405 = vadd.xlane.f32.xlu0 %v1404_v27 }
 0x7df   :  { %1625 = vadd.xlane.f32.xlu0 %v1624_v15 }
 0x7e2   :  { %v597_v56 = vpop.xlane.xlu1 %596 }
 0x7ea   :  { %v707_v58 = vpop.xlane.xlu1 %706 }
 0x7f2   :  { %v4124_v32 = vpop.xlane.xlu0 %816 }
 0x7f5   :  { %1300 = vrot.lane.b32.xlu0 %v4127_v60, %s3685_s4 }
 0x7f6   :  { %v370_v33 = vpop.xlane.xlu0 %369 }
 0x7f7   :  { %v371_v35 = vsub.f32 %v4001_v4, %v370_v33  ;;  %v1512_v4 = vmul.f32 1.442695, %v1511_v1 }
 0x7f9   :  { %v372_v61 = vmul.f32 1.442695, %v371_v35 }
 0x7fa   :  { %v927_v62 = vpop.xlane.xlu1 %926  ;;  %v602_v11 = vpop.permute.xlu0 %601 }
 0x7fb   :  { %3615 = vpow2.f32 %v372_v61 }
 0x7fc   :  { %3617 = vpow2.f32 %v1732_v6 }
 0x7fd   :  { %3619 = vpow2.f32 %v1512_v4 }
 0x7fe   :  { %3621 = vpow2.f32 %v1952_v2  ;;  %v712_v63 = vpop.permute.xlu1 %711  ;;  %v1196_v2 = vsel %vm274_vm4, %v4127_v60, 0 }
 0x7ff   :  { %v717_v21 = vsel %vm274_vm4, %v712_v63, 0 }
 0x805   :  { %v3616_v38 = vpop.eup %3615 }
 0x806   :  { %v374_v44 = vsel %vm257_vm5, %v3616_v38, 0.0  ;;  %v4134_v13 = vpop.eup %3617 }
 0x807   :  { %375 = vadd.xlane.f32.xlu1 %v374_v44  ;;  %v1734_v45 = vsel %vm257_vm5, %v4134_v13, 0.0  ;;  %v4142_v46 = vpop.eup %3619 }
 0x808   :  { %v1514_v49 = vsel %vm257_vm5, %v4142_v46, 0.0  ;;  %v4146_v18 = vpop.eup %3621 }
 0x809   :  { %v1954_v51 = vsel %vm257_vm5, %v4146_v18, 0.0 }
 0x814   :  { %1735 = vadd.xlane.f32.xlu0 %v1734_v45 }
 0x818   :  { %1041 = vrot.lane.b32.xlu1 %v3875_v57, %s3691_s26  ;;  %v1842_v57 = vmul.f32 1.442695, %v1841_v53  ;;  %v607_v53 = vsel %vm274_vm4, %v602_v11, 0 }
 0x81a   :  { %3623 = vpow2.f32 %v1842_v57 }
 0x824   :  { %v4154_v23 = vpop.eup %3623 }
 0x825   :  { %v1844_v54 = vsel %vm257_vm5, %v4154_v23, 0.0 }
 0x82a   :  { %1520 = vrot.lane.b32.xlu0 %v4127_v60, %s3687_s24 }
 0x82b   :  { %v1037_v29 = vpop.xlane.xlu0 %1036 }
 0x82f   :  { %v4164_v0 = vpop.xlane.xlu1 %1295  ;;  %v1187_v20 = vpop.xlane.xlu0 %1186 }
 0x83c   :  { %1515 = vadd.xlane.f32.xlu1 %v1514_v49 }
 0x849   :  { %1955 = vadd.xlane.f32.xlu0 %v1954_v51 }
 0x84d   :  { %1410 = vrot.lane.b32.xlu1 %v4127_v60, %s3686_s23 }
 0x85f   :  { %1960 = vrot.lane.b32.xlu0 %v4127_v60, %s3691_s26 }
 0x871   :  { %1845 = vadd.xlane.f32.xlu1 %v1844_v54 }
 0x882   :  { %1630 = vrot.lane.b32.xlu1 %v4127_v60, %s3688_s1 }
 0x886   :  { %1740 = vrot.lane.b32.xlu1 %v4127_v60, %s3689_s25  ;;  %s3699_s25 = smov [#allocation2]  }
 0x88a   :  { %1850 = vrot.lane.b32.xlu1 %v4127_v60, %s3690_s2  ;;  %s2994_s2 = sshll.u32 %s3699_s25, 4  ;;  %s2995_s2 = int_to_ptr.vmem [resolvable:$true] %s2994_s2 }
 0x88b   :  { %s3657_s26 = scalar_lea.vmem %s2995_s2, 32  ;;  %p3662_p1 = scmp.lt.s32.totalorder %s2995_s2, %s2995_s2 }
 0x88c   :  { %p3658_p0 = scmp.ne.s32.totalorder %s2995_s2, %s3657_s26  ;;  %p3663_p2 = scmp.lt.s32.totalorder %s3657_s26, %s3657_s26 }
 0x88e   :  { %p3664_p3 = por %p3663_p2, %p3662_p1 }
 0x890   :  { %p3665_p4 = pnand %p3664_p3, %p3658_p0 }
 0x894   :  { %v376_v1 = vpop.xlane.xlu1 %375 }
 0x895   :  { %3625 = vrcp.f32 %v376_v1 }
 0x896   :  { %3627 = vrcp.f32 %v487_v55 }
 0x897   :  { %3629 = vrcp.f32 %v597_v56 }
 0x898   :  { %3631 = vrcp.f32 %v707_v58 }
 0x899   :  { %3633 = vrcp.f32 %v4124_v32 }
 0x89a   :  { %3635 = vrcp.f32 %v927_v62 }
 0x89b   :  { %3637 = vrcp.f32 %v1037_v29 }
 0x89c   :  { %3639 = vrcp.f32 %v1187_v20 }
 0x89d   :  { %3641 = vrcp.f32 %v4164_v0 }
 0x89f   :  { %v3626_v3 = vpop.eup %3625 }
 0x8a0   :  { %v378_v47 = vmul.f32 %v3626_v3, %v3616_v38  ;;  %v3628_v7 = vpop.eup %3627 }
 0x8a1   :  { %v489_v10 = vmul.f32 %v3628_v7, %v4061_v30  ;;  %v3630_v16 = vpop.eup %3629 }
 0x8a2   :  { %v379_v5 = vpack.c.bf16 %v378_v47, %v378_v47  ;;  %v599_v39 = vmul.f32 %v3630_v16, %v4066_v36  ;;  %v3632_v19 = vpop.eup %3631  ;;  %v822_v36 = vpop.permute.xlu0 %821 }
 0x8a3   :  { %v490_v12 = vpack.c.bf16 %v489_v10, %v489_v10  ;;  %v709_v9 = vmul.f32 %v3632_v19, %v4071_v43  ;;  %v3634_v24 = vpop.eup %3633  ;;  %v827_v27 = vsel %vm274_vm4, %v822_v36, 0 }
 0x8a4   :  { %3254 = vmatmul.mubr.msk.bf16.vlgmr.msra.gmra.mrb[12].mxu1 %vm270_vm6, %v379_v5  ;;  %v600_v30 = vpack.c.bf16 %v599_v39, %v599_v39  ;;  %v819_v15 = vmul.f32 %v3634_v24, %v4076_v48  ;;  %v3636_v32 = vpop.eup %3635  ;;  %v1042_v48 = vpop.permute.xlu1 %1041 }
 0x8a5   :  { %3264 = vmatpush3.bf16.msra.mxu1 %v497_v8  ;;  %3265 = vmatprep.mubr.msk.bf16.mxu1 %vm3683_vm2, %v3682_v41  ;;  %v710_v22 = vpack.c.bf16 %v709_v9, %v709_v9  ;;  %v929_v35 = vmul.f32 %v3636_v32, %v4082_v50  ;;  %v3638_v37 = vpop.eup %3637  ;;  %v1047_v6 = vsel %vm274_vm4, %v1042_v48, 0 }
 0x8a6   :  { %3275 = vmatprep.subr.bf16.mxu1 %v3682_v41  ;;  %v932_v43 = vpop.permute.xlu0 %931  ;;  %v820_v31 = vpack.c.bf16 %v819_v15, %v819_v15  ;;  %v1039_v44 = vmul.f32 %v3638_v37, %v4097_v14  ;;  %v3640_v45 = vpop.eup %3639 }
 0x8a7   :  { %v937_v33 = vsel %vm274_vm4, %v932_v43, 0  ;;  %v930_v61 = vpack.c.bf16 %v929_v35, %v929_v35  ;;  %v1189_v49 = vmul.f32 %v3640_v45, %v4099_v17  ;;  %v3642_v57 = vpop.eup %3641 }
 0x8a8   :  { %v1040_v50 = vpack.c.bf16 %v1039_v44, %v1039_v44  ;;  %v1298_v60 = vmul.f32 %v3642_v57, %v4104_v34 }
 0x8a9   :  { %v1190_v51 = vpack.c.bf16 %v1189_v49, %v1189_v49 }
 0x8aa   :  { %v1406_v38 = vpop.xlane.xlu0 %1405  ;;  %v1299_v56 = vpack.c.bf16 %v1298_v60, %v1298_v60 }
 0x8ab   :  { %3643 = vrcp.f32 %v1406_v38 }
 0x8ac   :  { %3266 = vmatmul.mubr.msk.bf16.vlgmr.msra.gmra.mrb[16].mxu1 %vm270_vm6, %v490_v12 }
 0x8ad   :  { %3276 = vmatpush3.bf16.msra.mxu1 %v607_v53  ;;  %3277 = vmatprep.mubr.msk.bf16.mxu1 %vm3683_vm2, %v3682_v41 }
 0x8ae   :  { %3287 = vmatprep.subr.bf16.mxu1 %v3682_v41  ;;  %v1626_v4 = vpop.xlane.xlu0 %1625 }
 0x8b2   :  { %v1301_v14 = vpop.permute.xlu0 %1300 }
 0x8b3   :  { %v1306_v55 = vsel %vm274_vm4, %v1301_v14, 0 }
 0x8b4   :  { %3278 = vmatmul.mubr.msk.bf16.vlgmr.msra.gmra.mrb[20].mxu1 %vm270_vm6, %v600_v30 }
 0x8b5   :  { %3288 = vmatpush3.bf16.msra.mxu1 %v717_v21  ;;  %3289 = vmatprep.mubr.msk.bf16.mxu1 %vm3683_vm2, %v3682_v41  ;;  %v3644_v58 = vpop.eup %3643 }
 0x8b6   :  { %3299 = vmatprep.subr.bf16.mxu1 %v3682_v41  ;;  %v1736_v62 = vpop.xlane.xlu0 %1735  ;;  %v1408_v0 = vmul.f32 %v3644_v58, %v4116_v25 }
 0x8b8   :  { %v1409_v1 = vpack.c.bf16 %v1408_v0, %v1408_v0 }
 0x8ba   :  { %v1521_v34 = vpop.permute.xlu0 %1520 }
 0x8bb   :  { %v1526_v47 = vsel %vm274_vm4, %v1521_v34, 0 }
 0x8bc   :  { %3290 = vmatmul.mubr.msk.bf16.vlgmr.msra.gmra.mrb[24].mxu1 %vm270_vm6, %v710_v22 }
 0x8bd   :  { %3300 = vmatpush3.bf16.msra.mxu1 %v827_v27  ;;  %3301 = vmatprep.mubr.msk.bf16.mxu1 %vm3683_vm2, %v3682_v41 }
 0x8be   :  { %3311 = vmatprep.subr.bf16.mxu1 %v3682_v41 }
 0x8c4   :  { %3302 = vmatmul.mubr.msk.bf16.vlgmr.msra.gmra.mrb[28].mxu1 %vm270_vm6, %v820_v31 }
 0x8c5   :  { %3312 = vmatpush3.bf16.msra.mxu1 %v937_v33  ;;  %3313 = vmatprep.mubr.msk.bf16.mxu1 %vm3683_vm2, %v3682_v41 }
 0x8c6   :  { %3323 = vmatprep.subr.bf16.mxu1 %v3682_v41 }
 0x8c9   :  { %v1516_v54 = vpop.xlane.xlu1 %1515 }
 0x8ca   :  { %3645 = vrcp.f32 %v1516_v54 }
 0x8cb   :  { %3647 = vrcp.f32 %v1626_v4 }
 0x8cc   :  { %3314 = vmatmul.mubr.msk.bf16.vlgmr.msra.gmra.mrb[32].mxu1 %vm270_vm6, %v930_v61  ;;  %3649 = vrcp.f32 %v1736_v62 }
 0x8cd   :  { %3324 = vmatpush3.bf16.msra.mxu1 %v1047_v6  ;;  %3325 = vmatprep.mubr.msk.bf16.mxu1 %vm3683_vm2, %v3682_v41  ;;  %v1411_v17 = vpop.permute.xlu1 %1410 }
 0x8ce   :  { %3335 = vmatprep.subr.bf16.mxu1 %v3682_v41  ;;  %v1416_v63 = vsel %vm274_vm4, %v1411_v17, 0 }
 0x8d4   :  { %3326 = vmatmul.mubr.msk.bf16.vlgmr.msra.gmra.mrb[36].mxu1 %vm270_vm6, %v1040_v50  ;;  %v3646_v3 = vpop.eup %3645 }
 0x8d5   :  { %3336 = vmatpush3.bf16.msra.mxu1 %v1196_v2  ;;  %3337 = vmatprep.mubr.msk.bf16.mxu1 %vm3683_vm2, %v3682_v41  ;;  %v1518_v5 = vmul.f32 %v3646_v3, %v4142_v46  ;;  %v3648_v25 = vpop.eup %3647 }
 0x8d6   :  { %3347 = vmatprep.subr.bf16.mxu1 %v3682_v41  ;;  %v1628_v10 = vmul.f32 %v3648_v25, %v4120_v28  ;;  %v3650_v16 = vpop.eup %3649  ;;  %v1956_v39 = vpop.xlane.xlu0 %1955 }
 0x8d7   :  { %v1519_v7 = vpack.c.bf16 %v1518_v5, %v1518_v5  ;;  %v1738_v28 = vmul.f32 %v3650_v16, %v4134_v13 }
 0x8d8   :  { %v1629_v46 = vpack.c.bf16 %v1628_v10, %v1628_v10 }
 0x8d9   :  { %v1739_v19 = vpack.c.bf16 %v1738_v28, %v1738_v28 }
 0x8da   :  { %v1961_v13 = vpop.permute.xlu0 %1960 }
 0x8db   :  { %v1966_v24 = vsel %vm274_vm4, %v1961_v13, 0 }
 0x8dc   :  { %3338 = vmatmul.mubr.msk.bf16.vlgmr.msra.gmra.mrb[40].mxu1 %vm270_vm6, %v1190_v51 }
 0x8dd   :  { %3348 = vmatpush3.bf16.msra.mxu1 %v1306_v55  ;;  %3349 = vmatprep.mubr.msk.bf16.mxu1 %vm3683_vm2, %v3682_v41 }
 0x8de   :  { %3359 = vmatprep.subr.bf16.mxu1 %v3682_v41 }
 0x8e4   :  { %3350 = vmatmul.mubr.msk.bf16.vlgmr.msra.gmra.mrb[44].mxu1 %vm270_vm6, %v1299_v56 }
 0x8e5   :  { %3360 = vmatpush3.bf16.msra.mxu1 %v1416_v63  ;;  %3361 = vmatprep.mubr.msk.bf16.mxu1 %vm3683_vm2, %v3682_v41 }
 0x8e6   :  { %3371 = vmatprep.subr.bf16.mxu1 %v3682_v41 }
 0x8ec   :  { %3362 = vmatmul.mubr.msk.bf16.vlgmr.msra.gmra.mrb[48].mxu1 %vm270_vm6, %v1409_v1 }
 0x8ed   :  { %3372 = vmatpush3.bf16.msra.mxu1 %v1526_v47  ;;  %3373 = vmatprep.mubr.msk.bf16.mxu1 %vm3683_vm2, %v3682_v41 }
 0x8ee   :  { %3383 = vmatprep.subr.bf16.mxu1 %v3682_v41 }
 0x8f4   :  { %3374 = vmatmul.mubr.msk.bf16.vlgmr.msra.gmra.mrb[52].mxu1 %vm270_vm6, %v1519_v7 }
 0x8f5   :  { %3385 = vmatprep.mubr.msk.bf16.mxu1 %vm3683_vm2, %v3682_v41 }
 0x8fe   :  { %v1846_v8 = vpop.xlane.xlu1 %1845 }
 0x8ff   :  { %3651 = vrcp.f32 %v1846_v8 }
 0x900   :  { %3653 = vrcp.f32 %v1956_v39 }
 0x902   :  { %v1631_v11 = vpop.permute.xlu1 %1630 }
 0x903   :  { %v1636_v12 = vsel %vm274_vm4, %v1631_v11, 0 }
 0x904   :  { %3384 = vmatpush3.bf16.msra.mxu1 %v1636_v12 }
 0x905   :  { %3395 = vmatprep.subr.bf16.mxu1 %v3682_v41 }
 0x906   :  { %v1741_v53 = vpop.permute.xlu1 %1740 }
 0x907   :  { %v1746_v29 = vsel %vm274_vm4, %v1741_v53, 0  ;;  %3386 = vmatmul.mubr.msk.bf16.vlgmr.msra.gmra.mrb[56].mxu1 %vm270_vm6, %v1629_v46 }
 0x908   :  { %3396 = vmatpush3.bf16.msra.mxu1 %v1746_v29  ;;  %3397 = vmatprep.mubr.msk.bf16.mxu1 %vm3683_vm2, %v3682_v41 }
 0x909   :  { %3407 = vmatprep.subr.bf16.mxu1 %v3682_v41  ;;  %v3652_v20 = vpop.eup %3651 }
 0x90a   :  { %v1851_v30 = vpop.permute.xlu1 %1850  ;;  %v1848_v9 = vmul.f32 %v3652_v20, %v4154_v23  ;;  %v3654_v22 = vpop.eup %3653 }
 0x90b   :  { %v1856_v21 = vsel %vm274_vm4, %v1851_v30, 0  ;;  %v1958_v27 = vmul.f32 %v3654_v22, %v4146_v18 }
 0x90c   :  { %v1849_v36 = vpack.c.bf16 %v1848_v9, %v1848_v9 }
 0x90d   :  { %v1959_v15 = vpack.c.bf16 %v1958_v27, %v1958_v27 }
 0x90f   :  { %3398 = vmatmul.mubr.msk.bf16.vlgmr.msra.gmra.mrb[60].mxu1 %vm270_vm6, %v1739_v19 }
 0x910   :  { %3408 = vmatpush3.bf16.msra.mxu1 %v1856_v21  ;;  %3409 = vmatprep.mubr.msk.bf16.mxu1 %vm3683_vm2, %v3682_v41 }
 0x911   :  { %3419 = vmatprep.subr.bf16.mxu1 %v3682_v41 }
 0x917   :  { %3410 = vmatmul.mubr.msk.bf16.vlgmr.msra.gmra.mrb[64].mxu1 %vm270_vm6, %v1849_v36  ;;  %v3503_v36 = vld [vmem:[%s4542_s5] sm:$0xff]  }
 0x918   :  { %3420 = vmatpush3.bf16.msra.mxu1 %v1966_v24  ;;  %3421 = vmatprep.mubr.msk.bf16.mxu1 %vm3683_vm2, %v3682_v41 }
 0x919   :  { %3426 = vmatpush3.bf16.msra.mxu0 %v3503_v36 }
 0x91a   :  { %3427 = vmatprep.subr.bf16.mxu0 %v3682_v41 }
 0x91f   :  { %3422 = vmatmul.mubr.msk.bf16.vlgmr.msra.gmra.mrb[68].mxu1 %vm270_vm6, %v1959_v15  ;;  %v3504_v15 = vld [vmem:[%s4542_s5 + $0x8] sm:$0xff]  }
 0x920   :  { %2289 = vmatprep.mubr.bf16.mxu1 %v3681_v26  ;;  %3428 = vmatpush3.bf16.msra.mxu0 %v3504_v15 }
 0x921   :  { %3429 = vmatprep.subr.bf16.mxu0 %v3682_v41 }
 0x977   :  { %v423_v23 = vpop.f32.mrb[12].mxu1 }
 0x978   :  { %v3255_v43 = vpop.f32.mrb[13].mxu1 }
 0x979   :  { %v426_v31 = vpop.f32.mrb[14].mxu1 }
 0x97a   :  { %v3256_v32 = vpop.f32.mrb[15].mxu1  ;;  %v3505_v31 = vld [vmem:[%s4542_s5 + $0x10] sm:$0xff]  }
 0x97b   :  { %3430 = vmatpush3.bf16.msra.mxu0 %v3505_v31 }
 0x97c   :  { %3431 = vmatprep.subr.bf16.mxu0 %v3682_v41  ;;  %v3512_v41 = vld [vmem:[%s4544_s7 + $0x8c] ss:$16 sps:$4 sm:$0xff]  }
 0x97f   :  { %v533_v33 = vpop.f32.mrb[16].mxu1 }
 0x980   :  { %v3267_v35 = vpop.f32.mrb[17].mxu1 }
 0x981   :  { %v536_v48 = vpop.f32.mrb[18].mxu1 }
 0x982   :  { %v3268_v61 = vpop.f32.mrb[19].mxu1 }
 0x983   :  { %v3506_v61 = vld [vmem:[%s4542_s5 + $0x18] sm:$0xff]  }
 0x984   :  { %3432 = vmatpush3.bf16.msra.mxu0 %v3506_v61  ;;  %v3527_v61 = vld [vmem:[%s4544_s7 + $0xe4] ss:$16 sps:$4 sm:$0xff]  }
 0x985   :  { %2298 = vmatprep.subr.bf16.mxu0 %v3512_v41  ;;  %v3045_v41 = vld [vmem:[%s4543_s6] ss:$0 sm:$0xff] }
 0x987   :  { %v643_v37 = vpop.f32.mrb[20].mxu1 }
 0x988   :  { %v3279_v6 = vpop.f32.mrb[21].mxu1 }
 0x989   :  { %v646_v38 = vpop.f32.mrb[22].mxu1  ;;  %v3507_v6 = vld [vmem:[%s4544_s7 + $0x80] ss:$16 sps:$4 sm:$0xff]  }
 0x98a   :  { %v3280_v44 = vpop.f32.mrb[23].mxu1  ;;  %v3509_v38 = vld [vmem:[%s4544_s7 + $0x84] ss:$16 sps:$4 sm:$0xff]  }
 0x98b   :  { %2257 = vmatprep.subr.bf16.mxu1 %v3509_v38  ;;  %v3528_v38 = vld [vmem:[%s4544_s7 + $0xe8] ss:$16 sps:$4 sm:$0xff]  }
 0x98c   :  { %2258 = vmatpush1.bf16.msra.mxu1 %v3507_v6  ;;  %v3525_v6 = vld [vmem:[%s4544_s7 + $0xe0] ss:$16 sps:$4 sm:$0xff]  }
 0x98f   :  { %v753_v50 = vpop.f32.mrb[24].mxu1 }
 0x990   :  { %v3291_v45 = vpop.f32.mrb[25].mxu1 }
 0x991   :  { %v756_v18 = vpop.f32.mrb[26].mxu1 }
 0x992   :  { %v3292_v4 = vpop.f32.mrb[27].mxu1  ;;  %v3515_v18 = vld [vmem:[%s4544_s7 + $0xa4] ss:$16 sps:$4 sm:$0xff]  }
 0x993   :  { %2259 = vmatprep.subr.bf16.mxu1 %v3515_v18 }
 0x997   :  { %v863_v2 = vpop.f32.mrb[28].mxu1 }
 0x998   :  { %v3303_v49 = vpop.f32.mrb[29].mxu1 }
 0x999   :  { %v866_v14 = vpop.f32.mrb[30].mxu1  ;;  %v3521_v49 = vld [vmem:[%s4544_s7 + $0xc4] ss:$16 sps:$4 sm:$0xff]  }
 0x99a   :  { %v3304_v51 = vpop.f32.mrb[31].mxu1  ;;  %v3519_v14 = vld [vmem:[%s4544_s7 + $0xc0] ss:$16 sps:$4 sm:$0xff]  }
 0x99f   :  { %v973_v57 = vpop.f32.mrb[32].mxu1 }
 0x9a0   :  { %v3315_v54 = vpop.f32.mrb[33].mxu1 }
 0x9a1   :  { %v976_v55 = vpop.f32.mrb[34].mxu1 }
 0x9a2   :  { %v3316_v60 = vpop.f32.mrb[35].mxu1 }
 0x9a7   :  { %v4254_v17 = vpop.f32.mrb[36].mxu1 }
 0x9a8   :  { %v3327_v56 = vpop.f32.mrb[37].mxu1 }
 0x9a9   :  { %v1086_v58 = vpop.f32.mrb[38].mxu1 }
 0x9aa   :  { %v3328_v62 = vpop.f32.mrb[39].mxu1 }
 0x9af   :  { %v4256_v63 = vpop.f32.mrb[40].mxu1 }
 0x9b0   :  { %v3339_v0 = vpop.f32.mrb[41].mxu1 }
 0x9b1   :  { %v1235_v34 = vpop.f32.mrb[42].mxu1 }
 0x9b2   :  { %v3340_v1 = vpop.f32.mrb[43].mxu1 }
 0x9b7   :  { %v1342_v3 = vpop.f32.mrb[44].mxu1 }
 0x9b8   :  { %v3456_v47 = vpack.i.bf16 %v423_v23, %v1342_v3  ;;  %v3351_v5 = vpop.f32.mrb[45].mxu1 }
 0x9b9   :  { %v1345_v7 = vpop.f32.mrb[46].mxu1 }
 0x9ba   :  { %3457 = vrot.lane.b32.xlu1 %v3456_v47, %s3698_s18  ;;  %v3352_v25 = vpop.f32.mrb[47].mxu1 }
 0x9bf   :  { %v1452_v8 = vpop.f32.mrb[48].mxu1 }
 0x9c0   :  { %v3461_v10 = vpack.i.bf16 %v533_v33, %v1452_v8  ;;  %v3363_v11 = vpop.f32.mrb[49].mxu1 }
 0x9c1   :  { %v1455_v12 = vpop.f32.mrb[50].mxu1 }
 0x9c2   :  { %3462 = vrot.lane.b32.xlu1 %v3461_v10, %s3697_s17  ;;  %v3364_v46 = vpop.f32.mrb[51].mxu1 }
 0x9c7   :  { %v1562_v16 = vpop.f32.mrb[52].mxu1 }
 0x9c8   :  { %v3466_v53 = vpack.i.bf16 %v643_v37, %v1562_v16  ;;  %v3375_v29 = vpop.f32.mrb[53].mxu1 }
 0x9c9   :  { %v1565_v28 = vpop.f32.mrb[54].mxu1 }
 0x9ca   :  { %3467 = vrot.lane.b32.xlu1 %v3466_v53, %s3696_s16  ;;  %v3376_v39 = vpop.f32.mrb[55].mxu1 }
 0x9da   :  { %v1672_v30 = vpop.f32.mrb[56].mxu1 }
 0x9db   :  { %v3471_v19 = vpack.i.bf16 %v753_v50, %v1672_v30  ;;  %v3387_v20 = vpop.f32.mrb[57].mxu1 }
 0x9dc   :  { %v1675_v21 = vpop.f32.mrb[58].mxu1 }
 0x9dd   :  { %3472 = vrot.lane.b32.xlu1 %v3471_v19, %s3695_s30  ;;  %v3388_v9 = vpop.f32.mrb[59].mxu1 }
 0x9e2   :  { %v1782_v13 = vpop.f32.mrb[60].mxu1 }
 0x9e3   :  { %v3476_v22 = vpack.i.bf16 %v863_v2, %v1782_v13  ;;  %v3399_v24 = vpop.f32.mrb[61].mxu1  ;;  %v3513_v2 = vld [vmem:[%s4544_s7 + $0xa0] ss:$16 sps:$4 sm:$0xff]  }
 0x9e4   :  { %v1785_v27 = vpop.f32.mrb[62].mxu1  ;;  %2260 = vmatpush1.bf16.msra.mxu1 %v3513_v2 }
 0x9e5   :  { %3477 = vrot.lane.b32.xlu1 %v3476_v22, %s3694_s29  ;;  %v3400_v23 = vpop.f32.mrb[63].mxu1  ;;  %2261 = vmatprep.subr.bf16.mxu1 %v3521_v49 }
 0x9e8   :  { %2262 = vmatpush1.bf16.msra.mxu1 %v3519_v14 }
 0x9e9   :  { %2263 = vmatprep.subr.bf16.mxu1 %v3527_v61 }
 0x9ea   :  { %v1892_v43 = vpop.f32.mrb[64].mxu1 }
 0x9eb   :  { %v3481_v32 = vpack.i.bf16 %v973_v57, %v1892_v43  ;;  %v3411_v33 = vpop.f32.mrb[65].mxu1  ;;  %v3510_v43 = vld [vmem:[%s4544_s7 + $0x88] ss:$16 sps:$4 sm:$0xff]  }
 0x9ec   :  { %v1895_v35 = vpop.f32.mrb[66].mxu1  ;;  %v3516_v33 = vld [vmem:[%s4544_s7 + $0xa8] ss:$16 sps:$4 sm:$0xff]   ;;  %2264 = vmatpush1.bf16.msra.mxu1 %v3525_v6 }
 0x9ed   :  { %3482 = vrot.lane.b32.xlu1 %v3481_v32, %s3693_s28  ;;  %v3412_v48 = vpop.f32.mrb[67].mxu1  ;;  %v3518_v32 = vld [vmem:[%s4544_s7 + $0xac] ss:$16 sps:$4 sm:$0xff]  }
 0x9ee   :  { %v3524_v35 = vld [vmem:[%s4544_s7 + $0xcc] ss:$16 sps:$4 sm:$0xff]   ;;  %v3522_v48 = vld [vmem:[%s4544_s7 + $0xc8] ss:$16 sps:$4 sm:$0xff]  }
 0x9f2   :  { %v2002_v37 = vpop.f32.mrb[68].mxu1 }
 0x9f3   :  { %v3486_v44 = vpack.i.bf16 %v4254_v17, %v2002_v37  ;;  %v3423_v50 = vpop.f32.mrb[69].mxu1  ;;  %v3530_v37 = vld [vmem:[%s4544_s7 + $0xec] ss:$16 sps:$4 sm:$0xff]  }
 0x9f4   :  { %v2005_v45 = vpop.f32.mrb[70].mxu1  ;;  %v3536_v50 = vld [vmem:[%s4544_s7 + $0xc] ss:$16 sps:$4 sm:$0xff]  }
 0x9f5   :  { %3487 = vrot.lane.b32.xlu0 %v3486_v44, %s3692_s27  ;;  %v3424_v4 = vpop.f32.mrb[71].mxu1  ;;  %v3533_v44 = vld [vmem:[%s4544_s7 + $0x4] ss:$16 sps:$4 sm:$0xff]  }
 0x9f6   :  { %2422 = vmatprep.subr.bf16.mxu1 %v3533_v44 }
 0xa2c   :  { %v3458_v51 = vpop.permute.xlu1 %3457 }
 0xa2d   :  { %v3460_v17 = vunpack.i.h.bf16 %v3458_v51  ;;  %v3459_v56 = vunpack.i.l.bf16 %v3458_v51  ;;  %v3531_v51 = vld [vmem:[%s4544_s7] ss:$16 sps:$4 sm:$0xff]  }
 0xa2f   :  { %v1117_v5 = vsel %vm210_vm3, %v3995_v59, %v3460_v17  ;;  %v2036_v7 = vsel %vm210_vm3, %v4256_v63, %v3459_v56  ;;  %v3537_v17 = vld [vmem:[%s4544_s7 + $0x20] ss:$16 sps:$4 sm:$0xff]   ;;  %v3540_v56 = vld [vmem:[%s4544_s7 + $0x28] ss:$16 sps:$4 sm:$0xff]  }
 0xa34   :  { %v3463_v57 = vpop.permute.xlu1 %3462 }
 0xa35   :  { %v3465_v58 = vunpack.i.h.bf16 %v3463_v57  ;;  %v3464_v62 = vunpack.i.l.bf16 %v3463_v57  ;;  %v3534_v57 = vld [vmem:[%s4544_s7 + $0x8] ss:$16 sps:$4 sm:$0xff]  }
 0xa37   :  { %v1119_v10 = vsel %vm1118_vm7, %v1117_v5, %v3465_v58  ;;  %v2037_v11 = vsel %vm1118_vm7, %v2036_v7, %v3464_v62  ;;  %v3545_v58 = vld [vmem:[%s4544_s7 + $0x44] ss:$16 sps:$4 sm:$0xff]   ;;  %v3548_v62 = vld [vmem:[%s4544_s7 + $0x4c] ss:$16 sps:$4 sm:$0xff]  }
 0xa38   :  { %v3555_v5 = vld [vmem:[%s4550_s13 + $0x40] sm:$0xff]  }
 0xa39   :  { %v3556_v7 = vld [vmem:[%s4550_s13 + $0xc0] sm:$0xff]  }
 0xa3c   :  { %v3468_v54 = vpop.permute.xlu1 %3467 }
 0xa3d   :  { %v3470_v0 = vunpack.i.h.bf16 %v3468_v54  ;;  %v3469_v34 = vunpack.i.l.bf16 %v3468_v54 }
 0xa3f   :  { %v1121_v16 = vsel %vm1120_vm8, %v1119_v10, %v3470_v0  ;;  %v2038_v53 = vsel %vm1120_vm8, %v2037_v11, %v3469_v34  ;;  %v3543_v0 = vld [vmem:[%s4544_s7 + $0x40] ss:$16 sps:$4 sm:$0xff]   ;;  %v3546_v34 = vld [vmem:[%s4544_s7 + $0x48] ss:$16 sps:$4 sm:$0xff]  }
 0xa40   :  { %v3559_v10 = vld [vmem:[%s4550_s13 + $0x48] sm:$0xff]  }
 0xa41   :  { %v3560_v11 = vld [vmem:[%s4550_s13 + $0xc8] sm:$0xff]  }
 0xa4f   :  { %v3473_v55 = vpop.permute.xlu1 %3472 }
 0xa50   :  { %v3475_v3 = vunpack.i.h.bf16 %v3473_v55  ;;  %v3474_v47 = vunpack.i.l.bf16 %v3473_v55  ;;  %v3539_v55 = vld [vmem:[%s4544_s7 + $0x24] ss:$16 sps:$4 sm:$0xff]  }
 0xa52   :  { %v1123_v29 = vsel %vm1122_vm9, %v1121_v16, %v3475_v3  ;;  %v2039_v28 = vsel %vm1122_vm9, %v2038_v53, %v3474_v47  ;;  %v3549_v3 = vld [vmem:[%s4544_s7 + $0x60] ss:$16 sps:$4 sm:$0xff]   ;;  %v3552_v47 = vld [vmem:[%s4544_s7 + $0x68] ss:$16 sps:$4 sm:$0xff]  }
 0xa53   :  { %v3563_v16 = vld [vmem:[%s4550_s13 + $0x50] sm:$0xff]  }
 0xa54   :  { %v3564_v53 = vld [vmem:[%s4550_s13 + $0xd0] sm:$0xff]  }
 0xa57   :  { %v3478_v60 = vpop.permute.xlu1 %3477 }
 0xa58   :  { %v3480_v25 = vunpack.i.h.bf16 %v3478_v60  ;;  %v3479_v8 = vunpack.i.l.bf16 %v3478_v60  ;;  %v3542_v60 = vld [vmem:[%s4544_s7 + $0x2c] ss:$16 sps:$4 sm:$0xff]  }
 0xa5a   :  { %v1125_v39 = vsel %vm1124_vm10, %v1123_v29, %v3480_v25  ;;  %v2040_v63 = vsel %vm1124_vm10, %v2039_v28, %v3479_v8  ;;  %v3557_v25 = vld [vmem:[%s4550_s13] sm:$0xff]   ;;  %v3565_v29 = vld [vmem:[%s4550_s13 + $0x10] sm:$0xff]  }
 0xa5b   :  { %v3558_v8 = vld [vmem:[%s4550_s13 + $0x80] sm:$0xff]   ;;  %v3566_v28 = vld [vmem:[%s4550_s13 + $0x90] sm:$0xff]  }
 0xa5f   :  { %v3483_v1 = vpop.permute.xlu1 %3482 }
 0xa60   :  { %v3485_v12 = vunpack.i.h.bf16 %v3483_v1  ;;  %v3484_v46 = vunpack.i.l.bf16 %v3483_v1  ;;  %v3551_v1 = vld [vmem:[%s4544_s7 + $0x64] ss:$16 sps:$4 sm:$0xff]  }
 0xa62   :  { %v1127_v20 = vsel %vm1126_vm11, %v1125_v39, %v3485_v12  ;;  %v2041_v21 = vsel %vm1126_vm11, %v2040_v63, %v3484_v46  ;;  %v3561_v12 = vld [vmem:[%s4550_s13 + $0x8] sm:$0xff]   ;;  %v3568_v39 = vld [vmem:[%s4550_s13 + $0xd8] sm:$0xff]  }
 0xa63   :  { %v3562_v46 = vld [vmem:[%s4550_s13 + $0x88] sm:$0xff]   ;;  %v3569_v63 = vld [vmem:[%s4550_s13 + $0x18] sm:$0xff]  }
 0xa67   :  { %v3488_v59 = vpop.permute.xlu0 %3487 }
 0xa68   :  { %v3490_v30 = vunpack.i.h.bf16 %v3488_v59  ;;  %v3489_v19 = vunpack.i.l.bf16 %v3488_v59  ;;  %v3567_v59 = vld [vmem:[%s4550_s13 + $0x58] sm:$0xff]  }
 0xa6a   :  { %v1129_v9 = vsel %vm1128_vm12, %v1127_v20, %v3490_v30  ;;  %v2042_v13 = vsel %vm1128_vm12, %v2041_v21, %v3489_v19  ;;  %v3570_v30 = vld [vmem:[%s4550_s13 + $0x98] sm:$0xff]   ;;  %v3571_v19 = vld [vmem:[%s4550_s13 + $0x60] sm:$0xff]  }
 0xa6b   :  { %v2044_v36 = vrot.slane %v2042_v13, 7  ;;  %v2047_v22 = vrot.slane %v1129_v9, 7  ;;  %v2049_v24 = vrot.slane %v2042_v13, 6  ;;  %v3572_v20 = vld [vmem:[%s4550_s13 + $0xe0] sm:$0xff]   ;;  %v3575_v13 = vld [vmem:[%s4550_s13 + $0x68] sm:$0xff]  }
 0xa6c   :  { %v3573_v21 = vld [vmem:[%s4550_s13 + $0x20] sm:$0xff]  }
 0xa6d   :  { %v2051_v27 = vsel %vm274_vm4, %v1129_v9, %v2044_v36  ;;  %v3574_v9 = vld [vmem:[%s4550_s13 + $0xa0] sm:$0xff]   ;;  %v3576_v36 = vld [vmem:[%s4550_s13 + $0xe8] sm:$0xff]  }
 0xa6e   :  { %v2053_v15 = vsel %vm2052_vm13, %v2051_v27, %v2047_v22  ;;  %v3577_v22 = vld [vmem:[%s4550_s13 + $0x28] sm:$0xff]   ;;  %v3579_v27 = vld [vmem:[%s4550_s13 + $0x70] sm:$0xff]  }
 0xa6f   :  { %v2055_v23 = vsel %vm2054_vm14, %v2053_v15, %v2049_v24  ;;  %v3578_v24 = vld [vmem:[%s4550_s13 + $0xa8] sm:$0xff]   ;;  %v3580_v15 = vld [vmem:[%s4550_s13 + $0xf0] sm:$0xff]  }
 0xa70   :  { %v2056_v31 = vpack.c.bf16 %v2055_v23, %v2055_v23  ;;  %v3581_v23 = vld [vmem:[%s4550_s13 + $0x30] sm:$0xff]  }
 0xa72   :  { %3434 = vmatmul.mubr.msk.bf16.vlgmr.msra.gmra.mrb[60].mxu0 %vm160_vm1, %v2056_v31  ;;  %v3583_v31 = vld [vmem:[%s4550_s13 + $0x78] sm:$0xff]  }
 0xa73   :  { %2299 = vmatpush1.bf16.msra.mxu0 %v3510_v43  ;;  %2330 = vmatprep.mubr.bf16.mxu0 %v3681_v26  ;;  %v3582_v43 = vld [vmem:[%s4550_s13 + $0xb0] sm:$0xff]  }
 0xa74   :  { %2300 = vmatprep.subr.bf16.mxu0 %v3518_v32  ;;  %v3584_v32 = vld [vmem:[%s4550_s13 + $0xf8] sm:$0xff]  }
 0xa77   :  { %2301 = vmatpush1.bf16.msra.mxu0 %v3516_v33  ;;  %v3585_v33 = vld [vmem:[%s4550_s13 + $0x38] sm:$0xff]  }
 0xa78   :  { %2302 = vmatprep.subr.bf16.mxu0 %v3524_v35  ;;  %v3586_v35 = vld [vmem:[%s4550_s13 + $0xb8] sm:$0xff]  }
 0xa7b   :  { %2303 = vmatpush1.bf16.msra.mxu0 %v3522_v48  ;;  %v2556_v48 = vld [vmem:[%s4549_s12] sm:$0xf] }
 0xa7c   :  { %2304 = vmatprep.subr.bf16.mxu0 %v3530_v37 }
 0xa7f   :  { %2305 = vmatpush1.bf16.msra.mxu0 %v3528_v38 }
 0xa80   :  { %2463 = vmatprep.subr.bf16.mxu0 %v3536_v50 }
 0xb45   :  { %v2133_v45 = vpop.f32.mrb[60].mxu0 }
 0xb46   :  { %v2134_v18 = vadd.f32 %v3045_v41, %v2133_v45  ;;  %v3435_v4 = vpop.f32.mrb[61].mxu0  ;;  %v2557_v41 = vadd.f32 1e-05, %v2556_v48 }
 0xb47   :  { %v2136_v2 = vpop.f32.mrb[62].mxu0  ;;  %v2516_v4 = vsub.s32 2, %v3819_v40 }
 0xb48   :  { %v2139_v49 = vpack.c.bf16 %v2134_v18, %v2134_v18  ;;  %v3436_v14 = vpop.f32.mrb[63].mxu0  ;;  %3655 = vrsqrt.f32 %v2557_v41  ;;  %v2504_v2 = vld [vmem:[%s4545_s8] sm:$0xf] }
 0xb49   :  { %v2530_v14 = vld [vmem:[%s4548_s11] sm:$0xf] }
 0xb4a   :  { %v2173_v54 = vrot.slane %v2139_v49, 1 }
 0xb4c   :  { %3067 = vmatmul.mubr.msk.bf16.vlgmr.msra.gmra.mrb[72].mxu1 %vm160_vm1, %v2173_v54  ;;  %3068 = vmatmul.mubr.msk.bf16.vlgmr.msra.gmra.mrb[64].mxu0 %vm160_vm1, %v2173_v54 }
 0xb4d   :  { %2423 = vmatpush1.bf16.msra.mxu1 %v3531_v51  ;;  %2464 = vmatpush1.bf16.msra.mxu0 %v3534_v57  ;;  %v2509_v51 = vrot.slane %v2504_v2, %v3824_v42  ;;  %v2517_v57 = vrot.slane %v2504_v2, %v2516_v4 }
 0xb4e   :  { %2424 = vmatprep.subr.bf16.mxu1 %v3539_v55  ;;  %2465 = vmatprep.subr.bf16.mxu0 %v3542_v60 }
 0xb4f   :  { %2454 = vmatprep.mubr.bf16.mxu1 %v3681_v26  ;;  %2495 = vmatprep.mubr.bf16.mxu0 %v3681_v26  ;;  %v3554_v26 = vld [vmem:[%s4544_s7 + $0x6c] ss:$16 sps:$4 sm:$0xff]  }
 0xb51   :  { %2425 = vmatpush1.bf16.msra.mxu1 %v3537_v17  ;;  %2466 = vmatpush1.bf16.msra.mxu0 %v3540_v56  ;;  %v2513_v17 = vrot.slane %v2504_v2, %v3870_v52 }
 0xb52   :  { %2426 = vmatprep.subr.bf16.mxu1 %v3545_v58  ;;  %2467 = vmatprep.subr.bf16.mxu0 %v3548_v62  ;;  %v3656_v54 = vpop.eup %3655  ;;  %v2535_v62 = vrot.slane %v2530_v14, %v3824_v42 }
 0xb55   :  { %2427 = vmatpush1.bf16.msra.mxu1 %v3543_v0  ;;  %2468 = vmatpush1.bf16.msra.mxu0 %v3546_v34  ;;  %v2543_v34 = vrot.slane %v2530_v14, %v2516_v4 }
 0xb56   :  { %2428 = vmatprep.subr.bf16.mxu1 %v3551_v1  ;;  %2469 = vmatprep.subr.bf16.mxu0 %v3554_v26  ;;  %v2584_v26 = vld [vmem:[%s4546_s9] sm:$0xf] }
 0xb59   :  { %2429 = vmatpush1.bf16.msra.mxu1 %v3549_v3  ;;  %2470 = vmatpush1.bf16.msra.mxu0 %v3552_v47  ;;  %v2539_v47 = vrot.slane %v2530_v14, %v3870_v52 }
 0xb5a   :  { %3189 = vmatprep.subr.bf16.mxu1 %v3555_v5  ;;  %3211 = vmatprep.subr.bf16.mxu0 %v3556_v7 }
 0xb5c   :  { %3085 = vmatmul.mubr.msk.bf16.vlgmr.msra.gmra.mrb[76].mxu1 %vm160_vm1, %v2139_v49  ;;  %3086 = vmatmul.mubr.msk.bf16.vlgmr.msra.gmra.mrb[68].mxu0 %vm160_vm1, %v2139_v49  ;;  %v2520_v49 = vsub.s32 3, %v3819_v40 }
 0xb5d   :  { %3190 = vmatpush3.bf16.msra.mxu1 %v3557_v25  ;;  %3212 = vmatpush3.bf16.msra.mxu0 %v3558_v8 }
 0xb5e   :  { %3191 = vmatprep.subr.bf16.mxu1 %v3559_v10  ;;  %3213 = vmatprep.subr.bf16.mxu0 %v3560_v11  ;;  %v2521_v56 = vrot.slane %v2504_v2, %v2520_v49  ;;  %v2547_v7 = vrot.slane %v2530_v14, %v2520_v49  ;;  %v2563_v11 = vrot.slane %v3656_v54, %v3824_v42 }
 0xb61   :  { %3192 = vmatpush3.bf16.msra.mxu1 %v3561_v12  ;;  %3214 = vmatpush3.bf16.msra.mxu0 %v3562_v46  ;;  %v2571_v46 = vrot.slane %v3656_v54, %v2516_v4 }
 0xb62   :  { %3193 = vmatprep.subr.bf16.mxu1 %v3563_v16  ;;  %3215 = vmatprep.subr.bf16.mxu0 %v3564_v53 }
 0xb65   :  { %3194 = vmatpush3.bf16.msra.mxu1 %v3565_v29  ;;  %3216 = vmatpush3.bf16.msra.mxu0 %v3566_v28  ;;  %v2567_v28 = vrot.slane %v3656_v54, %v3870_v52 }
 0xb66   :  { %3195 = vmatprep.subr.bf16.mxu1 %v3567_v59  ;;  %3217 = vmatprep.subr.bf16.mxu0 %v3568_v39  ;;  %v2575_v39 = vrot.slane %v3656_v54, %v2520_v49 }
 0xb69   :  { %3196 = vmatpush3.bf16.msra.mxu1 %v3569_v63  ;;  %3218 = vmatpush3.bf16.msra.mxu0 %v3570_v30  ;;  %v2610_v63 = vld [vmem:[%s4547_s10] sm:$0xf] }
 0xb6a   :  { %3197 = vmatprep.subr.bf16.mxu1 %v3571_v19  ;;  %3219 = vmatprep.subr.bf16.mxu0 %v3572_v20  ;;  %v2589_v19 = vrot.slane %v2584_v26, %v3824_v42 }
 0xb6d   :  { %3198 = vmatpush3.bf16.msra.mxu1 %v3573_v21  ;;  %3220 = vmatpush3.bf16.msra.mxu0 %v3574_v9  ;;  %v2597_v21 = vrot.slane %v2584_v26, %v2516_v4 }
 0xb6e   :  { %3199 = vmatprep.subr.bf16.mxu1 %v3575_v13  ;;  %3221 = vmatprep.subr.bf16.mxu0 %v3576_v36  ;;  %v2593_v36 = vrot.slane %v2584_v26, %v3870_v52 }
 0xb71   :  { %3200 = vmatpush3.bf16.msra.mxu1 %v3577_v22  ;;  %3222 = vmatpush3.bf16.msra.mxu0 %v3578_v24  ;;  %v2601_v22 = vrot.slane %v2584_v26, %v2520_v49 }
 0xb72   :  { %3201 = vmatprep.subr.bf16.mxu1 %v3579_v27  ;;  %3223 = vmatprep.subr.bf16.mxu0 %v3580_v15  ;;  %v2615_v15 = vrot.slane %v2610_v63, %v3824_v42 }
 0xb75   :  { %3202 = vmatpush3.bf16.msra.mxu1 %v3581_v23  ;;  %3224 = vmatpush3.bf16.msra.mxu0 %v3582_v43  ;;  %v2623_v23 = vrot.slane %v2610_v63, %v2516_v4 }
 0xb76   :  { %3203 = vmatprep.subr.bf16.mxu1 %v3583_v31  ;;  %3225 = vmatprep.subr.bf16.mxu0 %v3584_v32  ;;  %v2619_v32 = vrot.slane %v2610_v63, %v3870_v52 }
 0xb79   :  { %3204 = vmatpush3.bf16.msra.mxu1 %v3585_v33  ;;  %3226 = vmatpush3.bf16.msra.mxu0 %v3586_v35  ;;  %v2627_v33 = vrot.slane %v2610_v63, %v2520_v49 }
 0xc1f   :  { %v2291_v61 = vpop.f32.mrb[72].mxu1  ;;  %v2332_v37 = vpop.f32.mrb[64].mxu0 }
 0xc20   :  { %v2293_v6 = vpop.f32.mrb[73].mxu1  ;;  %v2334_v38 = vpop.f32.mrb[65].mxu0 }
 0xc21   :  { %v2295_v44 = vpop.f32.mrb[74].mxu1  ;;  %v2336_v50 = vpop.f32.mrb[66].mxu0 }
 0xc22   :  { %v2296_v45 = vpop.f32.mrb[75].mxu1  ;;  %v2337_v18 = vpop.f32.mrb[67].mxu0 }
 0xc2f   :  { %v2456_v55 = vpop.f32.mrb[76].mxu1  ;;  %v2497_v60 = vpop.f32.mrb[68].mxu0 }
 0xc30   :  { %v2457_v58 = vadd.f32 %v2456_v55, %v2291_v61  ;;  %v2498_v0 = vadd.f32 %v2497_v60, %v2332_v37  ;;  %v2458_v1 = vpop.f32.mrb[77].mxu1  ;;  %v2499_v40 = vpop.f32.mrb[69].mxu0 }
 0xc31   :  { %v2459_v3 = vadd.f32 %v2458_v1, %v2293_v6  ;;  %v2500_v5 = vadd.f32 %v2499_v40, %v2334_v38  ;;  %v2460_v25 = vpop.f32.mrb[78].mxu1  ;;  %v2501_v8 = vpop.f32.mrb[70].mxu0 }
 0xc32   :  { %v2526_v10 = vadd.f32 %v2509_v51, %v2457_v58  ;;  %v2528_v12 = vadd.f32 %v2517_v57, %v2498_v0  ;;  %v2461_v16 = vpop.f32.mrb[79].mxu1  ;;  %v2502_v53 = vpop.f32.mrb[71].mxu0  ;;  %v3087_v57 = vld [vmem:[%s4551_s14] ss:$0 sm:$0xff] }
 0xc33   :  { %v2527_v29 = vadd.f32 %v2513_v17, %v2459_v3  ;;  %v2529_v59 = vadd.f32 %v2521_v56, %v2500_v5 }
 0xc34   :  { %v2552_v30 = vsub.f32 %v2526_v10, %v2535_v62  ;;  %v2554_v20 = vsub.f32 %v2528_v12, %v2543_v34 }
 0xc35   :  { %v2553_v9 = vsub.f32 %v2527_v29, %v2539_v47  ;;  %v2555_v13 = vsub.f32 %v2529_v59, %v2547_v7 }
 0xc36   :  { %v2580_v24 = vmul.f32 %v2563_v11, %v2552_v30  ;;  %v2582_v27 = vmul.f32 %v2571_v46, %v2554_v20 }
 0xc37   :  { %v2581_v43 = vmul.f32 %v2567_v28, %v2553_v9  ;;  %v2583_v31 = vmul.f32 %v2575_v39, %v2555_v13 }
 0xc38   :  { %v2606_v35 = vmul.f32 %v2589_v19, %v2580_v24  ;;  %v2608_v48 = vmul.f32 %v2597_v21, %v2582_v27 }
 0xc39   :  { %v2607_v61 = vmul.f32 %v2593_v36, %v2581_v43  ;;  %v2609_v37 = vmul.f32 %v2601_v22, %v2583_v31 }
 0xc3a   :  { %v2632_v6 = vadd.f32 %v2615_v15, %v2606_v35  ;;  %v2634_v38 = vadd.f32 %v2623_v23, %v2608_v48 }
 0xc3b   :  { %v2633_v44 = vadd.f32 %v2619_v32, %v2607_v61  ;;  %v2635_v50 = vadd.f32 %v2627_v33, %v2609_v37 }
 0xc3c   :  { %v2636_v41 = vmax.f32 %v2632_v6, 0.0  ;;  %v2638_v45 = vmax.f32 %v2634_v38, 0.0 }
 0xc3d   :  { %v2637_v18 = vmax.f32 %v2633_v44, 0.0  ;;  %v2639_v2 = vmax.f32 %v2635_v50, 0.0 }
 0xc3e   :  { %v2640_v4 = vpack.c.bf16 %v2636_v41, %v2636_v41  ;;  %v2642_v51 = vpack.c.bf16 %v2638_v45, %v2638_v45 }
 0xc3f   :  { %v2641_v14 = vpack.c.bf16 %v2637_v18, %v2637_v18  ;;  %v2643_v42 = vpack.c.bf16 %v2639_v2, %v2639_v2 }
 0xc41   :  { %2939 = vmatprep.mubr.bf16.mxu1 %v2641_v14  ;;  %2979 = vmatprep.mubr.bf16.mxu0 %v2643_v42 }
 0xc42   :  { %2940 = vmatmul.mubr.bf16.vlgmr.msra.gmra.mrb[80].mxu1 %v2640_v4  ;;  %2980 = vmatmul.mubr.bf16.vlgmr.msra.gmra.mrb[72].mxu0 %v2642_v51 }
 0xd15   :  { %v3205_v52 = vpop.f32.mrb[80].mxu1  ;;  %v3227_v49 = vpop.f32.mrb[72].mxu0 }
 0xd16   :  { %v3206_v54 = vpop.f32.mrb[81].mxu1  ;;  %v3228_v55 = vpop.f32.mrb[73].mxu0 }
 0xd17   :  { %v3207_v60 = vadd.f32 %v3206_v54, %v3205_v52  ;;  %v3229_v17 = vadd.f32 %v3228_v55, %v3227_v49  ;;  %v3208_v56 = vpop.f32.mrb[82].mxu1  ;;  %v3230_v58 = vpop.f32.mrb[74].mxu0 }
 0xd18   :  { %v3209_v62 = vpop.f32.mrb[83].mxu1  ;;  %v3231_v0 = vpop.f32.mrb[75].mxu0 }
 0xd19   :  { %v2942_v34 = vadd.f32 %v3207_v60, %v3087_v57 }
 0xd1b   :  { %v2982_v1 = vadd.f32 %v3229_v17, %v2942_v34 }
 0xd1d   :  { %2987 = vst [vmem:[#allocation2] sm:$0x3] %v2982_v1 }
 0xd1e   :  { %3668 = shalt.err (!%p3665_p4)
}
 0xd1f   :  { %s3669_s5 = scalar_lea.hbm %s4552_s15, 32 }
 0xd20   :  { %p3670_p5 = scmp.ne.s32.totalorder %s4552_s15, %s3669_s5  ;;  %p3673_p6 = scmp.lt.u32.totalorder %s3669_s5, %s4552_s15 }
 0xd22   :  { %p3675_p7 = pnand %p3673_p6, %p3670_p5 }
 0xd24   :  { %3678 = shalt.err (!%p3675_p7)
}
 0xd25   :  { %2997 = dma.vmem_to_hbm [thread:$0]  %s2995_s2, 32, %s4552_s15, [#allocation3]  }
 0xd26   :  { %3679 = dma.done.wait [#allocation3], 32  }
 0xd27   :  { %3680 = vsyncadd [#allocation3], 4294967264 }
 0xd28   :  { %3001 = vsyncpa [#allocation3], 1 }

</bundles_post_ra>
